<compile_context>
chip_gen: v6e
topology: v6e:2x2x1
jax: 0.10.0
libtpu: 0.0.40
codegen_flags: <defaults>
</compile_context>

<pallas_src>
import functools

import jax
import jax.numpy as jnp
import numpy as np
from jax.experimental import pallas as pl
from jax.experimental.pallas import tpu as pltpu

# --- model hyper-parameters (small, consistent with the forward) -------------
N_LAYERS = 2
D_MODEL = 32
N_HEADS = 4
HEAD_DIM = D_MODEL // N_HEADS
DIM_FF = 64
LN_EPS = 1e-5


# --- in-kernel helpers (traced inside the Pallas kernel) ----------------------
def _layernorm(x, gamma, beta):
    mu = jnp.mean(x, axis=-1, keepdims=True)
    var = jnp.mean((x - mu) ** 2, axis=-1, keepdims=True)
    return (x - mu) * jax.lax.rsqrt(var + LN_EPS) * gamma + beta


def _attention(q, k, v, mask):
    # q: (B, Tq, D), k/v: (B, Tk, D); mask: (Tq, Tk) additive or None.
    # Static unroll over the 4 heads; each contraction is batched over B.
    scale = 1.0 / (HEAD_DIM ** 0.5)
    ctx_heads = []
    for h in range(N_HEADS):
        sl = slice(h * HEAD_DIM, (h + 1) * HEAD_DIM)
        qh, kh, vh = q[..., sl], k[..., sl], v[..., sl]
        s = jnp.einsum("bqd,bkd->bqk", qh, kh,
                       preferred_element_type=jnp.float32) * scale
        if mask is not None:
            s = s + mask
        s = s - jnp.max(s, axis=-1, keepdims=True)
        p = jnp.exp(s)
        inv = pl.reciprocal(jnp.sum(p, axis=-1, keepdims=True), approx=True)
        p = p * inv
        ctx_heads.append(jnp.einsum("bqk,bkd->bqd", p, vh,
                                    preferred_element_type=jnp.float32))
    return jnp.concatenate(ctx_heads, axis=-1)  # (B, Tq, D)


# --- Pallas kernel: full fused decoder stack (all layers, all batch) -----------
def fused_decoder_kernel(x_ref, mem_ref, mask_ref,
                         wqkv_sa, bqkv_sa, wo_sa, bo_sa,
                         wq_ca, bq_ca, wkv_ca, bkv_ca, wo_ca, bo_ca,
                         w1, b1, w2, b2,
                         g1, be1, g2, be2, g3, be3,
                         out_ref, *, B, T, S, L):
    D = D_MODEL
    x = x_ref[...]         # (B*T, D)
    mem = mem_ref[...]     # (B*S, D)
    mask = mask_ref[...]   # (T, T)

    for l in range(L):     # static unroll over layers: activations stay on-chip
        # ---- masked self-attention (fused QKV projection) ----
        qkv = jnp.dot(x, wqkv_sa[l], preferred_element_type=jnp.float32) + bqkv_sa[l]
        q = qkv[:, :D].reshape(B, T, D)
        k = qkv[:, D:2 * D].reshape(B, T, D)
        v = qkv[:, 2 * D:].reshape(B, T, D)
        ctx = _attention(q, k, v, mask).reshape(B * T, D)
        sa = jnp.dot(ctx, wo_sa[l], preferred_element_type=jnp.float32) + bo_sa[l]
        x = _layernorm(x + sa, g1[l], be1[l])

        # ---- cross-attention over encoder memory (fused KV projection) ----
        qc = (jnp.dot(x, wq_ca[l], preferred_element_type=jnp.float32)
              + bq_ca[l]).reshape(B, T, D)
        kv = jnp.dot(mem, wkv_ca[l], preferred_element_type=jnp.float32) + bkv_ca[l]
        kc = kv[:, :D].reshape(B, S, D)
        vc = kv[:, D:].reshape(B, S, D)
        ctx = _attention(qc, kc, vc, None).reshape(B * T, D)
        ca = jnp.dot(ctx, wo_ca[l], preferred_element_type=jnp.float32) + bo_ca[l]
        x = _layernorm(x + ca, g2[l], be2[l])

        # ---- position-wise feed-forward (ReLU) ----
        hdn = jnp.maximum(
            jnp.dot(x, w1[l], preferred_element_type=jnp.float32) + b1[l], 0.0)
        ff = jnp.dot(hdn, w2[l], preferred_element_type=jnp.float32) + b2[l]
        x = _layernorm(x + ff, g3[l], be3[l])

    out_ref[...] = x


# --- wrapper: ONE pallas_call for the whole decoder stack ----------------------
def transformer_decoder_apply(target, memory, target_mask, layer_params_list):
    B, T, D = target.shape
    S = memory.shape[1]
    L = len(layer_params_list)

    def stack(name):
        return jnp.stack([p[name] for p in layer_params_list], axis=0)

    def stack_cat(names):
        return jnp.stack([jnp.concatenate([p[n] for n in names], axis=-1)
                          for p in layer_params_list], axis=0)

    weights = (
        stack_cat(("wq1", "wk1", "wv1")),   # (L, D, 3D)  fused self-attn QKV
        stack_cat(("bq1", "bk1", "bv1")),   # (L, 1, 3D)
        stack("wo1"), stack("bo1"),
        stack("wq2"), stack("bq2"),
        stack_cat(("wk2", "wv2")),          # (L, D, 2D)  fused cross-attn KV
        stack_cat(("bk2", "bv2")),          # (L, 1, 2D)
        stack("wo2"), stack("bo2"),
        stack("w1"), stack("b1"), stack("w2"), stack("b2"),
        stack("g1"), stack("be1"), stack("g2"), stack("be2"), stack("g3"), stack("be3"),
    )

    x_flat = target.reshape(B * T, D)
    mem_flat = memory.reshape(B * S, D)

    kernel = functools.partial(fused_decoder_kernel, B=B, T=T, S=S, L=L)

    def full_spec(a):
        nd = a.ndim
        return pl.BlockSpec(a.shape, lambda i, _nd=nd: (0,) * _nd)

    in_specs = ([full_spec(x_flat), full_spec(mem_flat), full_spec(target_mask)]
                + [full_spec(w) for w in weights])

    out = pl.pallas_call(
        kernel,
        out_shape=jax.ShapeDtypeStruct((B * T, D), jnp.float32),
        grid=(1,),
        in_specs=in_specs,
        out_specs=pl.BlockSpec((B * T, D), lambda i: (0, 0)),
        compiler_params=pltpu.CompilerParams(dimension_semantics=("arbitrary",)),
    )(x_flat, mem_flat, target_mask, *weights)

    return out.reshape(B, T, D)


# --- pure-JAX reference (correctness sanity check) -----------------------------
def _ref_layer(x, mem, mask, p):
    def mha(xq, xkv, wq, bq, wk, bk, wv, bv, wo, bo, m):
        q = xq @ wq + bq
        k = xkv @ wk + bk
        v = xkv @ wv + bv
        B_, Tq, _ = q.shape
        Tk = k.shape[1]
        q = q.reshape(B_, Tq, N_HEADS, HEAD_DIM).transpose(0, 2, 1, 3)
        k = k.reshape(B_, Tk, N_HEADS, HEAD_DIM).transpose(0, 2, 1, 3)
        v = v.reshape(B_, Tk, N_HEADS, HEAD_DIM).transpose(0, 2, 1, 3)
        s = jnp.einsum("bhqd,bhkd->bhqk", q, k) / (HEAD_DIM ** 0.5)
        if m is not None:
            s = s + m[None, None]
        p_ = jax.nn.softmax(s, axis=-1)
        ctx = jnp.einsum("bhqk,bhkd->bhqd", p_, v)
        ctx = ctx.transpose(0, 2, 1, 3).reshape(B_, Tq, D_MODEL)
        return ctx @ wo + bo

    def ln(x_, g, b):
        mu = jnp.mean(x_, axis=-1, keepdims=True)
        var = jnp.mean((x_ - mu) ** 2, axis=-1, keepdims=True)
        return (x_ - mu) * jax.lax.rsqrt(var + LN_EPS) * g + b

    x = ln(x + mha(x, x, p["wq1"], p["bq1"], p["wk1"], p["bk1"],
                   p["wv1"], p["bv1"], p["wo1"], p["bo1"], mask),
           p["g1"], p["be1"])
    x = ln(x + mha(x, mem, p["wq2"], p["bq2"], p["wk2"], p["bk2"],
                   p["wv2"], p["bv2"], p["wo2"], p["bo2"], None),
           p["g2"], p["be2"])
    h = jnp.maximum(x @ p["w1"] + p["b1"], 0.0)
    x = ln(x + h @ p["w2"] + p["b2"], p["g3"], p["be3"])
    return x


def _ref_decoder(target, memory, mask, layer_params_list):
    out = target
    for p in layer_params_list:
        out = _ref_layer(out, memory, mask, p)
    return out


# --- deterministic parameter init ----------------------------------------------
def init_layer_params(key):
    keys = jax.random.split(key, 16)
    ki = iter(keys)

    def w(k, shape):
        return jax.random.normal(k, shape, jnp.float32) * 0.02

    p = {}
    # self-attention
    p["wq1"], p["wk1"], p["wv1"], p["wo1"] = (w(next(ki), (D_MODEL, D_MODEL)) for _ in range(4))
    p["bq1"] = p["bk1"] = p["bv1"] = p["bo1"] = jnp.zeros((1, D_MODEL), jnp.float32)
    # cross-attention
    p["wq2"], p["wk2"], p["wv2"], p["wo2"] = (w(next(ki), (D_MODEL, D_MODEL)) for _ in range(4))
    p["bq2"] = p["bk2"] = p["bv2"] = p["bo2"] = jnp.zeros((1, D_MODEL), jnp.float32)
    # feed-forward
    p["w1"] = w(next(ki), (D_MODEL, DIM_FF))
    p["b1"] = jnp.zeros((1, DIM_FF), jnp.float32)
    p["w2"] = w(next(ki), (DIM_FF, D_MODEL))
    p["b2"] = jnp.zeros((1, D_MODEL), jnp.float32)
    # layer norms
    for g, b in (("g1", "be1"), ("g2", "be2"), ("g3", "be3")):
        p[g] = jnp.ones((1, D_MODEL), jnp.float32)
        p[b] = jnp.zeros((1, D_MODEL), jnp.float32)
    return p


if __name__ == "__main__":
    B, T, S = 2, 8, 8

    root = jax.random.PRNGKey(0)
    k_tgt, k_mem, k_layers = jax.random.split(root, 3)
    target = jax.random.normal(k_tgt, (B, T, D_MODEL), jnp.float32)
    memory = jax.random.normal(k_mem, (B, S, D_MODEL), jnp.float32)

    # causal additive target mask (0 keep, -1e9 masked), like PyTorch attn_mask
    causal = jnp.tril(jnp.ones((T, T), jnp.bool_))
    target_mask = jnp.where(causal, 0.0, -1e9).astype(jnp.float32)

    layer_keys = jax.random.split(k_layers, N_LAYERS)
    layer_params = [init_layer_params(k) for k in layer_keys]

    out = transformer_decoder_apply(target, memory, target_mask, layer_params)
    out = jax.block_until_ready(out)

    ref = jax.block_until_ready(_ref_decoder(target, memory, target_mask, layer_params))
    # tolerance relaxed slightly because the softmax uses the EUP approximate reciprocal
    np.testing.assert_allclose(np.asarray(out), np.asarray(ref), atol=2e-3, rtol=2e-3)

    print("KERNEL_OK")
</pallas_src>

<mosaic_0001>
module attributes {stable_mosaic.version = 11 : i64} {
  func.func @fused_decoder_kernel(%arg0: i32, %arg1: memref<16x32xf32, #tpu.memory_space<vmem>>, %arg2: memref<16x32xf32, #tpu.memory_space<vmem>>, %arg3: memref<8x8xf32, #tpu.memory_space<vmem>>, %arg4: memref<2x32x96xf32, #tpu.memory_space<vmem>>, %arg5: memref<2x1x96xf32, #tpu.memory_space<vmem>>, %arg6: memref<2x32x32xf32, #tpu.memory_space<vmem>>, %arg7: memref<2x1x32xf32, #tpu.memory_space<vmem>>, %arg8: memref<2x32x32xf32, #tpu.memory_space<vmem>>, %arg9: memref<2x1x32xf32, #tpu.memory_space<vmem>>, %arg10: memref<2x32x64xf32, #tpu.memory_space<vmem>>, %arg11: memref<2x1x64xf32, #tpu.memory_space<vmem>>, %arg12: memref<2x32x32xf32, #tpu.memory_space<vmem>>, %arg13: memref<2x1x32xf32, #tpu.memory_space<vmem>>, %arg14: memref<2x32x64xf32, #tpu.memory_space<vmem>>, %arg15: memref<2x1x64xf32, #tpu.memory_space<vmem>>, %arg16: memref<2x64x32xf32, #tpu.memory_space<vmem>>, %arg17: memref<2x1x32xf32, #tpu.memory_space<vmem>>, %arg18: memref<2x1x32xf32, #tpu.memory_space<vmem>>, %arg19: memref<2x1x32xf32, #tpu.memory_space<vmem>>, %arg20: memref<2x1x32xf32, #tpu.memory_space<vmem>>, %arg21: memref<2x1x32xf32, #tpu.memory_space<vmem>>, %arg22: memref<2x1x32xf32, #tpu.memory_space<vmem>>, %arg23: memref<2x1x32xf32, #tpu.memory_space<vmem>>, %arg24: memref<16x32xf32, #tpu.memory_space<vmem>>) attributes {dimension_semantics = [#tpu.dimension_semantics<arbitrary>], iteration_bounds = array<i64: 1>, scalar_prefetch = 0 : i64, scratch_operands = 0 : i64, tpu.core_type = #tpu.core_type<tc>, window_params = [{pipeline_mode = #tpu.pipeline_mode<synchronous>, transform_indices = @transform_0, window_bounds = array<i64: 16, 32>}, {pipeline_mode = #tpu.pipeline_mode<synchronous>, transform_indices = @transform_1, window_bounds = array<i64: 16, 32>}, {pipeline_mode = #tpu.pipeline_mode<synchronous>, transform_indices = @transform_2, window_bounds = array<i64: 8, 8>}, {pipeline_mode = #tpu.pipeline_mode<synchronous>, transform_indices = @transform_3, window_bounds = array<i64: 2, 32, 96>}, {pipeline_mode = #tpu.pipeline_mode<synchronous>, transform_indices = @transform_4, window_bounds = array<i64: 2, 1, 96>}, {pipeline_mode = #tpu.pipeline_mode<synchronous>, transform_indices = @transform_5, window_bounds = array<i64: 2, 32, 32>}, {pipeline_mode = #tpu.pipeline_mode<synchronous>, transform_indices = @transform_6, window_bounds = array<i64: 2, 1, 32>}, {pipeline_mode = #tpu.pipeline_mode<synchronous>, transform_indices = @transform_7, window_bounds = array<i64: 2, 32, 32>}, {pipeline_mode = #tpu.pipeline_mode<synchronous>, transform_indices = @transform_8, window_bounds = array<i64: 2, 1, 32>}, {pipeline_mode = #tpu.pipeline_mode<synchronous>, transform_indices = @transform_9, window_bounds = array<i64: 2, 32, 64>}, {pipeline_mode = #tpu.pipeline_mode<synchronous>, transform_indices = @transform_10, window_bounds = array<i64: 2, 1, 64>}, {pipeline_mode = #tpu.pipeline_mode<synchronous>, transform_indices = @transform_11, window_bounds = array<i64: 2, 32, 32>}, {pipeline_mode = #tpu.pipeline_mode<synchronous>, transform_indices = @transform_12, window_bounds = array<i64: 2, 1, 32>}, {pipeline_mode = #tpu.pipeline_mode<synchronous>, transform_indices = @transform_13, window_bounds = array<i64: 2, 32, 64>}, {pipeline_mode = #tpu.pipeline_mode<synchronous>, transform_indices = @transform_14, window_bounds = array<i64: 2, 1, 64>}, {pipeline_mode = #tpu.pipeline_mode<synchronous>, transform_indices = @transform_15, window_bounds = array<i64: 2, 64, 32>}, {pipeline_mode = #tpu.pipeline_mode<synchronous>, transform_indices = @transform_16, window_bounds = array<i64: 2, 1, 32>}, {pipeline_mode = #tpu.pipeline_mode<synchronous>, transform_indices = @transform_17, window_bounds = array<i64: 2, 1, 32>}, {pipeline_mode = #tpu.pipeline_mode<synchronous>, transform_indices = @transform_18, window_bounds = array<i64: 2, 1, 32>}, {pipeline_mode = #tpu.pipeline_mode<synchronous>, transform_indices = @transform_19, window_bounds = array<i64: 2, 1, 32>}, {pipeline_mode = #tpu.pipeline_mode<synchronous>, transform_indices = @transform_20, window_bounds = array<i64: 2, 1, 32>}, {pipeline_mode = #tpu.pipeline_mode<synchronous>, transform_indices = @transform_21, window_bounds = array<i64: 2, 1, 32>}, {pipeline_mode = #tpu.pipeline_mode<synchronous>, transform_indices = @transform_22, window_bounds = array<i64: 2, 1, 32>}, {pipeline_mode = #tpu.pipeline_mode<synchronous>, transform_indices = @transform_23, window_bounds = array<i64: 16, 32>}]} {
    %c0 = arith.constant 0 : index
    %c0_0 = arith.constant 0 : index
    %0 = vector.load %arg1[%c0, %c0_0] : memref<16x32xf32, #tpu.memory_space<vmem>>, vector<16x32xf32>
    %c0_1 = arith.constant 0 : index
    %c0_2 = arith.constant 0 : index
    %1 = vector.load %arg2[%c0_1, %c0_2] : memref<16x32xf32, #tpu.memory_space<vmem>>, vector<16x32xf32>
    %c0_3 = arith.constant 0 : index
    %c0_4 = arith.constant 0 : index
    %2 = vector.load %arg3[%c0_3, %c0_4] : memref<8x8xf32, #tpu.memory_space<vmem>>, vector<8x8xf32>
    %c0_5 = arith.constant 0 : index
    %c0_6 = arith.constant 0 : index
    %c0_7 = arith.constant 0 : index
    %3 = vector.load %arg4[%c0_5, %c0_6, %c0_7] : memref<2x32x96xf32, #tpu.memory_space<vmem>>, vector<1x32x96xf32>
    %4 = vector.shape_cast %3 : vector<1x32x96xf32> to vector<32x96xf32>
    %cst = arith.constant dense<0.000000e+00> : vector<16x96xf32>
    %5 = tpu.matmul %0, %4, %cst {dimension_numbers = #tpu.dot_dimension_numbers<[1], [0], [0], [1], [0, 0, 1, 1], [], []>} : vector<16x32xf32>, vector<32x96xf32>, vector<16x96xf32> -> vector<16x96xf32>
    %c0_8 = arith.constant 0 : index
    %c0_9 = arith.constant 0 : index
    %c0_10 = arith.constant 0 : index
    %6 = vector.load %arg5[%c0_8, %c0_9, %c0_10] : memref<2x1x96xf32, #tpu.memory_space<vmem>>, vector<1x1x96xf32>
    %7 = vector.shape_cast %6 : vector<1x1x96xf32> to vector<1x96xf32>
    %8 = vector.broadcast %7 : vector<1x96xf32> to vector<16x96xf32>
    %9 = arith.addf %5, %8 : vector<16x96xf32>
    %10 = vector.extract_strided_slice %9 {offsets = [0, 0], sizes = [16, 32], strides = [1, 1]} : vector<16x96xf32> to vector<16x32xf32>
    %11 = vector.shape_cast %10 : vector<16x32xf32> to vector<2x8x32xf32>
    %12 = vector.extract_strided_slice %9 {offsets = [0, 32], sizes = [16, 32], strides = [1, 1]} : vector<16x96xf32> to vector<16x32xf32>
    %13 = vector.shape_cast %12 : vector<16x32xf32> to vector<2x8x32xf32>
    %14 = vector.extract_strided_slice %9 {offsets = [0, 64], sizes = [16, 32], strides = [1, 1]} : vector<16x96xf32> to vector<16x32xf32>
    %15 = vector.shape_cast %14 : vector<16x32xf32> to vector<2x8x32xf32>
    %16 = vector.extract_strided_slice %11 {offsets = [0, 0, 0], sizes = [2, 8, 8], strides = [1, 1, 1]} : vector<2x8x32xf32> to vector<2x8x8xf32>
    %17 = vector.extract_strided_slice %13 {offsets = [0, 0, 0], sizes = [2, 8, 8], strides = [1, 1, 1]} : vector<2x8x32xf32> to vector<2x8x8xf32>
    %18 = vector.extract_strided_slice %15 {offsets = [0, 0, 0], sizes = [2, 8, 8], strides = [1, 1, 1]} : vector<2x8x32xf32> to vector<2x8x8xf32>
    "tpu.trace_start"() <{level = 10 : i32, message = "bqd,bkd->bqk"}> : () -> ()
    %cst_11 = arith.constant dense<0.000000e+00> : vector<2x8x8xf32>
    %19 = tpu.matmul %16, %17, %cst_11 {dimension_numbers = #tpu.dot_dimension_numbers<[2], [2], [1], [1], [0, 0, 0, 1, 1, 1], [0], [0]>} : vector<2x8x8xf32>, vector<2x8x8xf32>, vector<2x8x8xf32> -> vector<2x8x8xf32>
    "tpu.trace_stop"() : () -> ()
    %cst_12 = arith.constant 0.353553385 : f32
    %20 = vector.broadcast %cst_12 : f32 to vector<2x8x8xf32>
    %21 = arith.mulf %19, %20 : vector<2x8x8xf32>
    %22 = vector.shape_cast %2 : vector<8x8xf32> to vector<1x8x8xf32>
    %23 = vector.broadcast %22 : vector<1x8x8xf32> to vector<2x8x8xf32>
    %24 = arith.addf %21, %23 : vector<2x8x8xf32>
    %cst_13 = arith.constant dense<0xFF800000> : vector<2x8xf32>
    %25 = vector.multi_reduction <maximumf>, %24, %cst_13 [2] : vector<2x8x8xf32> to vector<2x8xf32>
    %26 = vector.shape_cast %25 : vector<2x8xf32> to vector<2x8x1xf32>
    %27 = vector.broadcast %26 : vector<2x8x1xf32> to vector<2x8x8xf32>
    %28 = arith.subf %24, %27 : vector<2x8x8xf32>
    %29 = math.exp %28 : vector<2x8x8xf32>
    %cst_14 = arith.constant dense<0.000000e+00> : vector<2x8xf32>
    %30 = vector.multi_reduction <add>, %29, %cst_14 [2] : vector<2x8x8xf32> to vector<2x8xf32>
    %31 = vector.shape_cast %30 : vector<2x8xf32> to vector<2x8x1xf32>
    %32 = tpu.reciprocal %31 {approx = true} : vector<2x8x1xf32> -> vector<2x8x1xf32>
    %33 = vector.broadcast %32 : vector<2x8x1xf32> to vector<2x8x8xf32>
    %34 = arith.mulf %29, %33 : vector<2x8x8xf32>
    "tpu.trace_start"() <{level = 10 : i32, message = "bqk,bkd->bqd"}> : () -> ()
    %cst_15 = arith.constant dense<0.000000e+00> : vector<2x8x8xf32>
    %35 = tpu.matmul %34, %18, %cst_15 {dimension_numbers = #tpu.dot_dimension_numbers<[2], [1], [1], [2], [0, 0, 0, 1, 1, 2], [0], [0]>} : vector<2x8x8xf32>, vector<2x8x8xf32>, vector<2x8x8xf32> -> vector<2x8x8xf32>
    "tpu.trace_stop"() : () -> ()
    %36 = vector.extract_strided_slice %11 {offsets = [0, 0, 8], sizes = [2, 8, 8], strides = [1, 1, 1]} : vector<2x8x32xf32> to vector<2x8x8xf32>
    %37 = vector.extract_strided_slice %13 {offsets = [0, 0, 8], sizes = [2, 8, 8], strides = [1, 1, 1]} : vector<2x8x32xf32> to vector<2x8x8xf32>
    %38 = vector.extract_strided_slice %15 {offsets = [0, 0, 8], sizes = [2, 8, 8], strides = [1, 1, 1]} : vector<2x8x32xf32> to vector<2x8x8xf32>
    "tpu.trace_start"() <{level = 10 : i32, message = "bqd,bkd->bqk"}> : () -> ()
    %cst_16 = arith.constant dense<0.000000e+00> : vector<2x8x8xf32>
    %39 = tpu.matmul %36, %37, %cst_16 {dimension_numbers = #tpu.dot_dimension_numbers<[2], [2], [1], [1], [0, 0, 0, 1, 1, 1], [0], [0]>} : vector<2x8x8xf32>, vector<2x8x8xf32>, vector<2x8x8xf32> -> vector<2x8x8xf32>
    "tpu.trace_stop"() : () -> ()
    %cst_17 = arith.constant 0.353553385 : f32
    %40 = vector.broadcast %cst_17 : f32 to vector<2x8x8xf32>
    %41 = arith.mulf %39, %40 : vector<2x8x8xf32>
    %42 = vector.shape_cast %2 : vector<8x8xf32> to vector<1x8x8xf32>
    %43 = vector.broadcast %42 : vector<1x8x8xf32> to vector<2x8x8xf32>
    %44 = arith.addf %41, %43 : vector<2x8x8xf32>
    %cst_18 = arith.constant dense<0xFF800000> : vector<2x8xf32>
    %45 = vector.multi_reduction <maximumf>, %44, %cst_18 [2] : vector<2x8x8xf32> to vector<2x8xf32>
    %46 = vector.shape_cast %45 : vector<2x8xf32> to vector<2x8x1xf32>
    %47 = vector.broadcast %46 : vector<2x8x1xf32> to vector<2x8x8xf32>
    %48 = arith.subf %44, %47 : vector<2x8x8xf32>
    %49 = math.exp %48 : vector<2x8x8xf32>
    %cst_19 = arith.constant dense<0.000000e+00> : vector<2x8xf32>
    %50 = vector.multi_reduction <add>, %49, %cst_19 [2] : vector<2x8x8xf32> to vector<2x8xf32>
    %51 = vector.shape_cast %50 : vector<2x8xf32> to vector<2x8x1xf32>
    %52 = tpu.reciprocal %51 {approx = true} : vector<2x8x1xf32> -> vector<2x8x1xf32>
    %53 = vector.broadcast %52 : vector<2x8x1xf32> to vector<2x8x8xf32>
    %54 = arith.mulf %49, %53 : vector<2x8x8xf32>
    "tpu.trace_start"() <{level = 10 : i32, message = "bqk,bkd->bqd"}> : () -> ()
    %cst_20 = arith.constant dense<0.000000e+00> : vector<2x8x8xf32>
    %55 = tpu.matmul %54, %38, %cst_20 {dimension_numbers = #tpu.dot_dimension_numbers<[2], [1], [1], [2], [0, 0, 0, 1, 1, 2], [0], [0]>} : vector<2x8x8xf32>, vector<2x8x8xf32>, vector<2x8x8xf32> -> vector<2x8x8xf32>
    "tpu.trace_stop"() : () -> ()
    %56 = vector.extract_strided_slice %11 {offsets = [0, 0, 16], sizes = [2, 8, 8], strides = [1, 1, 1]} : vector<2x8x32xf32> to vector<2x8x8xf32>
    %57 = vector.extract_strided_slice %13 {offsets = [0, 0, 16], sizes = [2, 8, 8], strides = [1, 1, 1]} : vector<2x8x32xf32> to vector<2x8x8xf32>
    %58 = vector.extract_strided_slice %15 {offsets = [0, 0, 16], sizes = [2, 8, 8], strides = [1, 1, 1]} : vector<2x8x32xf32> to vector<2x8x8xf32>
    "tpu.trace_start"() <{level = 10 : i32, message = "bqd,bkd->bqk"}> : () -> ()
    %cst_21 = arith.constant dense<0.000000e+00> : vector<2x8x8xf32>
    %59 = tpu.matmul %56, %57, %cst_21 {dimension_numbers = #tpu.dot_dimension_numbers<[2], [2], [1], [1], [0, 0, 0, 1, 1, 1], [0], [0]>} : vector<2x8x8xf32>, vector<2x8x8xf32>, vector<2x8x8xf32> -> vector<2x8x8xf32>
    "tpu.trace_stop"() : () -> ()
    %cst_22 = arith.constant 0.353553385 : f32
    %60 = vector.broadcast %cst_22 : f32 to vector<2x8x8xf32>
    %61 = arith.mulf %59, %60 : vector<2x8x8xf32>
    %62 = vector.shape_cast %2 : vector<8x8xf32> to vector<1x8x8xf32>
    %63 = vector.broadcast %62 : vector<1x8x8xf32> to vector<2x8x8xf32>
    %64 = arith.addf %61, %63 : vector<2x8x8xf32>
    %cst_23 = arith.constant dense<0xFF800000> : vector<2x8xf32>
    %65 = vector.multi_reduction <maximumf>, %64, %cst_23 [2] : vector<2x8x8xf32> to vector<2x8xf32>
    %66 = vector.shape_cast %65 : vector<2x8xf32> to vector<2x8x1xf32>
    %67 = vector.broadcast %66 : vector<2x8x1xf32> to vector<2x8x8xf32>
    %68 = arith.subf %64, %67 : vector<2x8x8xf32>
    %69 = math.exp %68 : vector<2x8x8xf32>
    %cst_24 = arith.constant dense<0.000000e+00> : vector<2x8xf32>
    %70 = vector.multi_reduction <add>, %69, %cst_24 [2] : vector<2x8x8xf32> to vector<2x8xf32>
    %71 = vector.shape_cast %70 : vector<2x8xf32> to vector<2x8x1xf32>
    %72 = tpu.reciprocal %71 {approx = true} : vector<2x8x1xf32> -> vector<2x8x1xf32>
    %73 = vector.broadcast %72 : vector<2x8x1xf32> to vector<2x8x8xf32>
    %74 = arith.mulf %69, %73 : vector<2x8x8xf32>
    "tpu.trace_start"() <{level = 10 : i32, message = "bqk,bkd->bqd"}> : () -> ()
    %cst_25 = arith.constant dense<0.000000e+00> : vector<2x8x8xf32>
    %75 = tpu.matmul %74, %58, %cst_25 {dimension_numbers = #tpu.dot_dimension_numbers<[2], [1], [1], [2], [0, 0, 0, 1, 1, 2], [0], [0]>} : vector<2x8x8xf32>, vector<2x8x8xf32>, vector<2x8x8xf32> -> vector<2x8x8xf32>
    "tpu.trace_stop"() : () -> ()
    %76 = vector.extract_strided_slice %11 {offsets = [0, 0, 24], sizes = [2, 8, 8], strides = [1, 1, 1]} : vector<2x8x32xf32> to vector<2x8x8xf32>
    %77 = vector.extract_strided_slice %13 {offsets = [0, 0, 24], sizes = [2, 8, 8], strides = [1, 1, 1]} : vector<2x8x32xf32> to vector<2x8x8xf32>
    %78 = vector.extract_strided_slice %15 {offsets = [0, 0, 24], sizes = [2, 8, 8], strides = [1, 1, 1]} : vector<2x8x32xf32> to vector<2x8x8xf32>
    "tpu.trace_start"() <{level = 10 : i32, message = "bqd,bkd->bqk"}> : () -> ()
    %cst_26 = arith.constant dense<0.000000e+00> : vector<2x8x8xf32>
    %79 = tpu.matmul %76, %77, %cst_26 {dimension_numbers = #tpu.dot_dimension_numbers<[2], [2], [1], [1], [0, 0, 0, 1, 1, 1], [0], [0]>} : vector<2x8x8xf32>, vector<2x8x8xf32>, vector<2x8x8xf32> -> vector<2x8x8xf32>
    "tpu.trace_stop"() : () -> ()
    %cst_27 = arith.constant 0.353553385 : f32
    %80 = vector.broadcast %cst_27 : f32 to vector<2x8x8xf32>
    %81 = arith.mulf %79, %80 : vector<2x8x8xf32>
    %82 = vector.shape_cast %2 : vector<8x8xf32> to vector<1x8x8xf32>
    %83 = vector.broadcast %82 : vector<1x8x8xf32> to vector<2x8x8xf32>
    %84 = arith.addf %81, %83 : vector<2x8x8xf32>
    %cst_28 = arith.constant dense<0xFF800000> : vector<2x8xf32>
    %85 = vector.multi_reduction <maximumf>, %84, %cst_28 [2] : vector<2x8x8xf32> to vector<2x8xf32>
    %86 = vector.shape_cast %85 : vector<2x8xf32> to vector<2x8x1xf32>
    %87 = vector.broadcast %86 : vector<2x8x1xf32> to vector<2x8x8xf32>
    %88 = arith.subf %84, %87 : vector<2x8x8xf32>
    %89 = math.exp %88 : vector<2x8x8xf32>
    %cst_29 = arith.constant dense<0.000000e+00> : vector<2x8xf32>
    %90 = vector.multi_reduction <add>, %89, %cst_29 [2] : vector<2x8x8xf32> to vector<2x8xf32>
    %91 = vector.shape_cast %90 : vector<2x8xf32> to vector<2x8x1xf32>
    %92 = tpu.reciprocal %91 {approx = true} : vector<2x8x1xf32> -> vector<2x8x1xf32>
    %93 = vector.broadcast %92 : vector<2x8x1xf32> to vector<2x8x8xf32>
    %94 = arith.mulf %89, %93 : vector<2x8x8xf32>
    "tpu.trace_start"() <{level = 10 : i32, message = "bqk,bkd->bqd"}> : () -> ()
    %cst_30 = arith.constant dense<0.000000e+00> : vector<2x8x8xf32>
    %95 = tpu.matmul %94, %78, %cst_30 {dimension_numbers = #tpu.dot_dimension_numbers<[2], [1], [1], [2], [0, 0, 0, 1, 1, 2], [0], [0]>} : vector<2x8x8xf32>, vector<2x8x8xf32>, vector<2x8x8xf32> -> vector<2x8x8xf32>
    "tpu.trace_stop"() : () -> ()
    %96 = tpu.concatenate %35, %55, %75, %95 in 2 : vector<2x8x8xf32>, vector<2x8x8xf32>, vector<2x8x8xf32>, vector<2x8x8xf32> -> vector<2x8x32xf32>
    %97 = vector.shape_cast %96 : vector<2x8x32xf32> to vector<16x32xf32>
    %c0_31 = arith.constant 0 : index
    %c0_32 = arith.constant 0 : index
    %c0_33 = arith.constant 0 : index
    %98 = vector.load %arg6[%c0_31, %c0_32, %c0_33] : memref<2x32x32xf32, #tpu.memory_space<vmem>>, vector<1x32x32xf32>
    %99 = vector.shape_cast %98 : vector<1x32x32xf32> to vector<32x32xf32>
    %cst_34 = arith.constant dense<0.000000e+00> : vector<16x32xf32>
    %100 = tpu.matmul %97, %99, %cst_34 {dimension_numbers = #tpu.dot_dimension_numbers<[1], [0], [0], [1], [0, 0, 1, 1], [], []>} : vector<16x32xf32>, vector<32x32xf32>, vector<16x32xf32> -> vector<16x32xf32>
    %c0_35 = arith.constant 0 : index
    %c0_36 = arith.constant 0 : index
    %c0_37 = arith.constant 0 : index
    %101 = vector.load %arg7[%c0_35, %c0_36, %c0_37] : memref<2x1x32xf32, #tpu.memory_space<vmem>>, vector<1x1x32xf32>
    %102 = vector.shape_cast %101 : vector<1x1x32xf32> to vector<1x32xf32>
    %103 = vector.broadcast %102 : vector<1x32xf32> to vector<16x32xf32>
    %104 = arith.addf %100, %103 : vector<16x32xf32>
    %105 = arith.addf %0, %104 : vector<16x32xf32>
    %c0_38 = arith.constant 0 : index
    %c0_39 = arith.constant 0 : index
    %c0_40 = arith.constant 0 : index
    %106 = vector.load %arg18[%c0_38, %c0_39, %c0_40] : memref<2x1x32xf32, #tpu.memory_space<vmem>>, vector<1x1x32xf32>
    %107 = vector.shape_cast %106 : vector<1x1x32xf32> to vector<1x32xf32>
    %c0_41 = arith.constant 0 : index
    %c0_42 = arith.constant 0 : index
    %c0_43 = arith.constant 0 : index
    %108 = vector.load %arg19[%c0_41, %c0_42, %c0_43] : memref<2x1x32xf32, #tpu.memory_space<vmem>>, vector<1x1x32xf32>
    %109 = vector.shape_cast %108 : vector<1x1x32xf32> to vector<1x32xf32>
    %cst_44 = arith.constant dense<0.000000e+00> : vector<16xf32>
    %110 = vector.multi_reduction <add>, %105, %cst_44 [1] : vector<16x32xf32> to vector<16xf32>
    %111 = vector.shape_cast %110 : vector<16xf32> to vector<16x1xf32>
    %cst_45 = arith.constant 3.200000e+01 : f32
    %112 = vector.broadcast %cst_45 : f32 to vector<16x1xf32>
    %113 = arith.divf %111, %112 : vector<16x1xf32>
    %114 = vector.broadcast %113 : vector<16x1xf32> to vector<16x32xf32>
    %115 = arith.subf %105, %114 : vector<16x32xf32>
    %116 = arith.mulf %115, %115 : vector<16x32xf32>
    %cst_46 = arith.constant dense<0.000000e+00> : vector<16xf32>
    %117 = vector.multi_reduction <add>, %116, %cst_46 [1] : vector<16x32xf32> to vector<16xf32>
    %118 = vector.shape_cast %117 : vector<16xf32> to vector<16x1xf32>
    %cst_47 = arith.constant 3.200000e+01 : f32
    %119 = vector.broadcast %cst_47 : f32 to vector<16x1xf32>
    %120 = arith.divf %118, %119 : vector<16x1xf32>
    %121 = vector.broadcast %113 : vector<16x1xf32> to vector<16x32xf32>
    %122 = arith.subf %105, %121 : vector<16x32xf32>
    %cst_48 = arith.constant 9.99999974E-6 : f32
    %123 = vector.broadcast %cst_48 : f32 to vector<16x1xf32>
    %124 = arith.addf %120, %123 : vector<16x1xf32>
    %125 = math.rsqrt %124 : vector<16x1xf32>
    %126 = vector.broadcast %125 : vector<16x1xf32> to vector<16x32xf32>
    %127 = arith.mulf %122, %126 : vector<16x32xf32>
    %128 = vector.broadcast %107 : vector<1x32xf32> to vector<16x32xf32>
    %129 = arith.mulf %127, %128 : vector<16x32xf32>
    %130 = vector.broadcast %109 : vector<1x32xf32> to vector<16x32xf32>
    %131 = arith.addf %129, %130 : vector<16x32xf32>
    %c0_49 = arith.constant 0 : index
    %c0_50 = arith.constant 0 : index
    %c0_51 = arith.constant 0 : index
    %132 = vector.load %arg8[%c0_49, %c0_50, %c0_51] : memref<2x32x32xf32, #tpu.memory_space<vmem>>, vector<1x32x32xf32>
    %133 = vector.shape_cast %132 : vector<1x32x32xf32> to vector<32x32xf32>
    %cst_52 = arith.constant dense<0.000000e+00> : vector<16x32xf32>
    %134 = tpu.matmul %131, %133, %cst_52 {dimension_numbers = #tpu.dot_dimension_numbers<[1], [0], [0], [1], [0, 0, 1, 1], [], []>} : vector<16x32xf32>, vector<32x32xf32>, vector<16x32xf32> -> vector<16x32xf32>
    %c0_53 = arith.constant 0 : index
    %c0_54 = arith.constant 0 : index
    %c0_55 = arith.constant 0 : index
    %135 = vector.load %arg9[%c0_53, %c0_54, %c0_55] : memref<2x1x32xf32, #tpu.memory_space<vmem>>, vector<1x1x32xf32>
    %136 = vector.shape_cast %135 : vector<1x1x32xf32> to vector<1x32xf32>
    %137 = vector.broadcast %136 : vector<1x32xf32> to vector<16x32xf32>
    %138 = arith.addf %134, %137 : vector<16x32xf32>
    %139 = vector.shape_cast %138 : vector<16x32xf32> to vector<2x8x32xf32>
    %c0_56 = arith.constant 0 : index
    %c0_57 = arith.constant 0 : index
    %c0_58 = arith.constant 0 : index
    %140 = vector.load %arg10[%c0_56, %c0_57, %c0_58] : memref<2x32x64xf32, #tpu.memory_space<vmem>>, vector<1x32x64xf32>
    %141 = vector.shape_cast %140 : vector<1x32x64xf32> to vector<32x64xf32>
    %cst_59 = arith.constant dense<0.000000e+00> : vector<16x64xf32>
    %142 = tpu.matmul %1, %141, %cst_59 {dimension_numbers = #tpu.dot_dimension_numbers<[1], [0], [0], [1], [0, 0, 1, 1], [], []>} : vector<16x32xf32>, vector<32x64xf32>, vector<16x64xf32> -> vector<16x64xf32>
    %c0_60 = arith.constant 0 : index
    %c0_61 = arith.constant 0 : index
    %c0_62 = arith.constant 0 : index
    %143 = vector.load %arg11[%c0_60, %c0_61, %c0_62] : memref<2x1x64xf32, #tpu.memory_space<vmem>>, vector<1x1x64xf32>
    %144 = vector.shape_cast %143 : vector<1x1x64xf32> to vector<1x64xf32>
    %145 = vector.broadcast %144 : vector<1x64xf32> to vector<16x64xf32>
    %146 = arith.addf %142, %145 : vector<16x64xf32>
    %147 = vector.extract_strided_slice %146 {offsets = [0, 0], sizes = [16, 32], strides = [1, 1]} : vector<16x64xf32> to vector<16x32xf32>
    %148 = vector.shape_cast %147 : vector<16x32xf32> to vector<2x8x32xf32>
    %149 = vector.extract_strided_slice %146 {offsets = [0, 32], sizes = [16, 32], strides = [1, 1]} : vector<16x64xf32> to vector<16x32xf32>
    %150 = vector.shape_cast %149 : vector<16x32xf32> to vector<2x8x32xf32>
    %151 = vector.extract_strided_slice %139 {offsets = [0, 0, 0], sizes = [2, 8, 8], strides = [1, 1, 1]} : vector<2x8x32xf32> to vector<2x8x8xf32>
    %152 = vector.extract_strided_slice %148 {offsets = [0, 0, 0], sizes = [2, 8, 8], strides = [1, 1, 1]} : vector<2x8x32xf32> to vector<2x8x8xf32>
    %153 = vector.extract_strided_slice %150 {offsets = [0, 0, 0], sizes = [2, 8, 8], strides = [1, 1, 1]} : vector<2x8x32xf32> to vector<2x8x8xf32>
    "tpu.trace_start"() <{level = 10 : i32, message = "bqd,bkd->bqk"}> : () -> ()
    %cst_63 = arith.constant dense<0.000000e+00> : vector<2x8x8xf32>
    %154 = tpu.matmul %151, %152, %cst_63 {dimension_numbers = #tpu.dot_dimension_numbers<[2], [2], [1], [1], [0, 0, 0, 1, 1, 1], [0], [0]>} : vector<2x8x8xf32>, vector<2x8x8xf32>, vector<2x8x8xf32> -> vector<2x8x8xf32>
    "tpu.trace_stop"() : () -> ()
    %cst_64 = arith.constant 0.353553385 : f32
    %155 = vector.broadcast %cst_64 : f32 to vector<2x8x8xf32>
    %156 = arith.mulf %154, %155 : vector<2x8x8xf32>
    %cst_65 = arith.constant dense<0xFF800000> : vector<2x8xf32>
    %157 = vector.multi_reduction <maximumf>, %156, %cst_65 [2] : vector<2x8x8xf32> to vector<2x8xf32>
    %158 = vector.shape_cast %157 : vector<2x8xf32> to vector<2x8x1xf32>
    %159 = vector.broadcast %158 : vector<2x8x1xf32> to vector<2x8x8xf32>
    %160 = arith.subf %156, %159 : vector<2x8x8xf32>
    %161 = math.exp %160 : vector<2x8x8xf32>
    %cst_66 = arith.constant dense<0.000000e+00> : vector<2x8xf32>
    %162 = vector.multi_reduction <add>, %161, %cst_66 [2] : vector<2x8x8xf32> to vector<2x8xf32>
    %163 = vector.shape_cast %162 : vector<2x8xf32> to vector<2x8x1xf32>
    %164 = tpu.reciprocal %163 {approx = true} : vector<2x8x1xf32> -> vector<2x8x1xf32>
    %165 = vector.broadcast %164 : vector<2x8x1xf32> to vector<2x8x8xf32>
    %166 = arith.mulf %161, %165 : vector<2x8x8xf32>
    "tpu.trace_start"() <{level = 10 : i32, message = "bqk,bkd->bqd"}> : () -> ()
    %cst_67 = arith.constant dense<0.000000e+00> : vector<2x8x8xf32>
    %167 = tpu.matmul %166, %153, %cst_67 {dimension_numbers = #tpu.dot_dimension_numbers<[2], [1], [1], [2], [0, 0, 0, 1, 1, 2], [0], [0]>} : vector<2x8x8xf32>, vector<2x8x8xf32>, vector<2x8x8xf32> -> vector<2x8x8xf32>
    "tpu.trace_stop"() : () -> ()
    %168 = vector.extract_strided_slice %139 {offsets = [0, 0, 8], sizes = [2, 8, 8], strides = [1, 1, 1]} : vector<2x8x32xf32> to vector<2x8x8xf32>
    %169 = vector.extract_strided_slice %148 {offsets = [0, 0, 8], sizes = [2, 8, 8], strides = [1, 1, 1]} : vector<2x8x32xf32> to vector<2x8x8xf32>
    %170 = vector.extract_strided_slice %150 {offsets = [0, 0, 8], sizes = [2, 8, 8], strides = [1, 1, 1]} : vector<2x8x32xf32> to vector<2x8x8xf32>
    "tpu.trace_start"() <{level = 10 : i32, message = "bqd,bkd->bqk"}> : () -> ()
    %cst_68 = arith.constant dense<0.000000e+00> : vector<2x8x8xf32>
    %171 = tpu.matmul %168, %169, %cst_68 {dimension_numbers = #tpu.dot_dimension_numbers<[2], [2], [1], [1], [0, 0, 0, 1, 1, 1], [0], [0]>} : vector<2x8x8xf32>, vector<2x8x8xf32>, vector<2x8x8xf32> -> vector<2x8x8xf32>
    "tpu.trace_stop"() : () -> ()
    %cst_69 = arith.constant 0.353553385 : f32
    %172 = vector.broadcast %cst_69 : f32 to vector<2x8x8xf32>
    %173 = arith.mulf %171, %172 : vector<2x8x8xf32>
    %cst_70 = arith.constant dense<0xFF800000> : vector<2x8xf32>
    %174 = vector.multi_reduction <maximumf>, %173, %cst_70 [2] : vector<2x8x8xf32> to vector<2x8xf32>
    %175 = vector.shape_cast %174 : vector<2x8xf32> to vector<2x8x1xf32>
    %176 = vector.broadcast %175 : vector<2x8x1xf32> to vector<2x8x8xf32>
    %177 = arith.subf %173, %176 : vector<2x8x8xf32>
    %178 = math.exp %177 : vector<2x8x8xf32>
    %cst_71 = arith.constant dense<0.000000e+00> : vector<2x8xf32>
    %179 = vector.multi_reduction <add>, %178, %cst_71 [2] : vector<2x8x8xf32> to vector<2x8xf32>
    %180 = vector.shape_cast %179 : vector<2x8xf32> to vector<2x8x1xf32>
    %181 = tpu.reciprocal %180 {approx = true} : vector<2x8x1xf32> -> vector<2x8x1xf32>
    %182 = vector.broadcast %181 : vector<2x8x1xf32> to vector<2x8x8xf32>
    %183 = arith.mulf %178, %182 : vector<2x8x8xf32>
    "tpu.trace_start"() <{level = 10 : i32, message = "bqk,bkd->bqd"}> : () -> ()
    %cst_72 = arith.constant dense<0.000000e+00> : vector<2x8x8xf32>
    %184 = tpu.matmul %183, %170, %cst_72 {dimension_numbers = #tpu.dot_dimension_numbers<[2], [1], [1], [2], [0, 0, 0, 1, 1, 2], [0], [0]>} : vector<2x8x8xf32>, vector<2x8x8xf32>, vector<2x8x8xf32> -> vector<2x8x8xf32>
    "tpu.trace_stop"() : () -> ()
    %185 = vector.extract_strided_slice %139 {offsets = [0, 0, 16], sizes = [2, 8, 8], strides = [1, 1, 1]} : vector<2x8x32xf32> to vector<2x8x8xf32>
    %186 = vector.extract_strided_slice %148 {offsets = [0, 0, 16], sizes = [2, 8, 8], strides = [1, 1, 1]} : vector<2x8x32xf32> to vector<2x8x8xf32>
    %187 = vector.extract_strided_slice %150 {offsets = [0, 0, 16], sizes = [2, 8, 8], strides = [1, 1, 1]} : vector<2x8x32xf32> to vector<2x8x8xf32>
    "tpu.trace_start"() <{level = 10 : i32, message = "bqd,bkd->bqk"}> : () -> ()
    %cst_73 = arith.constant dense<0.000000e+00> : vector<2x8x8xf32>
    %188 = tpu.matmul %185, %186, %cst_73 {dimension_numbers = #tpu.dot_dimension_numbers<[2], [2], [1], [1], [0, 0, 0, 1, 1, 1], [0], [0]>} : vector<2x8x8xf32>, vector<2x8x8xf32>, vector<2x8x8xf32> -> vector<2x8x8xf32>
    "tpu.trace_stop"() : () -> ()
    %cst_74 = arith.constant 0.353553385 : f32
    %189 = vector.broadcast %cst_74 : f32 to vector<2x8x8xf32>
    %190 = arith.mulf %188, %189 : vector<2x8x8xf32>
    %cst_75 = arith.constant dense<0xFF800000> : vector<2x8xf32>
    %191 = vector.multi_reduction <maximumf>, %190, %cst_75 [2] : vector<2x8x8xf32> to vector<2x8xf32>
    %192 = vector.shape_cast %191 : vector<2x8xf32> to vector<2x8x1xf32>
    %193 = vector.broadcast %192 : vector<2x8x1xf32> to vector<2x8x8xf32>
    %194 = arith.subf %190, %193 : vector<2x8x8xf32>
    %195 = math.exp %194 : vector<2x8x8xf32>
    %cst_76 = arith.constant dense<0.000000e+00> : vector<2x8xf32>
    %196 = vector.multi_reduction <add>, %195, %cst_76 [2] : vector<2x8x8xf32> to vector<2x8xf32>
    %197 = vector.shape_cast %196 : vector<2x8xf32> to vector<2x8x1xf32>
    %198 = tpu.reciprocal %197 {approx = true} : vector<2x8x1xf32> -> vector<2x8x1xf32>
    %199 = vector.broadcast %198 : vector<2x8x1xf32> to vector<2x8x8xf32>
    %200 = arith.mulf %195, %199 : vector<2x8x8xf32>
    "tpu.trace_start"() <{level = 10 : i32, message = "bqk,bkd->bqd"}> : () -> ()
    %cst_77 = arith.constant dense<0.000000e+00> : vector<2x8x8xf32>
    %201 = tpu.matmul %200, %187, %cst_77 {dimension_numbers = #tpu.dot_dimension_numbers<[2], [1], [1], [2], [0, 0, 0, 1, 1, 2], [0], [0]>} : vector<2x8x8xf32>, vector<2x8x8xf32>, vector<2x8x8xf32> -> vector<2x8x8xf32>
    "tpu.trace_stop"() : () -> ()
    %202 = vector.extract_strided_slice %139 {offsets = [0, 0, 24], sizes = [2, 8, 8], strides = [1, 1, 1]} : vector<2x8x32xf32> to vector<2x8x8xf32>
    %203 = vector.extract_strided_slice %148 {offsets = [0, 0, 24], sizes = [2, 8, 8], strides = [1, 1, 1]} : vector<2x8x32xf32> to vector<2x8x8xf32>
    %204 = vector.extract_strided_slice %150 {offsets = [0, 0, 24], sizes = [2, 8, 8], strides = [1, 1, 1]} : vector<2x8x32xf32> to vector<2x8x8xf32>
    "tpu.trace_start"() <{level = 10 : i32, message = "bqd,bkd->bqk"}> : () -> ()
    %cst_78 = arith.constant dense<0.000000e+00> : vector<2x8x8xf32>
    %205 = tpu.matmul %202, %203, %cst_78 {dimension_numbers = #tpu.dot_dimension_numbers<[2], [2], [1], [1], [0, 0, 0, 1, 1, 1], [0], [0]>} : vector<2x8x8xf32>, vector<2x8x8xf32>, vector<2x8x8xf32> -> vector<2x8x8xf32>
    "tpu.trace_stop"() : () -> ()
    %cst_79 = arith.constant 0.353553385 : f32
    %206 = vector.broadcast %cst_79 : f32 to vector<2x8x8xf32>
    %207 = arith.mulf %205, %206 : vector<2x8x8xf32>
    %cst_80 = arith.constant dense<0xFF800000> : vector<2x8xf32>
    %208 = vector.multi_reduction <maximumf>, %207, %cst_80 [2] : vector<2x8x8xf32> to vector<2x8xf32>
    %209 = vector.shape_cast %208 : vector<2x8xf32> to vector<2x8x1xf32>
    %210 = vector.broadcast %209 : vector<2x8x1xf32> to vector<2x8x8xf32>
    %211 = arith.subf %207, %210 : vector<2x8x8xf32>
    %212 = math.exp %211 : vector<2x8x8xf32>
    %cst_81 = arith.constant dense<0.000000e+00> : vector<2x8xf32>
    %213 = vector.multi_reduction <add>, %212, %cst_81 [2] : vector<2x8x8xf32> to vector<2x8xf32>
    %214 = vector.shape_cast %213 : vector<2x8xf32> to vector<2x8x1xf32>
    %215 = tpu.reciprocal %214 {approx = true} : vector<2x8x1xf32> -> vector<2x8x1xf32>
    %216 = vector.broadcast %215 : vector<2x8x1xf32> to vector<2x8x8xf32>
    %217 = arith.mulf %212, %216 : vector<2x8x8xf32>
    "tpu.trace_start"() <{level = 10 : i32, message = "bqk,bkd->bqd"}> : () -> ()
    %cst_82 = arith.constant dense<0.000000e+00> : vector<2x8x8xf32>
    %218 = tpu.matmul %217, %204, %cst_82 {dimension_numbers = #tpu.dot_dimension_numbers<[2], [1], [1], [2], [0, 0, 0, 1, 1, 2], [0], [0]>} : vector<2x8x8xf32>, vector<2x8x8xf32>, vector<2x8x8xf32> -> vector<2x8x8xf32>
    "tpu.trace_stop"() : () -> ()
    %219 = tpu.concatenate %167, %184, %201, %218 in 2 : vector<2x8x8xf32>, vector<2x8x8xf32>, vector<2x8x8xf32>, vector<2x8x8xf32> -> vector<2x8x32xf32>
    %220 = vector.shape_cast %219 : vector<2x8x32xf32> to vector<16x32xf32>
    %c0_83 = arith.constant 0 : index
    %c0_84 = arith.constant 0 : index
    %c0_85 = arith.constant 0 : index
    %221 = vector.load %arg12[%c0_83, %c0_84, %c0_85] : memref<2x32x32xf32, #tpu.memory_space<vmem>>, vector<1x32x32xf32>
    %222 = vector.shape_cast %221 : vector<1x32x32xf32> to vector<32x32xf32>
    %cst_86 = arith.constant dense<0.000000e+00> : vector<16x32xf32>
    %223 = tpu.matmul %220, %222, %cst_86 {dimension_numbers = #tpu.dot_dimension_numbers<[1], [0], [0], [1], [0, 0, 1, 1], [], []>} : vector<16x32xf32>, vector<32x32xf32>, vector<16x32xf32> -> vector<16x32xf32>
    %c0_87 = arith.constant 0 : index
    %c0_88 = arith.constant 0 : index
    %c0_89 = arith.constant 0 : index
    %224 = vector.load %arg13[%c0_87, %c0_88, %c0_89] : memref<2x1x32xf32, #tpu.memory_space<vmem>>, vector<1x1x32xf32>
    %225 = vector.shape_cast %224 : vector<1x1x32xf32> to vector<1x32xf32>
    %226 = vector.broadcast %225 : vector<1x32xf32> to vector<16x32xf32>
    %227 = arith.addf %223, %226 : vector<16x32xf32>
    %228 = arith.addf %131, %227 : vector<16x32xf32>
    %c0_90 = arith.constant 0 : index
    %c0_91 = arith.constant 0 : index
    %c0_92 = arith.constant 0 : index
    %229 = vector.load %arg20[%c0_90, %c0_91, %c0_92] : memref<2x1x32xf32, #tpu.memory_space<vmem>>, vector<1x1x32xf32>
    %230 = vector.shape_cast %229 : vector<1x1x32xf32> to vector<1x32xf32>
    %c0_93 = arith.constant 0 : index
    %c0_94 = arith.constant 0 : index
    %c0_95 = arith.constant 0 : index
    %231 = vector.load %arg21[%c0_93, %c0_94, %c0_95] : memref<2x1x32xf32, #tpu.memory_space<vmem>>, vector<1x1x32xf32>
    %232 = vector.shape_cast %231 : vector<1x1x32xf32> to vector<1x32xf32>
    %cst_96 = arith.constant dense<0.000000e+00> : vector<16xf32>
    %233 = vector.multi_reduction <add>, %228, %cst_96 [1] : vector<16x32xf32> to vector<16xf32>
    %234 = vector.shape_cast %233 : vector<16xf32> to vector<16x1xf32>
    %cst_97 = arith.constant 3.200000e+01 : f32
    %235 = vector.broadcast %cst_97 : f32 to vector<16x1xf32>
    %236 = arith.divf %234, %235 : vector<16x1xf32>
    %237 = vector.broadcast %236 : vector<16x1xf32> to vector<16x32xf32>
    %238 = arith.subf %228, %237 : vector<16x32xf32>
    %239 = arith.mulf %238, %238 : vector<16x32xf32>
    %cst_98 = arith.constant dense<0.000000e+00> : vector<16xf32>
    %240 = vector.multi_reduction <add>, %239, %cst_98 [1] : vector<16x32xf32> to vector<16xf32>
    %241 = vector.shape_cast %240 : vector<16xf32> to vector<16x1xf32>
    %cst_99 = arith.constant 3.200000e+01 : f32
    %242 = vector.broadcast %cst_99 : f32 to vector<16x1xf32>
    %243 = arith.divf %241, %242 : vector<16x1xf32>
    %244 = vector.broadcast %236 : vector<16x1xf32> to vector<16x32xf32>
    %245 = arith.subf %228, %244 : vector<16x32xf32>
    %cst_100 = arith.constant 9.99999974E-6 : f32
    %246 = vector.broadcast %cst_100 : f32 to vector<16x1xf32>
    %247 = arith.addf %243, %246 : vector<16x1xf32>
    %248 = math.rsqrt %247 : vector<16x1xf32>
    %249 = vector.broadcast %248 : vector<16x1xf32> to vector<16x32xf32>
    %250 = arith.mulf %245, %249 : vector<16x32xf32>
    %251 = vector.broadcast %230 : vector<1x32xf32> to vector<16x32xf32>
    %252 = arith.mulf %250, %251 : vector<16x32xf32>
    %253 = vector.broadcast %232 : vector<1x32xf32> to vector<16x32xf32>
    %254 = arith.addf %252, %253 : vector<16x32xf32>
    %c0_101 = arith.constant 0 : index
    %c0_102 = arith.constant 0 : index
    %c0_103 = arith.constant 0 : index
    %255 = vector.load %arg14[%c0_101, %c0_102, %c0_103] : memref<2x32x64xf32, #tpu.memory_space<vmem>>, vector<1x32x64xf32>
    %256 = vector.shape_cast %255 : vector<1x32x64xf32> to vector<32x64xf32>
    %cst_104 = arith.constant dense<0.000000e+00> : vector<16x64xf32>
    %257 = tpu.matmul %254, %256, %cst_104 {dimension_numbers = #tpu.dot_dimension_numbers<[1], [0], [0], [1], [0, 0, 1, 1], [], []>} : vector<16x32xf32>, vector<32x64xf32>, vector<16x64xf32> -> vector<16x64xf32>
    %c0_105 = arith.constant 0 : index
    %c0_106 = arith.constant 0 : index
    %c0_107 = arith.constant 0 : index
    %258 = vector.load %arg15[%c0_105, %c0_106, %c0_107] : memref<2x1x64xf32, #tpu.memory_space<vmem>>, vector<1x1x64xf32>
    %259 = vector.shape_cast %258 : vector<1x1x64xf32> to vector<1x64xf32>
    %260 = vector.broadcast %259 : vector<1x64xf32> to vector<16x64xf32>
    %261 = arith.addf %257, %260 : vector<16x64xf32>
    %cst_108 = arith.constant 0.000000e+00 : f32
    %262 = vector.broadcast %cst_108 : f32 to vector<16x64xf32>
    %263 = arith.maximumf %261, %262 : vector<16x64xf32>
    %c0_109 = arith.constant 0 : index
    %c0_110 = arith.constant 0 : index
    %c0_111 = arith.constant 0 : index
    %264 = vector.load %arg16[%c0_109, %c0_110, %c0_111] : memref<2x64x32xf32, #tpu.memory_space<vmem>>, vector<1x64x32xf32>
    %265 = vector.shape_cast %264 : vector<1x64x32xf32> to vector<64x32xf32>
    %cst_112 = arith.constant dense<0.000000e+00> : vector<16x32xf32>
    %266 = tpu.matmul %263, %265, %cst_112 {dimension_numbers = #tpu.dot_dimension_numbers<[1], [0], [0], [1], [0, 0, 1, 1], [], []>} : vector<16x64xf32>, vector<64x32xf32>, vector<16x32xf32> -> vector<16x32xf32>
    %c0_113 = arith.constant 0 : index
    %c0_114 = arith.constant 0 : index
    %c0_115 = arith.constant 0 : index
    %267 = vector.load %arg17[%c0_113, %c0_114, %c0_115] : memref<2x1x32xf32, #tpu.memory_space<vmem>>, vector<1x1x32xf32>
    %268 = vector.shape_cast %267 : vector<1x1x32xf32> to vector<1x32xf32>
    %269 = vector.broadcast %268 : vector<1x32xf32> to vector<16x32xf32>
    %270 = arith.addf %266, %269 : vector<16x32xf32>
    %271 = arith.addf %254, %270 : vector<16x32xf32>
    %c0_116 = arith.constant 0 : index
    %c0_117 = arith.constant 0 : index
    %c0_118 = arith.constant 0 : index
    %272 = vector.load %arg22[%c0_116, %c0_117, %c0_118] : memref<2x1x32xf32, #tpu.memory_space<vmem>>, vector<1x1x32xf32>
    %273 = vector.shape_cast %272 : vector<1x1x32xf32> to vector<1x32xf32>
    %c0_119 = arith.constant 0 : index
    %c0_120 = arith.constant 0 : index
    %c0_121 = arith.constant 0 : index
    %274 = vector.load %arg23[%c0_119, %c0_120, %c0_121] : memref<2x1x32xf32, #tpu.memory_space<vmem>>, vector<1x1x32xf32>
    %275 = vector.shape_cast %274 : vector<1x1x32xf32> to vector<1x32xf32>
    %cst_122 = arith.constant dense<0.000000e+00> : vector<16xf32>
    %276 = vector.multi_reduction <add>, %271, %cst_122 [1] : vector<16x32xf32> to vector<16xf32>
    %277 = vector.shape_cast %276 : vector<16xf32> to vector<16x1xf32>
    %cst_123 = arith.constant 3.200000e+01 : f32
    %278 = vector.broadcast %cst_123 : f32 to vector<16x1xf32>
    %279 = arith.divf %277, %278 : vector<16x1xf32>
    %280 = vector.broadcast %279 : vector<16x1xf32> to vector<16x32xf32>
    %281 = arith.subf %271, %280 : vector<16x32xf32>
    %282 = arith.mulf %281, %281 : vector<16x32xf32>
    %cst_124 = arith.constant dense<0.000000e+00> : vector<16xf32>
    %283 = vector.multi_reduction <add>, %282, %cst_124 [1] : vector<16x32xf32> to vector<16xf32>
    %284 = vector.shape_cast %283 : vector<16xf32> to vector<16x1xf32>
    %cst_125 = arith.constant 3.200000e+01 : f32
    %285 = vector.broadcast %cst_125 : f32 to vector<16x1xf32>
    %286 = arith.divf %284, %285 : vector<16x1xf32>
    %287 = vector.broadcast %279 : vector<16x1xf32> to vector<16x32xf32>
    %288 = arith.subf %271, %287 : vector<16x32xf32>
    %cst_126 = arith.constant 9.99999974E-6 : f32
    %289 = vector.broadcast %cst_126 : f32 to vector<16x1xf32>
    %290 = arith.addf %286, %289 : vector<16x1xf32>
    %291 = math.rsqrt %290 : vector<16x1xf32>
    %292 = vector.broadcast %291 : vector<16x1xf32> to vector<16x32xf32>
    %293 = arith.mulf %288, %292 : vector<16x32xf32>
    %294 = vector.broadcast %273 : vector<1x32xf32> to vector<16x32xf32>
    %295 = arith.mulf %293, %294 : vector<16x32xf32>
    %296 = vector.broadcast %275 : vector<1x32xf32> to vector<16x32xf32>
    %297 = arith.addf %295, %296 : vector<16x32xf32>
    %c1 = arith.constant 1 : index
    %c0_127 = arith.constant 0 : index
    %c0_128 = arith.constant 0 : index
    %298 = vector.load %arg4[%c1, %c0_127, %c0_128] : memref<2x32x96xf32, #tpu.memory_space<vmem>>, vector<1x32x96xf32>
    %299 = vector.shape_cast %298 : vector<1x32x96xf32> to vector<32x96xf32>
    %cst_129 = arith.constant dense<0.000000e+00> : vector<16x96xf32>
    %300 = tpu.matmul %297, %299, %cst_129 {dimension_numbers = #tpu.dot_dimension_numbers<[1], [0], [0], [1], [0, 0, 1, 1], [], []>} : vector<16x32xf32>, vector<32x96xf32>, vector<16x96xf32> -> vector<16x96xf32>
    %c1_130 = arith.constant 1 : index
    %c0_131 = arith.constant 0 : index
    %c0_132 = arith.constant 0 : index
    %301 = vector.load %arg5[%c1_130, %c0_131, %c0_132] : memref<2x1x96xf32, #tpu.memory_space<vmem>>, vector<1x1x96xf32>
    %302 = vector.shape_cast %301 : vector<1x1x96xf32> to vector<1x96xf32>
    %303 = vector.broadcast %302 : vector<1x96xf32> to vector<16x96xf32>
    %304 = arith.addf %300, %303 : vector<16x96xf32>
    %305 = vector.extract_strided_slice %304 {offsets = [0, 0], sizes = [16, 32], strides = [1, 1]} : vector<16x96xf32> to vector<16x32xf32>
    %306 = vector.shape_cast %305 : vector<16x32xf32> to vector<2x8x32xf32>
    %307 = vector.extract_strided_slice %304 {offsets = [0, 32], sizes = [16, 32], strides = [1, 1]} : vector<16x96xf32> to vector<16x32xf32>
    %308 = vector.shape_cast %307 : vector<16x32xf32> to vector<2x8x32xf32>
    %309 = vector.extract_strided_slice %304 {offsets = [0, 64], sizes = [16, 32], strides = [1, 1]} : vector<16x96xf32> to vector<16x32xf32>
    %310 = vector.shape_cast %309 : vector<16x32xf32> to vector<2x8x32xf32>
    %311 = vector.extract_strided_slice %306 {offsets = [0, 0, 0], sizes = [2, 8, 8], strides = [1, 1, 1]} : vector<2x8x32xf32> to vector<2x8x8xf32>
    %312 = vector.extract_strided_slice %308 {offsets = [0, 0, 0], sizes = [2, 8, 8], strides = [1, 1, 1]} : vector<2x8x32xf32> to vector<2x8x8xf32>
    %313 = vector.extract_strided_slice %310 {offsets = [0, 0, 0], sizes = [2, 8, 8], strides = [1, 1, 1]} : vector<2x8x32xf32> to vector<2x8x8xf32>
    "tpu.trace_start"() <{level = 10 : i32, message = "bqd,bkd->bqk"}> : () -> ()
    %cst_133 = arith.constant dense<0.000000e+00> : vector<2x8x8xf32>
    %314 = tpu.matmul %311, %312, %cst_133 {dimension_numbers = #tpu.dot_dimension_numbers<[2], [2], [1], [1], [0, 0, 0, 1, 1, 1], [0], [0]>} : vector<2x8x8xf32>, vector<2x8x8xf32>, vector<2x8x8xf32> -> vector<2x8x8xf32>
    "tpu.trace_stop"() : () -> ()
    %cst_134 = arith.constant 0.353553385 : f32
    %315 = vector.broadcast %cst_134 : f32 to vector<2x8x8xf32>
    %316 = arith.mulf %314, %315 : vector<2x8x8xf32>
    %317 = vector.shape_cast %2 : vector<8x8xf32> to vector<1x8x8xf32>
    %318 = vector.broadcast %317 : vector<1x8x8xf32> to vector<2x8x8xf32>
    %319 = arith.addf %316, %318 : vector<2x8x8xf32>
    %cst_135 = arith.constant dense<0xFF800000> : vector<2x8xf32>
    %320 = vector.multi_reduction <maximumf>, %319, %cst_135 [2] : vector<2x8x8xf32> to vector<2x8xf32>
    %321 = vector.shape_cast %320 : vector<2x8xf32> to vector<2x8x1xf32>
    %322 = vector.broadcast %321 : vector<2x8x1xf32> to vector<2x8x8xf32>
    %323 = arith.subf %319, %322 : vector<2x8x8xf32>
    %324 = math.exp %323 : vector<2x8x8xf32>
    %cst_136 = arith.constant dense<0.000000e+00> : vector<2x8xf32>
    %325 = vector.multi_reduction <add>, %324, %cst_136 [2] : vector<2x8x8xf32> to vector<2x8xf32>
    %326 = vector.shape_cast %325 : vector<2x8xf32> to vector<2x8x1xf32>
    %327 = tpu.reciprocal %326 {approx = true} : vector<2x8x1xf32> -> vector<2x8x1xf32>
    %328 = vector.broadcast %327 : vector<2x8x1xf32> to vector<2x8x8xf32>
    %329 = arith.mulf %324, %328 : vector<2x8x8xf32>
    "tpu.trace_start"() <{level = 10 : i32, message = "bqk,bkd->bqd"}> : () -> ()
    %cst_137 = arith.constant dense<0.000000e+00> : vector<2x8x8xf32>
    %330 = tpu.matmul %329, %313, %cst_137 {dimension_numbers = #tpu.dot_dimension_numbers<[2], [1], [1], [2], [0, 0, 0, 1, 1, 2], [0], [0]>} : vector<2x8x8xf32>, vector<2x8x8xf32>, vector<2x8x8xf32> -> vector<2x8x8xf32>
    "tpu.trace_stop"() : () -> ()
    %331 = vector.extract_strided_slice %306 {offsets = [0, 0, 8], sizes = [2, 8, 8], strides = [1, 1, 1]} : vector<2x8x32xf32> to vector<2x8x8xf32>
    %332 = vector.extract_strided_slice %308 {offsets = [0, 0, 8], sizes = [2, 8, 8], strides = [1, 1, 1]} : vector<2x8x32xf32> to vector<2x8x8xf32>
    %333 = vector.extract_strided_slice %310 {offsets = [0, 0, 8], sizes = [2, 8, 8], strides = [1, 1, 1]} : vector<2x8x32xf32> to vector<2x8x8xf32>
    "tpu.trace_start"() <{level = 10 : i32, message = "bqd,bkd->bqk"}> : () -> ()
    %cst_138 = arith.constant dense<0.000000e+00> : vector<2x8x8xf32>
    %334 = tpu.matmul %331, %332, %cst_138 {dimension_numbers = #tpu.dot_dimension_numbers<[2], [2], [1], [1], [0, 0, 0, 1, 1, 1], [0], [0]>} : vector<2x8x8xf32>, vector<2x8x8xf32>, vector<2x8x8xf32> -> vector<2x8x8xf32>
    "tpu.trace_stop"() : () -> ()
    %cst_139 = arith.constant 0.353553385 : f32
    %335 = vector.broadcast %cst_139 : f32 to vector<2x8x8xf32>
    %336 = arith.mulf %334, %335 : vector<2x8x8xf32>
    %337 = vector.shape_cast %2 : vector<8x8xf32> to vector<1x8x8xf32>
    %338 = vector.broadcast %337 : vector<1x8x8xf32> to vector<2x8x8xf32>
    %339 = arith.addf %336, %338 : vector<2x8x8xf32>
    %cst_140 = arith.constant dense<0xFF800000> : vector<2x8xf32>
    %340 = vector.multi_reduction <maximumf>, %339, %cst_140 [2] : vector<2x8x8xf32> to vector<2x8xf32>
    %341 = vector.shape_cast %340 : vector<2x8xf32> to vector<2x8x1xf32>
    %342 = vector.broadcast %341 : vector<2x8x1xf32> to vector<2x8x8xf32>
    %343 = arith.subf %339, %342 : vector<2x8x8xf32>
    %344 = math.exp %343 : vector<2x8x8xf32>
    %cst_141 = arith.constant dense<0.000000e+00> : vector<2x8xf32>
    %345 = vector.multi_reduction <add>, %344, %cst_141 [2] : vector<2x8x8xf32> to vector<2x8xf32>
    %346 = vector.shape_cast %345 : vector<2x8xf32> to vector<2x8x1xf32>
    %347 = tpu.reciprocal %346 {approx = true} : vector<2x8x1xf32> -> vector<2x8x1xf32>
    %348 = vector.broadcast %347 : vector<2x8x1xf32> to vector<2x8x8xf32>
    %349 = arith.mulf %344, %348 : vector<2x8x8xf32>
    "tpu.trace_start"() <{level = 10 : i32, message = "bqk,bkd->bqd"}> : () -> ()
    %cst_142 = arith.constant dense<0.000000e+00> : vector<2x8x8xf32>
    %350 = tpu.matmul %349, %333, %cst_142 {dimension_numbers = #tpu.dot_dimension_numbers<[2], [1], [1], [2], [0, 0, 0, 1, 1, 2], [0], [0]>} : vector<2x8x8xf32>, vector<2x8x8xf32>, vector<2x8x8xf32> -> vector<2x8x8xf32>
    "tpu.trace_stop"() : () -> ()
    %351 = vector.extract_strided_slice %306 {offsets = [0, 0, 16], sizes = [2, 8, 8], strides = [1, 1, 1]} : vector<2x8x32xf32> to vector<2x8x8xf32>
    %352 = vector.extract_strided_slice %308 {offsets = [0, 0, 16], sizes = [2, 8, 8], strides = [1, 1, 1]} : vector<2x8x32xf32> to vector<2x8x8xf32>
    %353 = vector.extract_strided_slice %310 {offsets = [0, 0, 16], sizes = [2, 8, 8], strides = [1, 1, 1]} : vector<2x8x32xf32> to vector<2x8x8xf32>
    "tpu.trace_start"() <{level = 10 : i32, message = "bqd,bkd->bqk"}> : () -> ()
    %cst_143 = arith.constant dense<0.000000e+00> : vector<2x8x8xf32>
    %354 = tpu.matmul %351, %352, %cst_143 {dimension_numbers = #tpu.dot_dimension_numbers<[2], [2], [1], [1], [0, 0, 0, 1, 1, 1], [0], [0]>} : vector<2x8x8xf32>, vector<2x8x8xf32>, vector<2x8x8xf32> -> vector<2x8x8xf32>
    "tpu.trace_stop"() : () -> ()
    %cst_144 = arith.constant 0.353553385 : f32
    %355 = vector.broadcast %cst_144 : f32 to vector<2x8x8xf32>
    %356 = arith.mulf %354, %355 : vector<2x8x8xf32>
    %357 = vector.shape_cast %2 : vector<8x8xf32> to vector<1x8x8xf32>
    %358 = vector.broadcast %357 : vector<1x8x8xf32> to vector<2x8x8xf32>
    %359 = arith.addf %356, %358 : vector<2x8x8xf32>
    %cst_145 = arith.constant dense<0xFF800000> : vector<2x8xf32>
    %360 = vector.multi_reduction <maximumf>, %359, %cst_145 [2] : vector<2x8x8xf32> to vector<2x8xf32>
    %361 = vector.shape_cast %360 : vector<2x8xf32> to vector<2x8x1xf32>
    %362 = vector.broadcast %361 : vector<2x8x1xf32> to vector<2x8x8xf32>
    %363 = arith.subf %359, %362 : vector<2x8x8xf32>
    %364 = math.exp %363 : vector<2x8x8xf32>
    %cst_146 = arith.constant dense<0.000000e+00> : vector<2x8xf32>
    %365 = vector.multi_reduction <add>, %364, %cst_146 [2] : vector<2x8x8xf32> to vector<2x8xf32>
    %366 = vector.shape_cast %365 : vector<2x8xf32> to vector<2x8x1xf32>
    %367 = tpu.reciprocal %366 {approx = true} : vector<2x8x1xf32> -> vector<2x8x1xf32>
    %368 = vector.broadcast %367 : vector<2x8x1xf32> to vector<2x8x8xf32>
    %369 = arith.mulf %364, %368 : vector<2x8x8xf32>
    "tpu.trace_start"() <{level = 10 : i32, message = "bqk,bkd->bqd"}> : () -> ()
    %cst_147 = arith.constant dense<0.000000e+00> : vector<2x8x8xf32>
    %370 = tpu.matmul %369, %353, %cst_147 {dimension_numbers = #tpu.dot_dimension_numbers<[2], [1], [1], [2], [0, 0, 0, 1, 1, 2], [0], [0]>} : vector<2x8x8xf32>, vector<2x8x8xf32>, vector<2x8x8xf32> -> vector<2x8x8xf32>
    "tpu.trace_stop"() : () -> ()
    %371 = vector.extract_strided_slice %306 {offsets = [0, 0, 24], sizes = [2, 8, 8], strides = [1, 1, 1]} : vector<2x8x32xf32> to vector<2x8x8xf32>
    %372 = vector.extract_strided_slice %308 {offsets = [0, 0, 24], sizes = [2, 8, 8], strides = [1, 1, 1]} : vector<2x8x32xf32> to vector<2x8x8xf32>
    %373 = vector.extract_strided_slice %310 {offsets = [0, 0, 24], sizes = [2, 8, 8], strides = [1, 1, 1]} : vector<2x8x32xf32> to vector<2x8x8xf32>
    "tpu.trace_start"() <{level = 10 : i32, message = "bqd,bkd->bqk"}> : () -> ()
    %cst_148 = arith.constant dense<0.000000e+00> : vector<2x8x8xf32>
    %374 = tpu.matmul %371, %372, %cst_148 {dimension_numbers = #tpu.dot_dimension_numbers<[2], [2], [1], [1], [0, 0, 0, 1, 1, 1], [0], [0]>} : vector<2x8x8xf32>, vector<2x8x8xf32>, vector<2x8x8xf32> -> vector<2x8x8xf32>
    "tpu.trace_stop"() : () -> ()
    %cst_149 = arith.constant 0.353553385 : f32
    %375 = vector.broadcast %cst_149 : f32 to vector<2x8x8xf32>
    %376 = arith.mulf %374, %375 : vector<2x8x8xf32>
    %377 = vector.shape_cast %2 : vector<8x8xf32> to vector<1x8x8xf32>
    %378 = vector.broadcast %377 : vector<1x8x8xf32> to vector<2x8x8xf32>
    %379 = arith.addf %376, %378 : vector<2x8x8xf32>
    %cst_150 = arith.constant dense<0xFF800000> : vector<2x8xf32>
    %380 = vector.multi_reduction <maximumf>, %379, %cst_150 [2] : vector<2x8x8xf32> to vector<2x8xf32>
    %381 = vector.shape_cast %380 : vector<2x8xf32> to vector<2x8x1xf32>
    %382 = vector.broadcast %381 : vector<2x8x1xf32> to vector<2x8x8xf32>
    %383 = arith.subf %379, %382 : vector<2x8x8xf32>
    %384 = math.exp %383 : vector<2x8x8xf32>
    %cst_151 = arith.constant dense<0.000000e+00> : vector<2x8xf32>
    %385 = vector.multi_reduction <add>, %384, %cst_151 [2] : vector<2x8x8xf32> to vector<2x8xf32>
    %386 = vector.shape_cast %385 : vector<2x8xf32> to vector<2x8x1xf32>
    %387 = tpu.reciprocal %386 {approx = true} : vector<2x8x1xf32> -> vector<2x8x1xf32>
    %388 = vector.broadcast %387 : vector<2x8x1xf32> to vector<2x8x8xf32>
    %389 = arith.mulf %384, %388 : vector<2x8x8xf32>
    "tpu.trace_start"() <{level = 10 : i32, message = "bqk,bkd->bqd"}> : () -> ()
    %cst_152 = arith.constant dense<0.000000e+00> : vector<2x8x8xf32>
    %390 = tpu.matmul %389, %373, %cst_152 {dimension_numbers = #tpu.dot_dimension_numbers<[2], [1], [1], [2], [0, 0, 0, 1, 1, 2], [0], [0]>} : vector<2x8x8xf32>, vector<2x8x8xf32>, vector<2x8x8xf32> -> vector<2x8x8xf32>
    "tpu.trace_stop"() : () -> ()
    %391 = tpu.concatenate %330, %350, %370, %390 in 2 : vector<2x8x8xf32>, vector<2x8x8xf32>, vector<2x8x8xf32>, vector<2x8x8xf32> -> vector<2x8x32xf32>
    %392 = vector.shape_cast %391 : vector<2x8x32xf32> to vector<16x32xf32>
    %c1_153 = arith.constant 1 : index
    %c0_154 = arith.constant 0 : index
    %c0_155 = arith.constant 0 : index
    %393 = vector.load %arg6[%c1_153, %c0_154, %c0_155] : memref<2x32x32xf32, #tpu.memory_space<vmem>>, vector<1x32x32xf32>
    %394 = vector.shape_cast %393 : vector<1x32x32xf32> to vector<32x32xf32>
    %cst_156 = arith.constant dense<0.000000e+00> : vector<16x32xf32>
    %395 = tpu.matmul %392, %394, %cst_156 {dimension_numbers = #tpu.dot_dimension_numbers<[1], [0], [0], [1], [0, 0, 1, 1], [], []>} : vector<16x32xf32>, vector<32x32xf32>, vector<16x32xf32> -> vector<16x32xf32>
    %c1_157 = arith.constant 1 : index
    %c0_158 = arith.constant 0 : index
    %c0_159 = arith.constant 0 : index
    %396 = vector.load %arg7[%c1_157, %c0_158, %c0_159] : memref<2x1x32xf32, #tpu.memory_space<vmem>>, vector<1x1x32xf32>
    %397 = vector.shape_cast %396 : vector<1x1x32xf32> to vector<1x32xf32>
    %398 = vector.broadcast %397 : vector<1x32xf32> to vector<16x32xf32>
    %399 = arith.addf %395, %398 : vector<16x32xf32>
    %400 = arith.addf %297, %399 : vector<16x32xf32>
    %c1_160 = arith.constant 1 : index
    %c0_161 = arith.constant 0 : index
    %c0_162 = arith.constant 0 : index
    %401 = vector.load %arg18[%c1_160, %c0_161, %c0_162] : memref<2x1x32xf32, #tpu.memory_space<vmem>>, vector<1x1x32xf32>
    %402 = vector.shape_cast %401 : vector<1x1x32xf32> to vector<1x32xf32>
    %c1_163 = arith.constant 1 : index
    %c0_164 = arith.constant 0 : index
    %c0_165 = arith.constant 0 : index
    %403 = vector.load %arg19[%c1_163, %c0_164, %c0_165] : memref<2x1x32xf32, #tpu.memory_space<vmem>>, vector<1x1x32xf32>
    %404 = vector.shape_cast %403 : vector<1x1x32xf32> to vector<1x32xf32>
    %cst_166 = arith.constant dense<0.000000e+00> : vector<16xf32>
    %405 = vector.multi_reduction <add>, %400, %cst_166 [1] : vector<16x32xf32> to vector<16xf32>
    %406 = vector.shape_cast %405 : vector<16xf32> to vector<16x1xf32>
    %cst_167 = arith.constant 3.200000e+01 : f32
    %407 = vector.broadcast %cst_167 : f32 to vector<16x1xf32>
    %408 = arith.divf %406, %407 : vector<16x1xf32>
    %409 = vector.broadcast %408 : vector<16x1xf32> to vector<16x32xf32>
    %410 = arith.subf %400, %409 : vector<16x32xf32>
    %411 = arith.mulf %410, %410 : vector<16x32xf32>
    %cst_168 = arith.constant dense<0.000000e+00> : vector<16xf32>
    %412 = vector.multi_reduction <add>, %411, %cst_168 [1] : vector<16x32xf32> to vector<16xf32>
    %413 = vector.shape_cast %412 : vector<16xf32> to vector<16x1xf32>
    %cst_169 = arith.constant 3.200000e+01 : f32
    %414 = vector.broadcast %cst_169 : f32 to vector<16x1xf32>
    %415 = arith.divf %413, %414 : vector<16x1xf32>
    %416 = vector.broadcast %408 : vector<16x1xf32> to vector<16x32xf32>
    %417 = arith.subf %400, %416 : vector<16x32xf32>
    %cst_170 = arith.constant 9.99999974E-6 : f32
    %418 = vector.broadcast %cst_170 : f32 to vector<16x1xf32>
    %419 = arith.addf %415, %418 : vector<16x1xf32>
    %420 = math.rsqrt %419 : vector<16x1xf32>
    %421 = vector.broadcast %420 : vector<16x1xf32> to vector<16x32xf32>
    %422 = arith.mulf %417, %421 : vector<16x32xf32>
    %423 = vector.broadcast %402 : vector<1x32xf32> to vector<16x32xf32>
    %424 = arith.mulf %422, %423 : vector<16x32xf32>
    %425 = vector.broadcast %404 : vector<1x32xf32> to vector<16x32xf32>
    %426 = arith.addf %424, %425 : vector<16x32xf32>
    %c1_171 = arith.constant 1 : index
    %c0_172 = arith.constant 0 : index
    %c0_173 = arith.constant 0 : index
    %427 = vector.load %arg8[%c1_171, %c0_172, %c0_173] : memref<2x32x32xf32, #tpu.memory_space<vmem>>, vector<1x32x32xf32>
    %428 = vector.shape_cast %427 : vector<1x32x32xf32> to vector<32x32xf32>
    %cst_174 = arith.constant dense<0.000000e+00> : vector<16x32xf32>
    %429 = tpu.matmul %426, %428, %cst_174 {dimension_numbers = #tpu.dot_dimension_numbers<[1], [0], [0], [1], [0, 0, 1, 1], [], []>} : vector<16x32xf32>, vector<32x32xf32>, vector<16x32xf32> -> vector<16x32xf32>
    %c1_175 = arith.constant 1 : index
    %c0_176 = arith.constant 0 : index
    %c0_177 = arith.constant 0 : index
    %430 = vector.load %arg9[%c1_175, %c0_176, %c0_177] : memref<2x1x32xf32, #tpu.memory_space<vmem>>, vector<1x1x32xf32>
    %431 = vector.shape_cast %430 : vector<1x1x32xf32> to vector<1x32xf32>
    %432 = vector.broadcast %431 : vector<1x32xf32> to vector<16x32xf32>
    %433 = arith.addf %429, %432 : vector<16x32xf32>
    %434 = vector.shape_cast %433 : vector<16x32xf32> to vector<2x8x32xf32>
    %c1_178 = arith.constant 1 : index
    %c0_179 = arith.constant 0 : index
    %c0_180 = arith.constant 0 : index
    %435 = vector.load %arg10[%c1_178, %c0_179, %c0_180] : memref<2x32x64xf32, #tpu.memory_space<vmem>>, vector<1x32x64xf32>
    %436 = vector.shape_cast %435 : vector<1x32x64xf32> to vector<32x64xf32>
    %cst_181 = arith.constant dense<0.000000e+00> : vector<16x64xf32>
    %437 = tpu.matmul %1, %436, %cst_181 {dimension_numbers = #tpu.dot_dimension_numbers<[1], [0], [0], [1], [0, 0, 1, 1], [], []>} : vector<16x32xf32>, vector<32x64xf32>, vector<16x64xf32> -> vector<16x64xf32>
    %c1_182 = arith.constant 1 : index
    %c0_183 = arith.constant 0 : index
    %c0_184 = arith.constant 0 : index
    %438 = vector.load %arg11[%c1_182, %c0_183, %c0_184] : memref<2x1x64xf32, #tpu.memory_space<vmem>>, vector<1x1x64xf32>
    %439 = vector.shape_cast %438 : vector<1x1x64xf32> to vector<1x64xf32>
    %440 = vector.broadcast %439 : vector<1x64xf32> to vector<16x64xf32>
    %441 = arith.addf %437, %440 : vector<16x64xf32>
    %442 = vector.extract_strided_slice %441 {offsets = [0, 0], sizes = [16, 32], strides = [1, 1]} : vector<16x64xf32> to vector<16x32xf32>
    %443 = vector.shape_cast %442 : vector<16x32xf32> to vector<2x8x32xf32>
    %444 = vector.extract_strided_slice %441 {offsets = [0, 32], sizes = [16, 32], strides = [1, 1]} : vector<16x64xf32> to vector<16x32xf32>
    %445 = vector.shape_cast %444 : vector<16x32xf32> to vector<2x8x32xf32>
    %446 = vector.extract_strided_slice %434 {offsets = [0, 0, 0], sizes = [2, 8, 8], strides = [1, 1, 1]} : vector<2x8x32xf32> to vector<2x8x8xf32>
    %447 = vector.extract_strided_slice %443 {offsets = [0, 0, 0], sizes = [2, 8, 8], strides = [1, 1, 1]} : vector<2x8x32xf32> to vector<2x8x8xf32>
    %448 = vector.extract_strided_slice %445 {offsets = [0, 0, 0], sizes = [2, 8, 8], strides = [1, 1, 1]} : vector<2x8x32xf32> to vector<2x8x8xf32>
    "tpu.trace_start"() <{level = 10 : i32, message = "bqd,bkd->bqk"}> : () -> ()
    %cst_185 = arith.constant dense<0.000000e+00> : vector<2x8x8xf32>
    %449 = tpu.matmul %446, %447, %cst_185 {dimension_numbers = #tpu.dot_dimension_numbers<[2], [2], [1], [1], [0, 0, 0, 1, 1, 1], [0], [0]>} : vector<2x8x8xf32>, vector<2x8x8xf32>, vector<2x8x8xf32> -> vector<2x8x8xf32>
    "tpu.trace_stop"() : () -> ()
    %cst_186 = arith.constant 0.353553385 : f32
    %450 = vector.broadcast %cst_186 : f32 to vector<2x8x8xf32>
    %451 = arith.mulf %449, %450 : vector<2x8x8xf32>
    %cst_187 = arith.constant dense<0xFF800000> : vector<2x8xf32>
    %452 = vector.multi_reduction <maximumf>, %451, %cst_187 [2] : vector<2x8x8xf32> to vector<2x8xf32>
    %453 = vector.shape_cast %452 : vector<2x8xf32> to vector<2x8x1xf32>
    %454 = vector.broadcast %453 : vector<2x8x1xf32> to vector<2x8x8xf32>
    %455 = arith.subf %451, %454 : vector<2x8x8xf32>
    %456 = math.exp %455 : vector<2x8x8xf32>
    %cst_188 = arith.constant dense<0.000000e+00> : vector<2x8xf32>
    %457 = vector.multi_reduction <add>, %456, %cst_188 [2] : vector<2x8x8xf32> to vector<2x8xf32>
    %458 = vector.shape_cast %457 : vector<2x8xf32> to vector<2x8x1xf32>
    %459 = tpu.reciprocal %458 {approx = true} : vector<2x8x1xf32> -> vector<2x8x1xf32>
    %460 = vector.broadcast %459 : vector<2x8x1xf32> to vector<2x8x8xf32>
    %461 = arith.mulf %456, %460 : vector<2x8x8xf32>
    "tpu.trace_start"() <{level = 10 : i32, message = "bqk,bkd->bqd"}> : () -> ()
    %cst_189 = arith.constant dense<0.000000e+00> : vector<2x8x8xf32>
    %462 = tpu.matmul %461, %448, %cst_189 {dimension_numbers = #tpu.dot_dimension_numbers<[2], [1], [1], [2], [0, 0, 0, 1, 1, 2], [0], [0]>} : vector<2x8x8xf32>, vector<2x8x8xf32>, vector<2x8x8xf32> -> vector<2x8x8xf32>
    "tpu.trace_stop"() : () -> ()
    %463 = vector.extract_strided_slice %434 {offsets = [0, 0, 8], sizes = [2, 8, 8], strides = [1, 1, 1]} : vector<2x8x32xf32> to vector<2x8x8xf32>
    %464 = vector.extract_strided_slice %443 {offsets = [0, 0, 8], sizes = [2, 8, 8], strides = [1, 1, 1]} : vector<2x8x32xf32> to vector<2x8x8xf32>
    %465 = vector.extract_strided_slice %445 {offsets = [0, 0, 8], sizes = [2, 8, 8], strides = [1, 1, 1]} : vector<2x8x32xf32> to vector<2x8x8xf32>
    "tpu.trace_start"() <{level = 10 : i32, message = "bqd,bkd->bqk"}> : () -> ()
    %cst_190 = arith.constant dense<0.000000e+00> : vector<2x8x8xf32>
    %466 = tpu.matmul %463, %464, %cst_190 {dimension_numbers = #tpu.dot_dimension_numbers<[2], [2], [1], [1], [0, 0, 0, 1, 1, 1], [0], [0]>} : vector<2x8x8xf32>, vector<2x8x8xf32>, vector<2x8x8xf32> -> vector<2x8x8xf32>
    "tpu.trace_stop"() : () -> ()
    %cst_191 = arith.constant 0.353553385 : f32
    %467 = vector.broadcast %cst_191 : f32 to vector<2x8x8xf32>
    %468 = arith.mulf %466, %467 : vector<2x8x8xf32>
    %cst_192 = arith.constant dense<0xFF800000> : vector<2x8xf32>
    %469 = vector.multi_reduction <maximumf>, %468, %cst_192 [2] : vector<2x8x8xf32> to vector<2x8xf32>
    %470 = vector.shape_cast %469 : vector<2x8xf32> to vector<2x8x1xf32>
    %471 = vector.broadcast %470 : vector<2x8x1xf32> to vector<2x8x8xf32>
    %472 = arith.subf %468, %471 : vector<2x8x8xf32>
    %473 = math.exp %472 : vector<2x8x8xf32>
    %cst_193 = arith.constant dense<0.000000e+00> : vector<2x8xf32>
    %474 = vector.multi_reduction <add>, %473, %cst_193 [2] : vector<2x8x8xf32> to vector<2x8xf32>
    %475 = vector.shape_cast %474 : vector<2x8xf32> to vector<2x8x1xf32>
    %476 = tpu.reciprocal %475 {approx = true} : vector<2x8x1xf32> -> vector<2x8x1xf32>
    %477 = vector.broadcast %476 : vector<2x8x1xf32> to vector<2x8x8xf32>
    %478 = arith.mulf %473, %477 : vector<2x8x8xf32>
    "tpu.trace_start"() <{level = 10 : i32, message = "bqk,bkd->bqd"}> : () -> ()
    %cst_194 = arith.constant dense<0.000000e+00> : vector<2x8x8xf32>
    %479 = tpu.matmul %478, %465, %cst_194 {dimension_numbers = #tpu.dot_dimension_numbers<[2], [1], [1], [2], [0, 0, 0, 1, 1, 2], [0], [0]>} : vector<2x8x8xf32>, vector<2x8x8xf32>, vector<2x8x8xf32> -> vector<2x8x8xf32>
    "tpu.trace_stop"() : () -> ()
    %480 = vector.extract_strided_slice %434 {offsets = [0, 0, 16], sizes = [2, 8, 8], strides = [1, 1, 1]} : vector<2x8x32xf32> to vector<2x8x8xf32>
    %481 = vector.extract_strided_slice %443 {offsets = [0, 0, 16], sizes = [2, 8, 8], strides = [1, 1, 1]} : vector<2x8x32xf32> to vector<2x8x8xf32>
    %482 = vector.extract_strided_slice %445 {offsets = [0, 0, 16], sizes = [2, 8, 8], strides = [1, 1, 1]} : vector<2x8x32xf32> to vector<2x8x8xf32>
    "tpu.trace_start"() <{level = 10 : i32, message = "bqd,bkd->bqk"}> : () -> ()
    %cst_195 = arith.constant dense<0.000000e+00> : vector<2x8x8xf32>
    %483 = tpu.matmul %480, %481, %cst_195 {dimension_numbers = #tpu.dot_dimension_numbers<[2], [2], [1], [1], [0, 0, 0, 1, 1, 1], [0], [0]>} : vector<2x8x8xf32>, vector<2x8x8xf32>, vector<2x8x8xf32> -> vector<2x8x8xf32>
    "tpu.trace_stop"() : () -> ()
    %cst_196 = arith.constant 0.353553385 : f32
    %484 = vector.broadcast %cst_196 : f32 to vector<2x8x8xf32>
    %485 = arith.mulf %483, %484 : vector<2x8x8xf32>
    %cst_197 = arith.constant dense<0xFF800000> : vector<2x8xf32>
    %486 = vector.multi_reduction <maximumf>, %485, %cst_197 [2] : vector<2x8x8xf32> to vector<2x8xf32>
    %487 = vector.shape_cast %486 : vector<2x8xf32> to vector<2x8x1xf32>
    %488 = vector.broadcast %487 : vector<2x8x1xf32> to vector<2x8x8xf32>
    %489 = arith.subf %485, %488 : vector<2x8x8xf32>
    %490 = math.exp %489 : vector<2x8x8xf32>
    %cst_198 = arith.constant dense<0.000000e+00> : vector<2x8xf32>
    %491 = vector.multi_reduction <add>, %490, %cst_198 [2] : vector<2x8x8xf32> to vector<2x8xf32>
    %492 = vector.shape_cast %491 : vector<2x8xf32> to vector<2x8x1xf32>
    %493 = tpu.reciprocal %492 {approx = true} : vector<2x8x1xf32> -> vector<2x8x1xf32>
    %494 = vector.broadcast %493 : vector<2x8x1xf32> to vector<2x8x8xf32>
    %495 = arith.mulf %490, %494 : vector<2x8x8xf32>
    "tpu.trace_start"() <{level = 10 : i32, message = "bqk,bkd->bqd"}> : () -> ()
    %cst_199 = arith.constant dense<0.000000e+00> : vector<2x8x8xf32>
    %496 = tpu.matmul %495, %482, %cst_199 {dimension_numbers = #tpu.dot_dimension_numbers<[2], [1], [1], [2], [0, 0, 0, 1, 1, 2], [0], [0]>} : vector<2x8x8xf32>, vector<2x8x8xf32>, vector<2x8x8xf32> -> vector<2x8x8xf32>
    "tpu.trace_stop"() : () -> ()
    %497 = vector.extract_strided_slice %434 {offsets = [0, 0, 24], sizes = [2, 8, 8], strides = [1, 1, 1]} : vector<2x8x32xf32> to vector<2x8x8xf32>
    %498 = vector.extract_strided_slice %443 {offsets = [0, 0, 24], sizes = [2, 8, 8], strides = [1, 1, 1]} : vector<2x8x32xf32> to vector<2x8x8xf32>
    %499 = vector.extract_strided_slice %445 {offsets = [0, 0, 24], sizes = [2, 8, 8], strides = [1, 1, 1]} : vector<2x8x32xf32> to vector<2x8x8xf32>
    "tpu.trace_start"() <{level = 10 : i32, message = "bqd,bkd->bqk"}> : () -> ()
    %cst_200 = arith.constant dense<0.000000e+00> : vector<2x8x8xf32>
    %500 = tpu.matmul %497, %498, %cst_200 {dimension_numbers = #tpu.dot_dimension_numbers<[2], [2], [1], [1], [0, 0, 0, 1, 1, 1], [0], [0]>} : vector<2x8x8xf32>, vector<2x8x8xf32>, vector<2x8x8xf32> -> vector<2x8x8xf32>
    "tpu.trace_stop"() : () -> ()
    %cst_201 = arith.constant 0.353553385 : f32
    %501 = vector.broadcast %cst_201 : f32 to vector<2x8x8xf32>
    %502 = arith.mulf %500, %501 : vector<2x8x8xf32>
    %cst_202 = arith.constant dense<0xFF800000> : vector<2x8xf32>
    %503 = vector.multi_reduction <maximumf>, %502, %cst_202 [2] : vector<2x8x8xf32> to vector<2x8xf32>
    %504 = vector.shape_cast %503 : vector<2x8xf32> to vector<2x8x1xf32>
    %505 = vector.broadcast %504 : vector<2x8x1xf32> to vector<2x8x8xf32>
    %506 = arith.subf %502, %505 : vector<2x8x8xf32>
    %507 = math.exp %506 : vector<2x8x8xf32>
    %cst_203 = arith.constant dense<0.000000e+00> : vector<2x8xf32>
    %508 = vector.multi_reduction <add>, %507, %cst_203 [2] : vector<2x8x8xf32> to vector<2x8xf32>
    %509 = vector.shape_cast %508 : vector<2x8xf32> to vector<2x8x1xf32>
    %510 = tpu.reciprocal %509 {approx = true} : vector<2x8x1xf32> -> vector<2x8x1xf32>
    %511 = vector.broadcast %510 : vector<2x8x1xf32> to vector<2x8x8xf32>
    %512 = arith.mulf %507, %511 : vector<2x8x8xf32>
    "tpu.trace_start"() <{level = 10 : i32, message = "bqk,bkd->bqd"}> : () -> ()
    %cst_204 = arith.constant dense<0.000000e+00> : vector<2x8x8xf32>
    %513 = tpu.matmul %512, %499, %cst_204 {dimension_numbers = #tpu.dot_dimension_numbers<[2], [1], [1], [2], [0, 0, 0, 1, 1, 2], [0], [0]>} : vector<2x8x8xf32>, vector<2x8x8xf32>, vector<2x8x8xf32> -> vector<2x8x8xf32>
    "tpu.trace_stop"() : () -> ()
    %514 = tpu.concatenate %462, %479, %496, %513 in 2 : vector<2x8x8xf32>, vector<2x8x8xf32>, vector<2x8x8xf32>, vector<2x8x8xf32> -> vector<2x8x32xf32>
    %515 = vector.shape_cast %514 : vector<2x8x32xf32> to vector<16x32xf32>
    %c1_205 = arith.constant 1 : index
    %c0_206 = arith.constant 0 : index
    %c0_207 = arith.constant 0 : index
    %516 = vector.load %arg12[%c1_205, %c0_206, %c0_207] : memref<2x32x32xf32, #tpu.memory_space<vmem>>, vector<1x32x32xf32>
    %517 = vector.shape_cast %516 : vector<1x32x32xf32> to vector<32x32xf32>
    %cst_208 = arith.constant dense<0.000000e+00> : vector<16x32xf32>
    %518 = tpu.matmul %515, %517, %cst_208 {dimension_numbers = #tpu.dot_dimension_numbers<[1], [0], [0], [1], [0, 0, 1, 1], [], []>} : vector<16x32xf32>, vector<32x32xf32>, vector<16x32xf32> -> vector<16x32xf32>
    %c1_209 = arith.constant 1 : index
    %c0_210 = arith.constant 0 : index
    %c0_211 = arith.constant 0 : index
    %519 = vector.load %arg13[%c1_209, %c0_210, %c0_211] : memref<2x1x32xf32, #tpu.memory_space<vmem>>, vector<1x1x32xf32>
    %520 = vector.shape_cast %519 : vector<1x1x32xf32> to vector<1x32xf32>
    %521 = vector.broadcast %520 : vector<1x32xf32> to vector<16x32xf32>
    %522 = arith.addf %518, %521 : vector<16x32xf32>
    %523 = arith.addf %426, %522 : vector<16x32xf32>
    %c1_212 = arith.constant 1 : index
    %c0_213 = arith.constant 0 : index
    %c0_214 = arith.constant 0 : index
    %524 = vector.load %arg20[%c1_212, %c0_213, %c0_214] : memref<2x1x32xf32, #tpu.memory_space<vmem>>, vector<1x1x32xf32>
    %525 = vector.shape_cast %524 : vector<1x1x32xf32> to vector<1x32xf32>
    %c1_215 = arith.constant 1 : index
    %c0_216 = arith.constant 0 : index
    %c0_217 = arith.constant 0 : index
    %526 = vector.load %arg21[%c1_215, %c0_216, %c0_217] : memref<2x1x32xf32, #tpu.memory_space<vmem>>, vector<1x1x32xf32>
    %527 = vector.shape_cast %526 : vector<1x1x32xf32> to vector<1x32xf32>
    %cst_218 = arith.constant dense<0.000000e+00> : vector<16xf32>
    %528 = vector.multi_reduction <add>, %523, %cst_218 [1] : vector<16x32xf32> to vector<16xf32>
    %529 = vector.shape_cast %528 : vector<16xf32> to vector<16x1xf32>
    %cst_219 = arith.constant 3.200000e+01 : f32
    %530 = vector.broadcast %cst_219 : f32 to vector<16x1xf32>
    %531 = arith.divf %529, %530 : vector<16x1xf32>
    %532 = vector.broadcast %531 : vector<16x1xf32> to vector<16x32xf32>
    %533 = arith.subf %523, %532 : vector<16x32xf32>
    %534 = arith.mulf %533, %533 : vector<16x32xf32>
    %cst_220 = arith.constant dense<0.000000e+00> : vector<16xf32>
    %535 = vector.multi_reduction <add>, %534, %cst_220 [1] : vector<16x32xf32> to vector<16xf32>
    %536 = vector.shape_cast %535 : vector<16xf32> to vector<16x1xf32>
    %cst_221 = arith.constant 3.200000e+01 : f32
    %537 = vector.broadcast %cst_221 : f32 to vector<16x1xf32>
    %538 = arith.divf %536, %537 : vector<16x1xf32>
    %539 = vector.broadcast %531 : vector<16x1xf32> to vector<16x32xf32>
    %540 = arith.subf %523, %539 : vector<16x32xf32>
    %cst_222 = arith.constant 9.99999974E-6 : f32
    %541 = vector.broadcast %cst_222 : f32 to vector<16x1xf32>
    %542 = arith.addf %538, %541 : vector<16x1xf32>
    %543 = math.rsqrt %542 : vector<16x1xf32>
    %544 = vector.broadcast %543 : vector<16x1xf32> to vector<16x32xf32>
    %545 = arith.mulf %540, %544 : vector<16x32xf32>
    %546 = vector.broadcast %525 : vector<1x32xf32> to vector<16x32xf32>
    %547 = arith.mulf %545, %546 : vector<16x32xf32>
    %548 = vector.broadcast %527 : vector<1x32xf32> to vector<16x32xf32>
    %549 = arith.addf %547, %548 : vector<16x32xf32>
    %c1_223 = arith.constant 1 : index
    %c0_224 = arith.constant 0 : index
    %c0_225 = arith.constant 0 : index
    %550 = vector.load %arg14[%c1_223, %c0_224, %c0_225] : memref<2x32x64xf32, #tpu.memory_space<vmem>>, vector<1x32x64xf32>
    %551 = vector.shape_cast %550 : vector<1x32x64xf32> to vector<32x64xf32>
    %cst_226 = arith.constant dense<0.000000e+00> : vector<16x64xf32>
    %552 = tpu.matmul %549, %551, %cst_226 {dimension_numbers = #tpu.dot_dimension_numbers<[1], [0], [0], [1], [0, 0, 1, 1], [], []>} : vector<16x32xf32>, vector<32x64xf32>, vector<16x64xf32> -> vector<16x64xf32>
    %c1_227 = arith.constant 1 : index
    %c0_228 = arith.constant 0 : index
    %c0_229 = arith.constant 0 : index
    %553 = vector.load %arg15[%c1_227, %c0_228, %c0_229] : memref<2x1x64xf32, #tpu.memory_space<vmem>>, vector<1x1x64xf32>
    %554 = vector.shape_cast %553 : vector<1x1x64xf32> to vector<1x64xf32>
    %555 = vector.broadcast %554 : vector<1x64xf32> to vector<16x64xf32>
    %556 = arith.addf %552, %555 : vector<16x64xf32>
    %cst_230 = arith.constant 0.000000e+00 : f32
    %557 = vector.broadcast %cst_230 : f32 to vector<16x64xf32>
    %558 = arith.maximumf %556, %557 : vector<16x64xf32>
    %c1_231 = arith.constant 1 : index
    %c0_232 = arith.constant 0 : index
    %c0_233 = arith.constant 0 : index
    %559 = vector.load %arg16[%c1_231, %c0_232, %c0_233] : memref<2x64x32xf32, #tpu.memory_space<vmem>>, vector<1x64x32xf32>
    %560 = vector.shape_cast %559 : vector<1x64x32xf32> to vector<64x32xf32>
    %cst_234 = arith.constant dense<0.000000e+00> : vector<16x32xf32>
    %561 = tpu.matmul %558, %560, %cst_234 {dimension_numbers = #tpu.dot_dimension_numbers<[1], [0], [0], [1], [0, 0, 1, 1], [], []>} : vector<16x64xf32>, vector<64x32xf32>, vector<16x32xf32> -> vector<16x32xf32>
    %c1_235 = arith.constant 1 : index
    %c0_236 = arith.constant 0 : index
    %c0_237 = arith.constant 0 : index
    %562 = vector.load %arg17[%c1_235, %c0_236, %c0_237] : memref<2x1x32xf32, #tpu.memory_space<vmem>>, vector<1x1x32xf32>
    %563 = vector.shape_cast %562 : vector<1x1x32xf32> to vector<1x32xf32>
    %564 = vector.broadcast %563 : vector<1x32xf32> to vector<16x32xf32>
    %565 = arith.addf %561, %564 : vector<16x32xf32>
    %566 = arith.addf %549, %565 : vector<16x32xf32>
    %c1_238 = arith.constant 1 : index
    %c0_239 = arith.constant 0 : index
    %c0_240 = arith.constant 0 : index
    %567 = vector.load %arg22[%c1_238, %c0_239, %c0_240] : memref<2x1x32xf32, #tpu.memory_space<vmem>>, vector<1x1x32xf32>
    %568 = vector.shape_cast %567 : vector<1x1x32xf32> to vector<1x32xf32>
    %c1_241 = arith.constant 1 : index
    %c0_242 = arith.constant 0 : index
    %c0_243 = arith.constant 0 : index
    %569 = vector.load %arg23[%c1_241, %c0_242, %c0_243] : memref<2x1x32xf32, #tpu.memory_space<vmem>>, vector<1x1x32xf32>
    %570 = vector.shape_cast %569 : vector<1x1x32xf32> to vector<1x32xf32>
    %cst_244 = arith.constant dense<0.000000e+00> : vector<16xf32>
    %571 = vector.multi_reduction <add>, %566, %cst_244 [1] : vector<16x32xf32> to vector<16xf32>
    %572 = vector.shape_cast %571 : vector<16xf32> to vector<16x1xf32>
    %cst_245 = arith.constant 3.200000e+01 : f32
    %573 = vector.broadcast %cst_245 : f32 to vector<16x1xf32>
    %574 = arith.divf %572, %573 : vector<16x1xf32>
    %575 = vector.broadcast %574 : vector<16x1xf32> to vector<16x32xf32>
    %576 = arith.subf %566, %575 : vector<16x32xf32>
    %577 = arith.mulf %576, %576 : vector<16x32xf32>
    %cst_246 = arith.constant dense<0.000000e+00> : vector<16xf32>
    %578 = vector.multi_reduction <add>, %577, %cst_246 [1] : vector<16x32xf32> to vector<16xf32>
    %579 = vector.shape_cast %578 : vector<16xf32> to vector<16x1xf32>
    %cst_247 = arith.constant 3.200000e+01 : f32
    %580 = vector.broadcast %cst_247 : f32 to vector<16x1xf32>
    %581 = arith.divf %579, %580 : vector<16x1xf32>
    %582 = vector.broadcast %574 : vector<16x1xf32> to vector<16x32xf32>
    %583 = arith.subf %566, %582 : vector<16x32xf32>
    %cst_248 = arith.constant 9.99999974E-6 : f32
    %584 = vector.broadcast %cst_248 : f32 to vector<16x1xf32>
    %585 = arith.addf %581, %584 : vector<16x1xf32>
    %586 = math.rsqrt %585 : vector<16x1xf32>
    %587 = vector.broadcast %586 : vector<16x1xf32> to vector<16x32xf32>
    %588 = arith.mulf %583, %587 : vector<16x32xf32>
    %589 = vector.broadcast %568 : vector<1x32xf32> to vector<16x32xf32>
    %590 = arith.mulf %588, %589 : vector<16x32xf32>
    %591 = vector.broadcast %570 : vector<1x32xf32> to vector<16x32xf32>
    %592 = arith.addf %590, %591 : vector<16x32xf32>
    %c0_249 = arith.constant 0 : index
    %c0_250 = arith.constant 0 : index
    %593 = vector.load %arg24[%c0_249, %c0_250] : memref<16x32xf32, #tpu.memory_space<vmem>>, vector<16x32xf32>
    tpu.vector_store %arg24[%c0_249, %c0_250], %592 {strides = array<i32>} : memref<16x32xf32, #tpu.memory_space<vmem>>, vector<16x32xf32>,
    return
  }
  func.func @transform_0(%arg0: i32) -> (i32, i32) {
    %c0_i32 = arith.constant 0 : i32
    %c0_i32_0 = arith.constant 0 : i32
    %c0_i32_1 = arith.constant 0 : i32
    return %c0_i32, %c0_i32_0 : i32, i32
  }
  func.func @transform_1(%arg0: i32) -> (i32, i32) {
    %c0_i32 = arith.constant 0 : i32
    %c0_i32_0 = arith.constant 0 : i32
    %c0_i32_1 = arith.constant 0 : i32
    return %c0_i32, %c0_i32_0 : i32, i32
  }
  func.func @transform_2(%arg0: i32) -> (i32, i32) {
    %c0_i32 = arith.constant 0 : i32
    %c0_i32_0 = arith.constant 0 : i32
    %c0_i32_1 = arith.constant 0 : i32
    return %c0_i32, %c0_i32_0 : i32, i32
  }
  func.func @transform_3(%arg0: i32) -> (i32, i32, i32) {
    %c0_i32 = arith.constant 0 : i32
    %c0_i32_0 = arith.constant 0 : i32
    %c0_i32_1 = arith.constant 0 : i32
    %c0_i32_2 = arith.constant 0 : i32
    return %c0_i32, %c0_i32_0, %c0_i32_1 : i32, i32, i32
  }
  func.func @transform_4(%arg0: i32) -> (i32, i32, i32) {
    %c0_i32 = arith.constant 0 : i32
    %c0_i32_0 = arith.constant 0 : i32
    %c0_i32_1 = arith.constant 0 : i32
    %c0_i32_2 = arith.constant 0 : i32
    return %c0_i32, %c0_i32_0, %c0_i32_1 : i32, i32, i32
  }
  func.func @transform_5(%arg0: i32) -> (i32, i32, i32) {
    %c0_i32 = arith.constant 0 : i32
    %c0_i32_0 = arith.constant 0 : i32
    %c0_i32_1 = arith.constant 0 : i32
    %c0_i32_2 = arith.constant 0 : i32
    return %c0_i32, %c0_i32_0, %c0_i32_1 : i32, i32, i32
  }
  func.func @transform_6(%arg0: i32) -> (i32, i32, i32) {
    %c0_i32 = arith.constant 0 : i32
    %c0_i32_0 = arith.constant 0 : i32
    %c0_i32_1 = arith.constant 0 : i32
    %c0_i32_2 = arith.constant 0 : i32
    return %c0_i32, %c0_i32_0, %c0_i32_1 : i32, i32, i32
  }
  func.func @transform_7(%arg0: i32) -> (i32, i32, i32) {
    %c0_i32 = arith.constant 0 : i32
    %c0_i32_0 = arith.constant 0 : i32
    %c0_i32_1 = arith.constant 0 : i32
    %c0_i32_2 = arith.constant 0 : i32
    return %c0_i32, %c0_i32_0, %c0_i32_1 : i32, i32, i32
  }
  func.func @transform_8(%arg0: i32) -> (i32, i32, i32) {
    %c0_i32 = arith.constant 0 : i32
    %c0_i32_0 = arith.constant 0 : i32
    %c0_i32_1 = arith.constant 0 : i32
    %c0_i32_2 = arith.constant 0 : i32
    return %c0_i32, %c0_i32_0, %c0_i32_1 : i32, i32, i32
  }
  func.func @transform_9(%arg0: i32) -> (i32, i32, i32) {
    %c0_i32 = arith.constant 0 : i32
    %c0_i32_0 = arith.constant 0 : i32
    %c0_i32_1 = arith.constant 0 : i32
    %c0_i32_2 = arith.constant 0 : i32
    return %c0_i32, %c0_i32_0, %c0_i32_1 : i32, i32, i32
  }
  func.func @transform_10(%arg0: i32) -> (i32, i32, i32) {
    %c0_i32 = arith.constant 0 : i32
    %c0_i32_0 = arith.constant 0 : i32
    %c0_i32_1 = arith.constant 0 : i32
    %c0_i32_2 = arith.constant 0 : i32
    return %c0_i32, %c0_i32_0, %c0_i32_1 : i32, i32, i32
  }
  func.func @transform_11(%arg0: i32) -> (i32, i32, i32) {
    %c0_i32 = arith.constant 0 : i32
    %c0_i32_0 = arith.constant 0 : i32
    %c0_i32_1 = arith.constant 0 : i32
    %c0_i32_2 = arith.constant 0 : i32
    return %c0_i32, %c0_i32_0, %c0_i32_1 : i32, i32, i32
  }
  func.func @transform_12(%arg0: i32) -> (i32, i32, i32) {
    %c0_i32 = arith.constant 0 : i32
    %c0_i32_0 = arith.constant 0 : i32
    %c0_i32_1 = arith.constant 0 : i32
    %c0_i32_2 = arith.constant 0 : i32
    return %c0_i32, %c0_i32_0, %c0_i32_1 : i32, i32, i32
  }
  func.func @transform_13(%arg0: i32) -> (i32, i32, i32) {
    %c0_i32 = arith.constant 0 : i32
    %c0_i32_0 = arith.constant 0 : i32
    %c0_i32_1 = arith.constant 0 : i32
    %c0_i32_2 = arith.constant 0 : i32
    return %c0_i32, %c0_i32_0, %c0_i32_1 : i32, i32, i32
  }
  func.func @transform_14(%arg0: i32) -> (i32, i32, i32) {
    %c0_i32 = arith.constant 0 : i32
    %c0_i32_0 = arith.constant 0 : i32
    %c0_i32_1 = arith.constant 0 : i32
    %c0_i32_2 = arith.constant 0 : i32
    return %c0_i32, %c0_i32_0, %c0_i32_1 : i32, i32, i32
  }
  func.func @transform_15(%arg0: i32) -> (i32, i32, i32) {
    %c0_i32 = arith.constant 0 : i32
    %c0_i32_0 = arith.constant 0 : i32
    %c0_i32_1 = arith.constant 0 : i32
    %c0_i32_2 = arith.constant 0 : i32
    return %c0_i32, %c0_i32_0, %c0_i32_1 : i32, i32, i32
  }
  func.func @transform_16(%arg0: i32) -> (i32, i32, i32) {
    %c0_i32 = arith.constant 0 : i32
    %c0_i32_0 = arith.constant 0 : i32
    %c0_i32_1 = arith.constant 0 : i32
    %c0_i32_2 = arith.constant 0 : i32
    return %c0_i32, %c0_i32_0, %c0_i32_1 : i32, i32, i32
  }
  func.func @transform_17(%arg0: i32) -> (i32, i32, i32) {
    %c0_i32 = arith.constant 0 : i32
    %c0_i32_0 = arith.constant 0 : i32
    %c0_i32_1 = arith.constant 0 : i32
    %c0_i32_2 = arith.constant 0 : i32
    return %c0_i32, %c0_i32_0, %c0_i32_1 : i32, i32, i32
  }
  func.func @transform_18(%arg0: i32) -> (i32, i32, i32) {
    %c0_i32 = arith.constant 0 : i32
    %c0_i32_0 = arith.constant 0 : i32
    %c0_i32_1 = arith.constant 0 : i32
    %c0_i32_2 = arith.constant 0 : i32
    return %c0_i32, %c0_i32_0, %c0_i32_1 : i32, i32, i32
  }
  func.func @transform_19(%arg0: i32) -> (i32, i32, i32) {
    %c0_i32 = arith.constant 0 : i32
    %c0_i32_0 = arith.constant 0 : i32
    %c0_i32_1 = arith.constant 0 : i32
    %c0_i32_2 = arith.constant 0 : i32
    return %c0_i32, %c0_i32_0, %c0_i32_1 : i32, i32, i32
  }
  func.func @transform_20(%arg0: i32) -> (i32, i32, i32) {
    %c0_i32 = arith.constant 0 : i32
    %c0_i32_0 = arith.constant 0 : i32
    %c0_i32_1 = arith.constant 0 : i32
    %c0_i32_2 = arith.constant 0 : i32
    return %c0_i32, %c0_i32_0, %c0_i32_1 : i32, i32, i32
  }
  func.func @transform_21(%arg0: i32) -> (i32, i32, i32) {
    %c0_i32 = arith.constant 0 : i32
    %c0_i32_0 = arith.constant 0 : i32
    %c0_i32_1 = arith.constant 0 : i32
    %c0_i32_2 = arith.constant 0 : i32
    return %c0_i32, %c0_i32_0, %c0_i32_1 : i32, i32, i32
  }
  func.func @transform_22(%arg0: i32) -> (i32, i32, i32) {
    %c0_i32 = arith.constant 0 : i32
    %c0_i32_0 = arith.constant 0 : i32
    %c0_i32_1 = arith.constant 0 : i32
    %c0_i32_2 = arith.constant 0 : i32
    return %c0_i32, %c0_i32_0, %c0_i32_1 : i32, i32, i32
  }
  func.func @transform_23(%arg0: i32) -> (i32, i32) {
    %c0_i32 = arith.constant 0 : i32
    %c0_i32_0 = arith.constant 0 : i32
    %c0_i32_1 = arith.constant 0 : i32
    return %c0_i32, %c0_i32_0 : i32, i32
  }
}

</mosaic_0001>

<bundles_post_ra>
// kernel: tpu_custom_call.1
= control target key start
LH: loop header
LB: loop body
LE: loop exit
PB: predicated region body
PF: predicated region fallthrough
CT: control target
= control target key end

     0   :  { %s9575_s0 = inlined_call_operand.hbm [shape: f32[16,32], index: 0, kind: input, shape index: {}]   ;;  %s9576_s1 = inlined_call_operand.hbm [shape: f32[16,32], index: 1, kind: input, shape index: {}]   ;;  %s9577_s2 = inlined_call_operand.hbm [shape: f32[8,8], index: 2, kind: input, shape index: {}]   ;;  %s9578_s3 = inlined_call_operand.vmem [shape: f32[2,32,96], index: 3, kind: input, shape index: {}]   ;;  %s9579_s4 = inlined_call_operand.vmem [shape: f32[2,1,96], index: 4, kind: input, shape index: {}]   ;;  %s9580_s5 = inlined_call_operand.vmem [shape: f32[2,32,32], index: 5, kind: input, shape index: {}]   ;;  %s9581_s6 = inlined_call_operand.vmem [shape: f32[2,1,32], index: 6, kind: input, shape index: {}]   ;;  %s9582_s7 = inlined_call_operand.vmem [shape: f32[2,32,32], index: 7, kind: input, shape index: {}]   ;;  %s9583_s8 = inlined_call_operand.vmem [shape: f32[2,1,32], index: 8, kind: input, shape index: {}]   ;;  %s9584_s9 = inlined_call_operand.hbm [shape: f32[2,32,64], index: 9, kind: input, shape index: {}]   ;;  %s9585_s10 = inlined_call_operand.vmem [shape: f32[2,1,64], index: 10, kind: input, shape index: {}]   ;;  %s9586_s11 = inlined_call_operand.hbm [shape: f32[2,32,32], index: 11, kind: input, shape index: {}]   ;;  %s9587_s12 = inlined_call_operand.vmem [shape: f32[2,1,32], index: 12, kind: input, shape index: {}]   ;;  %s9588_s13 = inlined_call_operand.hbm [shape: f32[2,32,64], index: 13, kind: input, shape index: {}]   ;;  %s9589_s14 = inlined_call_operand.vmem [shape: f32[2,1,64], index: 14, kind: input, shape index: {}]   ;;  %s9590_s15 = inlined_call_operand.vmem [shape: f32[2,64,32], index: 15, kind: input, shape index: {}]   ;;  %s9591_s16 = inlined_call_operand.vmem [shape: f32[2,1,32], index: 16, kind: input, shape index: {}]   ;;  %s9592_s17 = inlined_call_operand.vmem [shape: f32[2,1,32], index: 17, kind: input, shape index: {}]   ;;  %s9593_s18 = inlined_call_operand.vmem [shape: f32[2,1,32], index: 18, kind: input, shape index: {}]   ;;  %s9594_s19 = inlined_call_operand.vmem [shape: f32[2,1,32], index: 19, kind: input, shape index: {}]   ;;  %s9595_s20 = inlined_call_operand.vmem [shape: f32[2,1,32], index: 20, kind: input, shape index: {}]   ;;  %s9596_s21 = inlined_call_operand.vmem [shape: f32[2,1,32], index: 21, kind: input, shape index: {}]   ;;  %s9597_s22 = inlined_call_operand.vmem [shape: f32[2,1,32], index: 22, kind: input, shape index: {}]   ;;  %s9598_s23 = inlined_call_operand.hbm [shape: f32[16,32], index: 23, kind: output, shape index: {}]  }
   0x1   :  { %9633 = sst [smem:[#allocation19_spill]] %s9575_s0 }
   0x2   :  { %9634 = sst [smem:[#allocation20_spill]] %s9576_s1 }
   0x3   :  { %9635 = sst [smem:[#allocation21_spill]] %s9577_s2 }
   0x4   :  { %9636 = sst [smem:[#allocation22_spill]] %s9578_s3 }
   0x5   :  { %9637 = sst [smem:[#allocation23_spill]] %s9579_s4 }
   0x6   :  { %9638 = sst [smem:[#allocation24_spill]] %s9580_s5 }
   0x7   :  { %9639 = sst [smem:[#allocation25_spill]] %s9581_s6 }
   0x8   :  { %9640 = sst [smem:[#allocation26_spill]] %s9582_s7 }
   0x9   :  { %9641 = sst [smem:[#allocation27_spill]] %s9598_s23 }
   0xa   :  { %28 = vsyncpa [#allocation3], 0 }
   0xb   :  { %29 = vsyncpa [#allocation6], 0 }
   0xc   :  { %30 = vsyncpa [#allocation9], 0 }
   0xd   :  { %31 = vsyncpa [#allocation12], 0 }
   0xe   :  { %32 = vsyncpa [#allocation4], 0  ;;  %s8436_s4 = smov [#allocation5]   ;;  %s8437_s24 = smov [#allocation8]  }
   0xf   :  { %s50_s30 = sshll.u32 %s8436_s4, 4  ;;  %s84_s25 = sshll.u32 %s8437_s24, 4  ;;  %s51_s30 = int_to_ptr.vmem [resolvable:$true] %s50_s30  ;;  %s85_s25 = int_to_ptr.vmem [resolvable:$true] %s84_s25 }
  0x10   :  { %s8294_s5 = scalar_lea.vmem %s51_s30, 256  ;;  %p8299_p1 = scmp.lt.s32.totalorder %s51_s30, %s51_s30 }
  0x11   :  { %p8295_p0 = scmp.ne.s32.totalorder %s51_s30, %s8294_s5  ;;  %p8300_p2 = scmp.lt.s32.totalorder %s8294_s5, %s8294_s5 }
  0x13   :  { %p8301_p3 = por %p8300_p2, %p8299_p1 }
  0x15   :  { %p8302_p4 = pnand %p8301_p3, %p8295_p0 }
  0x17   :  { %8305 = shalt.err (!%p8302_p4)
}
  0x18   :  { %s9604_s1 = smov 128   ;;  %s9615_s26 = smov 8  }
  0x19   :  { %s9642_s27 = sld [smem:[#allocation20_spill]]  ;;  %s8314_s7 = scalar_lea.vmem %s85_s25, 1024 }
  0x1a   :  { %p8315_p5 = scmp.ne.s32.totalorder %s85_s25, %s8314_s7  ;;  %p8319_p6 = scmp.lt.s32.totalorder %s85_s25, %s85_s25 }
  0x1b   :  { %p8320_p7 = scmp.lt.s32.totalorder %s8314_s7, %s8314_s7 }
  0x1d   :  { %p8321_p8 = por %p8320_p7, %p8319_p6 }
  0x1f   :  { %56 = dma.hbm_to_vmem [thread:$0]  %s9642_s27, 256, %s51_s30, [#allocation6], %s9604_s1, %s9604_s1, %s9615_s26  }
  0x20   :  { %p8322_p9 = pnand %p8321_p8, %p8315_p5 }
  0x22   :  { %8325 = shalt.err (!%p8322_p9)
}
  0x23   :  { %90 = dma.hbm_to_vmem [thread:$0]  %s9584_s9, 1024, %s85_s25, [#allocation9], %s9604_s1, %s9604_s1, %s9615_s26  }
  0x24   :  { %s8440_s3 = smov [#allocation2]   ;;  %s8441_s4 = smov [#allocation7]  }
  0x25   :  { %s38_s0 = sshll.u32 %s8440_s3, 4  ;;  %s63_s24 = sshll.u32 %s8441_s4, 4  ;;  %s39_s0 = int_to_ptr.vmem [resolvable:$true] %s38_s0  ;;  %s64_s24 = int_to_ptr.vmem [resolvable:$true] %s63_s24 }
  0x26   :  { %s8334_s30 = scalar_lea.vmem %s39_s0, 256  ;;  %p8339_p11 = scmp.lt.s32.totalorder %s39_s0, %s39_s0 }
  0x27   :  { %p8335_p10 = scmp.ne.s32.totalorder %s39_s0, %s8334_s30  ;;  %p8340_p12 = scmp.lt.s32.totalorder %s8334_s30, %s8334_s30 }
  0x29   :  { %p8341_p13 = por %p8340_p12, %p8339_p11 }
  0x2b   :  { %p8342_p0 = pnand %p8341_p13, %p8335_p10 }
  0x2d   :  { %8345 = shalt.err (!%p8342_p0)
}
  0x2e   :  { %s9643_s6 = sld [smem:[#allocation19_spill]]  ;;  %s8354_s9 = scalar_lea.vmem %s64_s24, 128 }
  0x2f   :  { %p8355_p1 = scmp.ne.s32.totalorder %s64_s24, %s8354_s9  ;;  %p8359_p2 = scmp.lt.s32.totalorder %s64_s24, %s64_s24 }
  0x30   :  { %p8360_p3 = scmp.lt.s32.totalorder %s8354_s9, %s8354_s9 }
  0x32   :  { %p8361_p4 = por %p8360_p3, %p8359_p2 }
  0x34   :  { %44 = dma.hbm_to_vmem [thread:$0]  %s9643_s6, 256, %s39_s0, [#allocation3], %s9604_s1, %s9604_s1, %s9615_s26  }
  0x35   :  { %p8362_p5 = pnand %p8361_p4, %p8355_p1 }
  0x37   :  { %8365 = shalt.err (!%p8362_p5)
}
  0x38   :  { %s9644_s7 = sld [smem:[#allocation21_spill]]  ;;  %s8442_s28 = smov [#allocation10]  }
  0x39   :  { %s98_s29 = sshll.u32 %s8442_s28, 4  ;;  %s8443_s3 = smov [#allocation11]   ;;  %s99_s29 = int_to_ptr.vmem [resolvable:$true] %s98_s29 }
  0x3a   :  { %s112_s4 = sshll.u32 %s8443_s3, 4  ;;  %s8374_s30 = scalar_lea.vmem %s99_s29, 1024  ;;  %s113_s4 = int_to_ptr.vmem [resolvable:$true] %s112_s4 }
  0x3b   :  { %p8375_p6 = scmp.ne.s32.totalorder %s99_s29, %s8374_s30  ;;  %p8379_p7 = scmp.lt.s32.totalorder %s99_s29, %s99_s29 }
  0x3c   :  { %p8380_p8 = scmp.lt.s32.totalorder %s8374_s30, %s8374_s30 }
  0x3e   :  { %66 = dma.hbm_to_vmem [thread:$0]  %s9644_s7, 128, %s64_s24, [#allocation6]  }
  0x3f   :  { %p8381_p9 = por %p8380_p8, %p8379_p7 }
  0x41   :  { %p8382_p10 = pnand %p8381_p9, %p8375_p6 }
  0x43   :  { %8385 = shalt.err (!%p8382_p10)
}
  0x44   :  { %104 = dma.hbm_to_vmem [thread:$0]  %s9586_s11, 1024, %s99_s29, [#allocation9], %s9604_s1, %s9604_s1, %s9615_s26  }
  0x45   :  { %s8394_s24 = scalar_lea.vmem %s113_s4, 1024  ;;  %p8399_p12 = scmp.lt.s32.totalorder %s113_s4, %s113_s4 }
  0x46   :  { %p8395_p11 = scmp.ne.s32.totalorder %s113_s4, %s8394_s24  ;;  %p8400_p13 = scmp.lt.s32.totalorder %s8394_s24, %s8394_s24 }
  0x48   :  { %p8401_p0 = por %p8400_p13, %p8399_p12 }
  0x4a   :  { %p8402_p1 = pnand %p8401_p0, %p8395_p11 }
  0x4c   :  { %8405 = shalt.err (!%p8402_p1)
}
  0x4d   :  { %118 = dma.hbm_to_vmem [thread:$0]  %s9588_s13, 1024, %s113_s4, [#allocation12], %s9604_s1, %s9604_s1, %s9615_s26  }
  0x4e   :  { %8426 = dma.done.wait [#allocation3], 256  }
  0x4f   :  { %8427 = vsyncadd [#allocation3], 4294967040 }
  0x50   :  { %8428 = dma.done.wait [#allocation6], 384  }
  0x51   :  { %8429 = vsyncadd [#allocation6], 4294966912 }
  0x52   :  { %8430 = dma.done.wait [#allocation9], 2048  }
  0x53   :  { %8431 = vsyncadd [#allocation9], 4294965248 }
  0x54   :  { %8432 = dma.done.wait [#allocation12], 1024  }
  0x55   :  { %8433 = vsyncadd [#allocation12], 4294966272  ;;  %vm171_vm0 = vcmask 261120   ;;  %s9645_s25 = sld [smem:[#allocation22_spill]]  ;;  %v8619_v2 = vld [vmem:[#allocation2] sm:$0xff]  ;;  %v8629_v5 = vld [vmem:[#allocation2 + $0x8] sm:$0xff] }
  0x56   :  { %7625 = vmatprep.mubr.msk.f32.mxu1 %vm171_vm0, %v8619_v2  ;;  %v8444_v6 = vmov 0.0   ;;  %vm8445_vm1 = vmmov 0   ;;  %s9646_s0 = sld [smem:[#allocation23_spill]]  ;;  %s9631_s5 = smov 96   ;;  %vm256_vm2 = vcmask 64512   ;;  %v8662_v15 = vld [vmem:[#allocation7] sm:$0xff] }
  0x57   :  { %7638 = vmatprep.subr.mxu0 %v8444_v6  ;;  %7640 = vmatprep.mubr.msk.f32.mxu0 %vm8445_vm1, %v8444_v6  ;;  %s9611_s24 = smov 64   ;;  %s9629_s2 = smov 88   ;;  %vm1617_vm3 = vcmask 195584   ;;  %vm1614_vm4 = vcmask 130048   ;;  %vm3544_vm5 = vcmask 523264  }
  0x58   :  { %s9627_s6 = smov 120   ;;  %s9609_s11 = smov 56  }
  0x59   :  { %s9625_s9 = smov 80   ;;  %s9623_s27 = smov 112  }
  0x5a   :  { %s9607_s7 = smov 48   ;;  %s9621_s13 = smov 72  }
  0x5b   :  { %v163_v0 = vld [vmem:[%s9645_s25 + $0x18] sm:$0xff]  ;;  %v162_v1 = vld [vmem:[%s9645_s25 + $0x10] sm:$0xff]  ;;  %v161_v3 = vld [vmem:[%s9645_s25 + $0x8] sm:$0xff]  ;;  %s9619_s28 = smov 104   ;;  %s9605_s29 = smov 40  }
  0x5c   :  { %7617 = vmatprep.subr.mxu1 %v163_v0  ;;  %v160_v4 = vld [vmem:[%s9645_s25] sm:$0xff]  ;;  %s9613_s3 = smov 16   ;;  %s9647_s1 = sld [smem:[#allocation24_spill]] }
  0x5d   :  { %7618 = vmatpush3.msra.mxu1 %v163_v0  ;;  %v7214_v8 = vld [vmem:[%s9646_s0] ss:$0 sm:$0xff]  ;;  %s9617_s4 = smov 24   ;;  %s9654_s30 = smov 120  }
  0x5e   :  { %7619 = vmatprep.subr.mxu1 %v162_v1 }
  0x5f   :  { %7620 = vmatpush3.msra.mxu1 %v162_v1 }
  0x60   :  { %7621 = vmatprep.subr.mxu1 %v161_v3 }
  0x61   :  { %7622 = vmatpush3.msra.mxu1 %v161_v3 }
  0x62   :  { %7623 = vmatprep.subr.mxu1 %v160_v4 }
  0x63   :  { %7624 = vmatpush3.msra.mxu1 %v160_v4 }
  0x64   :  { %7626 = vmatmul.mubr.msk.f32.vlgmr.msra.gmra.mxu1 %vm171_vm0, %v8629_v5  ;;  %7628 = vmatprep.subr.mxu1 %v8444_v6 }
  0x65   :  { %7630 = vmatprep.mubr.msk.f32.mxu1 %vm8445_vm1, %v8444_v6 }
 0x124   :  { %v7627_v7 = vpop.f32.mrf.mxu1 }
 0x125   :  { %v8646_v11 = vadd.f32 %v7627_v7, %v7214_v8 }
 0x126   :  { %v244_v9 = vpop.f32.mrf.mxu1 }
 0x127   :  { %v8642_v10 = vadd.f32 %v7214_v8, %v244_v9 }
 0x129   :  { %254 = vrot.lane.b32.xlu0 %v8642_v10, %s9631_s5 }
 0x12d   :  { %332 = vrot.lane.b32.xlu0 %v8646_v11, %s9631_s5 }
 0x19b   :  { %v255_v12 = vpop.permute.xlu0 %254 }
 0x19c   :  { %7629 = vmatpush3.xpose.msk.msra.mxu1 %vm256_vm2, %v255_v12 }
 0x19d   :  { %7633 = vmatprep.subr.mxu1 %v8444_v6 }
 0x19f   :  { %7631 = vmatmul.mubr.msk.f32.vlgmr.msra.gmra.mxu1 %vm256_vm2, %v8642_v10  ;;  %v333_v13 = vpop.permute.xlu0 %332 }
 0x1a0   :  { %7634 = vmatpush3.xpose.msk.msra.mxu1 %vm256_vm2, %v333_v13  ;;  %7635 = vmatprep.mubr.msk.f32.mxu1 %vm8445_vm1, %v8444_v6 }
 0x1a1   :  { %7643 = vmatprep.subr.mxu1 %v8444_v6 }
 0x1a3   :  { %7636 = vmatmul.mubr.msk.f32.vlgmr.msra.gmra.mxu1 %vm256_vm2, %v8646_v11 }
 0x1a4   :  { %7645 = vmatprep.mubr.msk.f32.mxu1 %vm8445_vm1, %v8444_v6 }
 0x25f   :  { %v327_v14 = vpop.f32.mrf.mxu1 }
 0x260   :  { %v408_v16 = vmul.f32 0.35355338, %v327_v14 }
 0x261   :  { %v7632_v17 = vpop.f32.mrf.mxu1 }
 0x262   :  { %v410_v18 = vadd.f32 %v408_v16, %v8662_v15 }
 0x263   :  { %v404_v19 = vpop.f32.mrf.mxu1 }
 0x264   :  { %v409_v20 = vmul.f32 0.35355338, %v404_v19  ;;  %v412_v21 = vsel %vm256_vm2, %v410_v18, -inf }
 0x265   :  { %413 = vmax.xlane.f32.xlu1 %v412_v21  ;;  %v7637_v22 = vpop.f32.mrf.mxu1 }
 0x266   :  { %v411_v23 = vadd.f32 %v409_v20, %v8662_v15 }
 0x268   :  { %v415_v24 = vsel %vm256_vm2, %v411_v23, -inf }
 0x269   :  { %416 = vmax.xlane.f32.xlu1 %v415_v24 }
 0x27a   :  { %434 = vrot.lane.b32.xlu1 %v8642_v10, %s9611_s24 }
 0x27e   :  { %510 = vrot.lane.b32.xlu1 %v8646_v11, %s9611_s24  ;;  %s9651_s24 = smov 16  }
 0x282   :  { %588 = vrot.lane.b32.xlu1 %v8642_v10, %s9629_s2 }
 0x286   :  { %666 = vrot.lane.b32.xlu1 %v8646_v11, %s9629_s2 }
 0x2ee   :  { %v414_v25 = vpop.xlane.xlu1 %413 }
 0x2ef   :  { %v418_v26 = vsub.f32 %v410_v18, %v414_v25 }
 0x2f1   :  { %v420_v27 = vmul.f32 1.442695, %v418_v26 }
 0x2f2   :  { %v417_v28 = vpop.xlane.xlu1 %416 }
 0x2f3   :  { %8131 = vpow2.f32 %v420_v27  ;;  %v419_v29 = vsub.f32 %v411_v23, %v417_v28 }
 0x2f5   :  { %v422_v30 = vmul.f32 1.442695, %v419_v29 }
 0x2f6   :  { %v435_v31 = vpop.permute.xlu1 %434 }
 0x2f7   :  { %8133 = vpow2.f32 %v422_v30  ;;  %7639 = vmatpush3.msra.mxu0 %v435_v31 }
 0x2f8   :  { %7648 = vmatprep.subr.mxu0 %v8444_v6 }
 0x2fa   :  { %v511_v32 = vpop.permute.xlu1 %510 }
 0x2fb   :  { %7644 = vmatpush3.msra.mxu1 %v511_v32 }
 0x2fc   :  { %7653 = vmatprep.subr.mxu1 %v8444_v6 }
 0x2fe   :  { %v589_v37 = vpop.permute.xlu1 %588 }
 0x300   :  { %v8132_v33 = vpop.eup %8131 }
 0x301   :  { %v424_v34 = vsel %vm256_vm2, %v8132_v33, 0.0 }
 0x302   :  { %425 = vadd.xlane.f32.xlu0 %v424_v34  ;;  %v667_v38 = vpop.permute.xlu1 %666 }
 0x304   :  { %v8134_v35 = vpop.eup %8133 }
 0x305   :  { %v427_v36 = vsel %vm256_vm2, %v8134_v35, 0.0 }
 0x306   :  { %428 = vadd.xlane.f32.xlu1 %v427_v36 }
 0x317   :  { %664 = vrot.lane.b32.xlu1 %v8646_v11, %s9627_s6 }
 0x318   :  { %586 = vrot.lane.b32.xlu0 %v8642_v10, %s9627_s6 }
 0x38b   :  { %v426_v39 = vpop.xlane.xlu0 %425 }
 0x38c   :  { %8135 = vrcp.f32 %v426_v39 }
 0x38f   :  { %v429_v40 = vpop.xlane.xlu1 %428  ;;  %v587_v45 = vpop.permute.xlu0 %586 }
 0x390   :  { %8137 = vrcp.f32 %v429_v40 }
 0x393   :  { %v665_v46 = vpop.permute.xlu1 %664 }
 0x399   :  { %v8136_v41 = vpop.eup %8135 }
 0x39a   :  { %v432_v42 = vmul.f32 %v8136_v41, %v8132_v33 }
 0x39c   :  { %7641 = vmatmul.mubr.msk.f32.vlgmr.msra.gmra.mxu0 %vm256_vm2, %v432_v42 }
 0x39d   :  { %v8138_v43 = vpop.eup %8137  ;;  %7649 = vmatpush3.xpose.msk.msra.mxu0 %vm256_vm2, %v589_v37  ;;  %7650 = vmatprep.mubr.msk.f32.mxu0 %vm8445_vm1, %v8444_v6 }
 0x39e   :  { %v433_v44 = vmul.f32 %v8138_v43, %v8134_v35  ;;  %7658 = vmatprep.subr.mxu0 %v8444_v6 }
 0x3a0   :  { %7646 = vmatmul.mubr.msk.f32.vlgmr.msra.gmra.mxu1 %vm256_vm2, %v433_v44  ;;  %7651 = vmatmul.mubr.msk.f32.vlgmr.msra.gmra.mxu0 %vm256_vm2, %v587_v45 }
 0x3a1   :  { %7654 = vmatpush3.xpose.msk.msra.mxu1 %vm256_vm2, %v667_v38  ;;  %7655 = vmatprep.mubr.msk.f32.mxu1 %vm8445_vm1, %v8444_v6 }
 0x3a2   :  { %7663 = vmatprep.subr.mxu1 %v8444_v6  ;;  %7660 = vmatprep.mubr.msk.f32.mxu0 %vm8445_vm1, %v8444_v6 }
 0x3a4   :  { %7656 = vmatmul.mubr.msk.f32.vlgmr.msra.gmra.mxu1 %vm256_vm2, %v665_v46 }
 0x3a5   :  { %7665 = vmatprep.mubr.msk.f32.mxu1 %vm8445_vm1, %v8444_v6 }
 0x45c   :  { %v8700_v47 = vpop.f32.mrf.mxu0 }
 0x45e   :  { %v7642_v48 = vpop.f32.mrf.mxu0 }
 0x460   :  { %v8702_v49 = vpop.f32.mrf.mxu1  ;;  %v660_v50 = vpop.f32.mrf.mxu0 }
 0x461   :  { %v742_v51 = vmul.f32 0.35355338, %v660_v50 }
 0x462   :  { %v7647_v52 = vpop.f32.mrf.mxu1  ;;  %v7652_v53 = vpop.f32.mrf.mxu0 }
 0x463   :  { %v744_v54 = vadd.f32 %v742_v51, %v8662_v15 }
 0x464   :  { %v738_v55 = vpop.f32.mrf.mxu1 }
 0x465   :  { %v743_v56 = vmul.f32 0.35355338, %v738_v55  ;;  %v746_v57 = vsel %vm256_vm2, %v744_v54, -inf }
 0x466   :  { %v7657_v58 = vpop.f32.mrf.mxu1  ;;  %747 = vmax.xlane.f32.xlu1 %v746_v57 }
 0x467   :  { %v745_v59 = vadd.f32 %v743_v56, %v8662_v15 }
 0x469   :  { %v749_v60 = vsel %vm256_vm2, %v745_v59, -inf }
 0x46a   :  { %750 = vmax.xlane.f32.xlu0 %v749_v60 }
 0x477   :  { %768 = vrot.lane.b32.xlu1 %v8642_v10, %s9609_s11 }
 0x47b   :  { %922 = vrot.lane.b32.xlu1 %v8642_v10, %s9625_s9 }
 0x47f   :  { %1000 = vrot.lane.b32.xlu1 %v8646_v11, %s9625_s9 }
 0x480   :  { %844 = vrot.lane.b32.xlu0 %v8646_v11, %s9609_s11  ;;  %s9648_s11 = sld [smem:[#allocation25_spill]] }
 0x484   :  { %920 = vrot.lane.b32.xlu0 %v8642_v10, %s9623_s27 }
 0x4ef   :  { %v748_v61 = vpop.xlane.xlu1 %747 }
 0x4f0   :  { %v752_v62 = vsub.f32 %v744_v54, %v748_v61 }
 0x4f2   :  { %v754_v63 = vmul.f32 1.442695, %v752_v62 }
 0x4f3   :  { %v769_v0 = vpop.permute.xlu1 %768  ;;  %v751_v1 = vpop.xlane.xlu0 %750 }
 0x4f4   :  { %8139 = vpow2.f32 %v754_v63  ;;  %v753_v3 = vsub.f32 %v745_v59, %v751_v1  ;;  %7659 = vmatpush3.msra.mxu0 %v769_v0 }
 0x4f5   :  { %7668 = vmatprep.subr.mxu0 %v8444_v6 }
 0x4f6   :  { %v756_v4 = vmul.f32 1.442695, %v753_v3 }
 0x4f7   :  { %v845_v7 = vpop.permute.xlu0 %844  ;;  %v923_v14 = vpop.permute.xlu1 %922 }
 0x4f8   :  { %8141 = vpow2.f32 %v756_v4  ;;  %7664 = vmatpush3.msra.mxu1 %v845_v7 }
 0x4f9   :  { %7673 = vmatprep.subr.mxu1 %v8444_v6 }
 0x4fb   :  { %v1001_v16 = vpop.permute.xlu1 %1000  ;;  %v921_v23 = vpop.permute.xlu0 %920 }
 0x501   :  { %v8140_v8 = vpop.eup %8139 }
 0x502   :  { %v758_v9 = vsel %vm256_vm2, %v8140_v8, 0.0 }
 0x503   :  { %759 = vadd.xlane.f32.xlu1 %v758_v9 }
 0x505   :  { %v8142_v12 = vpop.eup %8141 }
 0x506   :  { %v761_v13 = vsel %vm256_vm2, %v8142_v12, 0.0 }
 0x507   :  { %762 = vadd.xlane.f32.xlu1 %v761_v13 }
 0x518   :  { %998 = vrot.lane.b32.xlu1 %v8646_v11, %s9623_s27 }
 0x58c   :  { %v760_v17 = vpop.xlane.xlu1 %759 }
 0x58d   :  { %8143 = vrcp.f32 %v760_v17 }
 0x590   :  { %v763_v18 = vpop.xlane.xlu1 %762 }
 0x591   :  { %8145 = vrcp.f32 %v763_v18 }
 0x594   :  { %v999_v24 = vpop.permute.xlu1 %998 }
 0x59a   :  { %v8144_v19 = vpop.eup %8143 }
 0x59b   :  { %v766_v20 = vmul.f32 %v8144_v19, %v8140_v8 }
 0x59d   :  { %7661 = vmatmul.mubr.msk.f32.vlgmr.msra.gmra.mxu0 %vm256_vm2, %v766_v20 }
 0x59e   :  { %v8146_v21 = vpop.eup %8145  ;;  %7669 = vmatpush3.xpose.msk.msra.mxu0 %vm256_vm2, %v923_v14  ;;  %7670 = vmatprep.mubr.msk.f32.mxu0 %vm8445_vm1, %v8444_v6 }
 0x59f   :  { %v767_v22 = vmul.f32 %v8146_v21, %v8142_v12  ;;  %7678 = vmatprep.subr.mxu0 %v8444_v6 }
 0x5a1   :  { %7666 = vmatmul.mubr.msk.f32.vlgmr.msra.gmra.mxu1 %vm256_vm2, %v767_v22  ;;  %7671 = vmatmul.mubr.msk.f32.vlgmr.msra.gmra.mxu0 %vm256_vm2, %v921_v23 }
 0x5a2   :  { %7674 = vmatpush3.xpose.msk.msra.mxu1 %vm256_vm2, %v1001_v16  ;;  %7675 = vmatprep.mubr.msk.f32.mxu1 %vm8445_vm1, %v8444_v6 }
 0x5a3   :  { %7683 = vmatprep.subr.mxu1 %v8444_v6  ;;  %7680 = vmatprep.mubr.msk.f32.mxu0 %vm8445_vm1, %v8444_v6 }
 0x5a5   :  { %7676 = vmatmul.mubr.msk.f32.vlgmr.msra.gmra.mxu1 %vm256_vm2, %v999_v24 }
 0x5a6   :  { %7685 = vmatprep.mubr.msk.f32.mxu1 %vm8445_vm1, %v8444_v6 }
 0x65d   :  { %v8740_v25 = vpop.f32.mrf.mxu0 }
 0x65f   :  { %v7662_v26 = vpop.f32.mrf.mxu0 }
 0x661   :  { %v8742_v27 = vpop.f32.mrf.mxu1  ;;  %v994_v28 = vpop.f32.mrf.mxu0 }
 0x662   :  { %v1076_v29 = vmul.f32 0.35355338, %v994_v28 }
 0x663   :  { %v7667_v30 = vpop.f32.mrf.mxu1  ;;  %v7672_v31 = vpop.f32.mrf.mxu0 }
 0x664   :  { %v1078_v32 = vadd.f32 %v1076_v29, %v8662_v15 }
 0x665   :  { %v1072_v33 = vpop.f32.mrf.mxu1 }
 0x666   :  { %v1077_v34 = vmul.f32 0.35355338, %v1072_v33  ;;  %v1080_v35 = vsel %vm256_vm2, %v1078_v32, -inf }
 0x667   :  { %v7677_v36 = vpop.f32.mrf.mxu1  ;;  %1081 = vmax.xlane.f32.xlu0 %v1080_v35  ;;  %v1622_v35 = vld [vmem:[%s9647_s1 + $0x10] sm:$0xff] }
 0x668   :  { %v1079_v37 = vadd.f32 %v1077_v34, %v8662_v15  ;;  %v1621_v36 = vld [vmem:[%s9647_s1 + $0x8] sm:$0xff] }
 0x66a   :  { %v1083_v38 = vsel %vm256_vm2, %v1079_v37, -inf }
 0x66b   :  { %1084 = vmax.xlane.f32.xlu1 %v1083_v38 }
 0x67c   :  { %1102 = vrot.lane.b32.xlu1 %v8642_v10, %s9607_s7 }
 0x67d   :  { %1178 = vrot.lane.b32.xlu0 %v8646_v11, %s9607_s7  ;;  %s9652_s7 = smov 24  }
 0x680   :  { %1256 = vrot.lane.b32.xlu1 %v8642_v10, %s9621_s13 }
 0x684   :  { %1334 = vrot.lane.b32.xlu1 %v8646_v11, %s9621_s13 }
 0x688   :  { %1332 = vrot.lane.b32.xlu1 %v8646_v11, %s9619_s28 }
 0x6f0   :  { %v1082_v39 = vpop.xlane.xlu0 %1081 }
 0x6f1   :  { %v1086_v40 = vsub.f32 %v1078_v32, %v1082_v39 }
 0x6f3   :  { %v1088_v41 = vmul.f32 1.442695, %v1086_v40 }
 0x6f4   :  { %v1085_v42 = vpop.xlane.xlu1 %1084  ;;  %v1179_v43 = vpop.permute.xlu0 %1178 }
 0x6f5   :  { %8147 = vpow2.f32 %v1088_v41  ;;  %v1087_v44 = vsub.f32 %v1079_v37, %v1085_v42  ;;  %7684 = vmatpush3.msra.mxu1 %v1179_v43  ;;  %v1620_v37 = vld [vmem:[%s9647_s1] sm:$0xff] }
 0x6f6   :  { %7693 = vmatprep.subr.mxu1 %v8444_v6 }
 0x6f7   :  { %v1090_v45 = vmul.f32 1.442695, %v1087_v44 }
 0x6f8   :  { %v1103_v46 = vpop.permute.xlu1 %1102 }
 0x6f9   :  { %8149 = vpow2.f32 %v1090_v45  ;;  %7679 = vmatpush3.msra.mxu0 %v1103_v46 }
 0x6fa   :  { %7688 = vmatprep.subr.mxu0 %v8444_v6 }
 0x6fc   :  { %v1257_v55 = vpop.permute.xlu1 %1256 }
 0x700   :  { %v1335_v59 = vpop.permute.xlu1 %1334 }
 0x702   :  { %v8148_v48 = vpop.eup %8147 }
 0x703   :  { %v1092_v50 = vsel %vm256_vm2, %v8148_v48, 0.0 }
 0x704   :  { %1093 = vadd.xlane.f32.xlu0 %v1092_v50  ;;  %v1333_v62 = vpop.permute.xlu1 %1332 }
 0x706   :  { %v8150_v51 = vpop.eup %8149 }
 0x707   :  { %v1095_v52 = vsel %vm256_vm2, %v8150_v51, 0.0 }
 0x708   :  { %1096 = vadd.xlane.f32.xlu0 %v1095_v52 }
 0x71e   :  { %1254 = vrot.lane.b32.xlu0 %v8642_v10, %s9619_s28 }
 0x78d   :  { %v1094_v53 = vpop.xlane.xlu0 %1093 }
 0x78e   :  { %8151 = vrcp.f32 %v1094_v53 }
 0x791   :  { %v1097_v54 = vpop.xlane.xlu0 %1096 }
 0x792   :  { %8153 = vrcp.f32 %v1097_v54 }
 0x795   :  { %v1255_v61 = vpop.permute.xlu0 %1254 }
 0x79b   :  { %v8152_v56 = vpop.eup %8151 }
 0x79c   :  { %v1100_v57 = vmul.f32 %v8152_v56, %v8148_v48 }
 0x79e   :  { %7681 = vmatmul.mubr.msk.f32.vlgmr.msra.gmra.mxu0 %vm256_vm2, %v1100_v57 }
 0x79f   :  { %v8154_v58 = vpop.eup %8153  ;;  %7689 = vmatpush3.xpose.msk.msra.mxu0 %vm256_vm2, %v1257_v55  ;;  %7690 = vmatprep.mubr.msk.f32.mxu0 %vm8445_vm1, %v8444_v6 }
 0x7a0   :  { %v1101_v60 = vmul.f32 %v8154_v58, %v8150_v51  ;;  %7698 = vmatprep.subr.mxu0 %v8444_v6 }
 0x7a2   :  { %7686 = vmatmul.mubr.msk.f32.vlgmr.msra.gmra.mxu1 %vm256_vm2, %v1101_v60  ;;  %7691 = vmatmul.mubr.msk.f32.vlgmr.msra.gmra.mxu0 %vm256_vm2, %v1255_v61 }
 0x7a3   :  { %7694 = vmatpush3.xpose.msk.msra.mxu1 %vm256_vm2, %v1335_v59  ;;  %7695 = vmatprep.mubr.msk.f32.mxu1 %vm8445_vm1, %v8444_v6 }
 0x7a4   :  { %7703 = vmatprep.subr.mxu1 %v8444_v6  ;;  %7700 = vmatprep.mubr.msk.f32.mxu0 %vm8445_vm1, %v8444_v6 }
 0x7a6   :  { %7696 = vmatmul.mubr.msk.f32.vlgmr.msra.gmra.mxu1 %vm256_vm2, %v1333_v62 }
 0x7a7   :  { %7705 = vmatprep.mubr.msk.f32.mxu1 %vm8445_vm1, %v8444_v6 }
 0x85e   :  { %v1174_v63 = vpop.f32.mrf.mxu0 }
 0x860   :  { %v7682_v0 = vpop.f32.mrf.mxu0 }
 0x862   :  { %v1250_v1 = vpop.f32.mrf.mxu1  ;;  %v1328_v3 = vpop.f32.mrf.mxu0 }
 0x863   :  { %v1410_v4 = vmul.f32 0.35355338, %v1328_v3 }
 0x864   :  { %v7687_v7 = vpop.f32.mrf.mxu1  ;;  %v7692_v8 = vpop.f32.mrf.mxu0 }
 0x865   :  { %v1412_v9 = vadd.f32 %v1410_v4, %v8662_v15 }
 0x866   :  { %v1406_v12 = vpop.f32.mrf.mxu1 }
 0x867   :  { %v1411_v13 = vmul.f32 0.35355338, %v1406_v12  ;;  %v1414_v14 = vsel %vm256_vm2, %v1412_v9, -inf }
 0x868   :  { %v7697_v16 = vpop.f32.mrf.mxu1  ;;  %1415 = vmax.xlane.f32.xlu0 %v1414_v14 }
 0x869   :  { %v1413_v17 = vadd.f32 %v1411_v13, %v8662_v15  ;;  %v1854_v13 = vld [vmem:[#allocation8 + $0x18] sm:$0xff] }
 0x86b   :  { %v1417_v18 = vsel %vm256_vm2, %v1413_v17, -inf }
 0x86c   :  { %1418 = vmax.xlane.f32.xlu1 %v1417_v18  ;;  %v157_v18 = vld [vmem:[#allocation5] sm:$0xff] }
 0x87d   :  { %1436 = vrot.lane.b32.xlu1 %v8642_v10, %s9605_s29 }
 0x881   :  { %1590 = vrot.lane.b32.xlu1 %v8740_v25, %s9615_s26 }
 0x885   :  { %1592 = vrot.lane.b32.xlu1 %v8742_v27, %s9615_s26  ;;  %s9650_s26 = smov 8  }
 0x889   :  { %1600 = vrot.lane.b32.xlu1 %v1250_v1, %s9613_s3 }
 0x8f1   :  { %v1416_v19 = vpop.xlane.xlu0 %1415 }
 0x8f2   :  { %v1420_v20 = vsub.f32 %v1412_v9, %v1416_v19  ;;  %v1851_v19 = vld [vmem:[#allocation8] sm:$0xff] }
 0x8f4   :  { %v1422_v21 = vmul.f32 1.442695, %v1420_v20 }
 0x8f5   :  { %v1419_v15 = vpop.xlane.xlu1 %1418 }
 0x8f6   :  { %8155 = vpow2.f32 %v1422_v21  ;;  %v1421_v22 = vsub.f32 %v1413_v17, %v1419_v15  ;;  %v1852_v17 = vld [vmem:[#allocation8 + $0x8] sm:$0xff]  ;;  %v158_v21 = vld [vmem:[#allocation5 + $0x8] sm:$0xff] }
 0x8f8   :  { %v1424_v23 = vmul.f32 1.442695, %v1421_v22 }
 0x8f9   :  { %v1437_v24 = vpop.permute.xlu1 %1436 }
 0x8fa   :  { %8157 = vpow2.f32 %v1424_v23  ;;  %7699 = vmatpush3.msra.mxu0 %v1437_v24 }
 0x8fd   :  { %v1591_v42 = vpop.permute.xlu1 %1590 }
 0x8fe   :  { %v1612_v45 = vsel %vm256_vm2, %v8700_v47, %v1591_v42  ;;  %v7241_v47 = vld [vmem:[%s9648_s11] ss:$0 sm:$0xff] }
 0x8ff   :  { %v7246_v42 = vld [vmem:[%s9583_s8] ss:$0 sm:$0xff] }
 0x901   :  { %v1593_v43 = vpop.permute.xlu1 %1592 }
 0x902   :  { %v1613_v52 = vsel %vm256_vm2, %v8702_v49, %v1593_v43 }
 0x903   :  { %v8156_v10 = vpop.eup %8155 }
 0x904   :  { %v1426_v26 = vsel %vm256_vm2, %v8156_v10, 0.0 }
 0x905   :  { %1427 = vadd.xlane.f32.xlu0 %v1426_v26  ;;  %v1601_v46 = vpop.permute.xlu1 %1600 }
 0x906   :  { %v1616_v53 = vsel %vm1614_vm4, %v1613_v52, %v1601_v46 }
 0x907   :  { %v8158_v25 = vpop.eup %8157 }
 0x908   :  { %v1429_v27 = vsel %vm256_vm2, %v8158_v25, 0.0 }
 0x909   :  { %1430 = vadd.xlane.f32.xlu0 %v1429_v27 }
 0x91f   :  { %1512 = vrot.lane.b32.xlu0 %v8646_v11, %s9605_s29  ;;  %v1623_v11 = vld [vmem:[%s9647_s1 + $0x18] sm:$0xff]  ;;  %s9656_s29 = smov 80  }
 0x920   :  { %7708 = vmatprep.subr.mxu0 %v1623_v11 }
 0x923   :  { %1598 = vrot.lane.b32.xlu0 %v1174_v63, %s9613_s3  ;;  %s9649_s3 = sld [smem:[#allocation26_spill]] }
 0x929   :  { %v1762_v14 = vld [vmem:[%s9649_s3 + $0x18] sm:$0xff]  ;;  %v1761_v16 = vld [vmem:[%s9649_s3 + $0x10] sm:$0xff]  ;;  %v1760_v20 = vld [vmem:[%s9649_s3 + $0x8] sm:$0xff] }
 0x92a   :  { %v1759_v15 = vld [vmem:[%s9649_s3] sm:$0xff] }
 0x98e   :  { %v1428_v28 = vpop.xlane.xlu0 %1427 }
 0x98f   :  { %8159 = vrcp.f32 %v1428_v28  ;;  %v7244_v28 = vld [vmem:[%s9592_s17] ss:$0 sm:$0xff] }
 0x992   :  { %v1431_v29 = vpop.xlane.xlu0 %1430 }
 0x993   :  { %8161 = vrcp.f32 %v1431_v29 }
 0x996   :  { %v1513_v30 = vpop.permute.xlu0 %1512 }
 0x997   :  { %7704 = vmatpush3.msra.mxu1 %v1513_v30  ;;  %v7245_v30 = vld [vmem:[%s9593_s18] ss:$0 sm:$0xff] }
 0x998   :  { %7719 = vmatprep.subr.mxu1 %v1762_v14 }
 0x99a   :  { %v1599_v44 = vpop.permute.xlu0 %1598 }
 0x99b   :  { %v1615_v48 = vsel %vm1614_vm4, %v1612_v45, %v1599_v44 }
 0x99c   :  { %v8160_v31 = vpop.eup %8159 }
 0x99d   :  { %v1434_v32 = vmul.f32 %v8160_v31, %v8156_v10 }
 0x99f   :  { %7701 = vmatmul.mubr.msk.f32.vlgmr.msra.gmra.mxu0 %vm256_vm2, %v1434_v32 }
 0x9a0   :  { %v8162_v33 = vpop.eup %8161  ;;  %7709 = vmatpush3.msra.mxu0 %v1623_v11 }
 0x9a1   :  { %v1435_v34 = vmul.f32 %v8162_v33, %v8158_v25  ;;  %7710 = vmatprep.subr.mxu0 %v1622_v35 }
 0x9a2   :  { %7711 = vmatpush3.msra.mxu0 %v1622_v35 }
 0x9a3   :  { %7706 = vmatmul.mubr.msk.f32.vlgmr.msra.gmra.mxu1 %vm256_vm2, %v1435_v34  ;;  %7712 = vmatprep.subr.mxu0 %v1621_v36 }
 0x9a4   :  { %7713 = vmatpush3.msra.mxu0 %v1621_v36  ;;  %7720 = vmatpush3.msra.mxu1 %v1762_v14  ;;  %v7249_v36 = vld [vmem:[%s9585_s10] ss:$0 sm:$0xff] }
 0x9a5   :  { %7714 = vmatprep.subr.mxu0 %v1620_v37  ;;  %7721 = vmatprep.subr.mxu1 %v1761_v16 }
 0x9a6   :  { %7715 = vmatpush3.msra.mxu0 %v1620_v37  ;;  %7722 = vmatpush3.msra.mxu1 %v1761_v16 }
 0x9a7   :  { %7730 = vmatprep.subr.mxu0 %v1854_v13  ;;  %7723 = vmatprep.subr.mxu1 %v1760_v20 }
 0x9a8   :  { %7724 = vmatpush3.msra.mxu1 %v1760_v20 }
 0x9a9   :  { %7725 = vmatprep.subr.mxu1 %v1759_v15 }
 0x9aa   :  { %7726 = vmatpush3.msra.mxu1 %v1759_v15 }
 0x9ab   :  { %7741 = vmatprep.subr.mxu1 %v8444_v6 }
 0xa5f   :  { %v1508_v38 = vpop.f32.mrf.mxu0 }
 0xa60   :  { %1606 = vrot.lane.b32.xlu0 %v1508_v38, %s9617_s4 }
 0xa61   :  { %v7702_v39 = vpop.f32.mrf.mxu0 }
 0xa63   :  { %v1584_v40 = vpop.f32.mrf.mxu1 }
 0xa64   :  { %1608 = vrot.lane.b32.xlu1 %v1584_v40, %s9617_s4  ;;  %s9655_s4 = smov 56  }
 0xa65   :  { %v7707_v41 = vpop.f32.mrf.mxu1 }
 0xad2   :  { %v1607_v50 = vpop.permute.xlu0 %1606 }
 0xad3   :  { %v1618_v51 = vsel %vm1617_vm3, %v1615_v48, %v1607_v50 }
 0xad4   :  { %7716 = vmatprep.mubr.msk.f32.mxu0 %vm171_vm0, %v1618_v51 }
 0xad6   :  { %v1609_v54 = vpop.permute.xlu1 %1608 }
 0xad7   :  { %v1619_v55 = vsel %vm1617_vm3, %v1616_v53, %v1609_v54 }
 0xad8   :  { %7717 = vmatmul.mubr.msk.f32.vlgmr.msra.gmra.mxu0 %vm171_vm0, %v1619_v55 }
 0xad9   :  { %7731 = vmatpush3.msra.mxu0 %v1854_v13  ;;  %7738 = vmatprep.mubr.msk.f32.mxu0 %vm171_vm0, %v157_v18 }
 0xb98   :  { %v7718_v56 = vpop.f32.mrf.mxu0 }
 0xb99   :  { %v1709_v57 = vadd.f32 %v7718_v56, %v7241_v47 }
 0xb9a   :  { %v1703_v58 = vpop.f32.mrf.mxu0 }
 0xb9b   :  { %v1704_v59 = vadd.f32 %v7241_v47, %v1703_v58  ;;  %v1713_v60 = vadd.f32 %v1709_v57, %v8629_v5 }
 0xb9d   :  { %v1719_v61 = vsel %vm171_vm0, %v1713_v60, 0.0  ;;  %v1712_v49 = vadd.f32 %v1704_v59, %v8619_v2  ;;  %v1853_v2 = vld [vmem:[#allocation8 + $0x10] sm:$0xff] }
 0xb9e   :  { %1720 = vadd.xlane.f32.xlu1 %v1719_v61  ;;  %7732 = vmatprep.subr.mxu0 %v1853_v2 }
 0xb9f   :  { %v1716_v62 = vsel %vm171_vm0, %v1712_v49, 0.0  ;;  %7733 = vmatpush3.msra.mxu0 %v1853_v2 }
 0xba0   :  { %1717 = vadd.xlane.f32.xlu0 %v1716_v62  ;;  %7734 = vmatprep.subr.mxu0 %v1852_v17 }
 0xba1   :  { %7735 = vmatpush3.msra.mxu0 %v1852_v17 }
 0xba2   :  { %7736 = vmatprep.subr.mxu0 %v1851_v19 }
 0xba3   :  { %7737 = vmatpush3.msra.mxu0 %v1851_v19 }
 0xba4   :  { %7739 = vmatmul.mubr.msk.f32.vlgmr.msra.gmra.mxu0 %vm171_vm0, %v158_v21  ;;  %7751 = vmatprep.subr.mxu0 %v8444_v6 }
 0xba5   :  { %7753 = vmatprep.mubr.msk.f32.mxu0 %vm8445_vm1, %v8444_v6 }
 0xc27   :  { %v1721_v63 = vpop.xlane.xlu1 %1720 }
 0xc28   :  { %v1724_v0 = vmul.f32 0.03125, %v1721_v63 }
 0xc29   :  { %v1718_v1 = vpop.xlane.xlu0 %1717 }
 0xc2a   :  { %v1723_v3 = vmul.f32 0.03125, %v1718_v1  ;;  %v1726_v4 = vsub.f32 %v1713_v60, %v1724_v0 }
 0xc2c   :  { %v1725_v7 = vsub.f32 %v1712_v49, %v1723_v3  ;;  %v1728_v12 = vmul.f32 %v1726_v4, %v1726_v4 }
 0xc2e   :  { %v1727_v8 = vmul.f32 %v1725_v7, %v1725_v7  ;;  %v1732_v5 = vsel %vm171_vm0, %v1728_v12, 0.0 }
 0xc30   :  { %v1729_v9 = vsel %vm171_vm0, %v1727_v8, 0.0 }
 0xc31   :  { %1730 = vadd.xlane.f32.xlu0 %v1729_v9 }
 0xc35   :  { %1733 = vadd.xlane.f32.xlu0 %v1732_v5 }
 0xc64   :  { %v7740_v37 = vpop.f32.mrf.mxu0 }
 0xc65   :  { %v8868_v38 = vadd.f32 %v7740_v37, %v7249_v36 }
 0xc66   :  { %v1934_v39 = vpop.f32.mrf.mxu0 }
 0xc67   :  { %v8870_v40 = vadd.f32 %v7249_v36, %v1934_v39 }
 0xcba   :  { %v1731_v22 = vpop.xlane.xlu0 %1730 }
 0xcbb   :  { %v1735_v23 = vmul.f32 0.03125, %v1731_v22 }
 0xcbd   :  { %v1737_v24 = vadd.f32 1e-05, %v1735_v23 }
 0xcbe   :  { %v1734_v10 = vpop.xlane.xlu0 %1733 }
 0xcbf   :  { %8163 = vrsqrt.f32 %v1737_v24  ;;  %v1736_v26 = vmul.f32 0.03125, %v1734_v10 }
 0xcc1   :  { %v1738_v25 = vadd.f32 1e-05, %v1736_v26 }
 0xcc3   :  { %8165 = vrsqrt.f32 %v1738_v25 }
 0xccc   :  { %v8164_v27 = vpop.eup %8163 }
 0xccd   :  { %v1741_v29 = vmul.f32 %v8164_v27, %v1725_v7 }
 0xccf   :  { %v1749_v31 = vmul.f32 %v7244_v28, %v1741_v29 }
 0xcd0   :  { %v8166_v32 = vpop.eup %8165 }
 0xcd1   :  { %v1742_v33 = vmul.f32 %v8166_v32, %v1726_v4  ;;  %v8855_v34 = vadd.f32 %v7245_v30, %v1749_v31 }
 0xcd3   :  { %v1750_v11 = vmul.f32 %v7244_v28, %v1742_v33  ;;  %7727 = vmatprep.mubr.msk.f32.mxu1 %vm171_vm0, %v8855_v34 }
 0xcd5   :  { %v8859_v35 = vadd.f32 %v7245_v30, %v1750_v11 }
 0xcd7   :  { %7728 = vmatmul.mubr.msk.f32.vlgmr.msra.gmra.mxu1 %vm171_vm0, %v8859_v35 }
 0xcd8   :  { %7743 = vmatprep.mubr.msk.f32.mxu1 %vm8445_vm1, %v8444_v6  ;;  %7742 = vmatpush3.xpose.msk.msra.mxu1 %vm256_vm2, %v8870_v40 }
 0xcd9   :  { %7746 = vmatprep.subr.mxu1 %v8444_v6 }
 0xd97   :  { %v7729_v41 = vpop.f32.mrf.mxu1 }
 0xd98   :  { %v8886_v45 = vadd.f32 %v7729_v41, %v7246_v42 }
 0xd99   :  { %v1842_v43 = vpop.f32.mrf.mxu1 }
 0xd9a   :  { %v8878_v44 = vadd.f32 %v7246_v42, %v1842_v43 }
 0xd9c   :  { %7744 = vmatmul.mubr.msk.f32.vlgmr.msra.gmra.mxu1 %vm256_vm2, %v8878_v44 }
 0xd9d   :  { %7747 = vmatpush3.xpose.msk.msra.mxu1 %vm256_vm2, %v8868_v38  ;;  %7748 = vmatprep.mubr.msk.f32.mxu1 %vm8445_vm1, %v8444_v6 }
 0xd9e   :  { %7756 = vmatprep.subr.mxu1 %v8444_v6 }
 0xda0   :  { %7749 = vmatmul.mubr.msk.f32.vlgmr.msra.gmra.mxu1 %vm256_vm2, %v8886_v45 }
 0xda1   :  { %7758 = vmatprep.mubr.msk.f32.mxu1 %vm8445_vm1, %v8444_v6 }
 0xe5c   :  { %v2015_v46 = vpop.f32.mrf.mxu1 }
 0xe5d   :  { %v2095_v48 = vmul.f32 0.35355338, %v2015_v46 }
 0xe5e   :  { %v7745_v50 = vpop.f32.mrf.mxu1 }
 0xe5f   :  { %v2097_v51 = vsel %vm256_vm2, %v2095_v48, -inf }
 0xe60   :  { %2098 = vmax.xlane.f32.xlu1 %v2097_v51  ;;  %v2091_v52 = vpop.f32.mrf.mxu1 }
 0xe61   :  { %v2096_v53 = vmul.f32 0.35355338, %v2091_v52 }
 0xe62   :  { %v7750_v54 = vpop.f32.mrf.mxu1 }
 0xe63   :  { %v2100_v55 = vsel %vm256_vm2, %v2096_v53, -inf }
 0xe64   :  { %2101 = vmax.xlane.f32.xlu0 %v2100_v55 }
 0xe71   :  { %2119 = vrot.lane.b32.xlu1 %v8870_v40, %s9631_s5 }
 0xe75   :  { %2273 = vrot.lane.b32.xlu1 %v8870_v40, %s9627_s6 }
 0xe79   :  { %2351 = vrot.lane.b32.xlu1 %v8868_v38, %s9627_s6 }
 0xe7a   :  { %2195 = vrot.lane.b32.xlu0 %v8868_v38, %s9631_s5 }
 0xee9   :  { %v2099_v47 = vpop.xlane.xlu1 %2098 }
 0xeea   :  { %v2103_v56 = vsub.f32 %v2095_v48, %v2099_v47 }
 0xeec   :  { %v2105_v57 = vmul.f32 1.442695, %v2103_v56 }
 0xeed   :  { %v2120_v58 = vpop.permute.xlu1 %2119  ;;  %v2102_v59 = vpop.xlane.xlu0 %2101 }
 0xeee   :  { %8167 = vpow2.f32 %v2105_v57  ;;  %v2104_v60 = vsub.f32 %v2096_v53, %v2102_v59  ;;  %7752 = vmatpush3.msra.mxu0 %v2120_v58 }
 0xeef   :  { %7761 = vmatprep.subr.mxu0 %v8444_v6 }
 0xef0   :  { %v2107_v61 = vmul.f32 1.442695, %v2104_v60 }
 0xef1   :  { %v2196_v49 = vpop.permute.xlu0 %2195  ;;  %v2274_v3 = vpop.permute.xlu1 %2273 }
 0xef2   :  { %8169 = vpow2.f32 %v2107_v61  ;;  %7757 = vmatpush3.msra.mxu1 %v2196_v49 }
 0xef3   :  { %7766 = vmatprep.subr.mxu1 %v8444_v6 }
 0xef5   :  { %v2352_v4 = vpop.permute.xlu1 %2351 }
 0xefb   :  { %v8168_v62 = vpop.eup %8167 }
 0xefc   :  { %v2109_v63 = vsel %vm256_vm2, %v8168_v62, 0.0 }
 0xefd   :  { %2110 = vadd.xlane.f32.xlu1 %v2109_v63 }
 0xeff   :  { %v8170_v0 = vpop.eup %8169 }
 0xf00   :  { %v2112_v1 = vsel %vm256_vm2, %v8170_v0, 0.0 }
 0xf01   :  { %2113 = vadd.xlane.f32.xlu0 %v2112_v1 }
 0xf0e   :  { %2349 = vrot.lane.b32.xlu1 %v8886_v45, %s9627_s6 }
 0xf17   :  { %2271 = vrot.lane.b32.xlu0 %v8878_v44, %s9627_s6  ;;  %s9660_s6 = smov 104  }
 0xf86   :  { %v2111_v7 = vpop.xlane.xlu1 %2110 }
 0xf87   :  { %8171 = vrcp.f32 %v2111_v7 }
 0xf8a   :  { %v2114_v8 = vpop.xlane.xlu0 %2113  ;;  %v2350_v14 = vpop.permute.xlu1 %2349 }
 0xf8b   :  { %8173 = vrcp.f32 %v2114_v8 }
 0xf8e   :  { %v2272_v2 = vpop.permute.xlu0 %2271 }
 0xf94   :  { %v8172_v9 = vpop.eup %8171 }
 0xf95   :  { %v2117_v12 = vmul.f32 %v8172_v9, %v8168_v62 }
 0xf97   :  { %7754 = vmatmul.mubr.msk.f32.vlgmr.msra.gmra.mxu0 %vm256_vm2, %v2117_v12 }
 0xf98   :  { %v8174_v5 = vpop.eup %8173  ;;  %7762 = vmatpush3.xpose.msk.msra.mxu0 %vm256_vm2, %v2274_v3  ;;  %7763 = vmatprep.mubr.msk.f32.mxu0 %vm8445_vm1, %v8444_v6 }
 0xf99   :  { %v2118_v13 = vmul.f32 %v8174_v5, %v8170_v0  ;;  %7771 = vmatprep.subr.mxu0 %v8444_v6 }
 0xf9b   :  { %7759 = vmatmul.mubr.msk.f32.vlgmr.msra.gmra.mxu1 %vm256_vm2, %v2118_v13  ;;  %7764 = vmatmul.mubr.msk.f32.vlgmr.msra.gmra.mxu0 %vm256_vm2, %v2272_v2 }
 0xf9c   :  { %7767 = vmatpush3.xpose.msk.msra.mxu1 %vm256_vm2, %v2352_v4  ;;  %7768 = vmatprep.mubr.msk.f32.mxu1 %vm8445_vm1, %v8444_v6 }
 0xf9d   :  { %7776 = vmatprep.subr.mxu1 %v8444_v6  ;;  %7773 = vmatprep.mubr.msk.f32.mxu0 %vm8445_vm1, %v8444_v6 }
 0xf9f   :  { %7769 = vmatmul.mubr.msk.f32.vlgmr.msra.gmra.mxu1 %vm256_vm2, %v2350_v14 }
 0xfa0   :  { %7778 = vmatprep.mubr.msk.f32.mxu1 %vm8445_vm1, %v8444_v6 }
0x1057   :  { %v8927_v16 = vpop.f32.mrf.mxu0 }
0x1059   :  { %v7755_v17 = vpop.f32.mrf.mxu0 }
0x105b   :  { %v8929_v18 = vpop.f32.mrf.mxu1  ;;  %v2345_v19 = vpop.f32.mrf.mxu0 }
0x105c   :  { %v2427_v20 = vmul.f32 0.35355338, %v2345_v19 }
0x105d   :  { %v7760_v21 = vpop.f32.mrf.mxu1  ;;  %v7765_v15 = vpop.f32.mrf.mxu0 }
0x105e   :  { %v2429_v22 = vsel %vm256_vm2, %v2427_v20, -inf }
0x105f   :  { %2430 = vmax.xlane.f32.xlu0 %v2429_v22  ;;  %v2423_v23 = vpop.f32.mrf.mxu1 }
0x1060   :  { %v2428_v24 = vmul.f32 0.35355338, %v2423_v23 }
0x1061   :  { %v7770_v10 = vpop.f32.mrf.mxu1 }
0x1062   :  { %v2432_v26 = vsel %vm256_vm2, %v2428_v24, -inf }
0x1063   :  { %2433 = vmax.xlane.f32.xlu1 %v2432_v26 }
0x1074   :  { %2451 = vrot.lane.b32.xlu1 %v8870_v40, %s9629_s2 }
0x1075   :  { %2527 = vrot.lane.b32.xlu0 %v8868_v38, %s9629_s2 }
0x1078   :  { %2605 = vrot.lane.b32.xlu1 %v8870_v40, %s9623_s27 }
0x107c   :  { %2683 = vrot.lane.b32.xlu1 %v8868_v38, %s9623_s27 }
0x1080   :  { %2681 = vrot.lane.b32.xlu1 %v8886_v45, %s9623_s27 }
0x10e8   :  { %v2431_v25 = vpop.xlane.xlu0 %2430 }
0x10e9   :  { %v2435_v27 = vsub.f32 %v2427_v20, %v2431_v25 }
0x10eb   :  { %v2437_v28 = vmul.f32 1.442695, %v2435_v27 }
0x10ec   :  { %v2528_v29 = vpop.permute.xlu0 %2527  ;;  %v2434_v30 = vpop.xlane.xlu1 %2433 }
0x10ed   :  { %8175 = vpow2.f32 %v2437_v28  ;;  %v2436_v31 = vsub.f32 %v2428_v24, %v2434_v30  ;;  %7777 = vmatpush3.msra.mxu1 %v2528_v29 }
0x10ee   :  { %7786 = vmatprep.subr.mxu1 %v8444_v6 }
0x10ef   :  { %v2439_v32 = vmul.f32 1.442695, %v2436_v31 }
0x10f0   :  { %v2452_v33 = vpop.permute.xlu1 %2451 }
0x10f1   :  { %8177 = vpow2.f32 %v2439_v32  ;;  %7772 = vmatpush3.msra.mxu0 %v2452_v33 }
0x10f2   :  { %7781 = vmatprep.subr.mxu0 %v8444_v6 }
0x10f4   :  { %v2606_v43 = vpop.permute.xlu1 %2605 }
0x10f8   :  { %v2684_v51 = vpop.permute.xlu1 %2683 }
0x10fa   :  { %v8176_v11 = vpop.eup %8175 }
0x10fb   :  { %v2441_v36 = vsel %vm256_vm2, %v8176_v11, 0.0 }
0x10fc   :  { %2442 = vadd.xlane.f32.xlu0 %v2441_v36  ;;  %v2682_v54 = vpop.permute.xlu1 %2681 }
0x10fe   :  { %v8178_v37 = vpop.eup %8177 }
0x10ff   :  { %v2444_v39 = vsel %vm256_vm2, %v8178_v37, 0.0 }
0x1100   :  { %2445 = vadd.xlane.f32.xlu0 %v2444_v39 }
0x1116   :  { %2603 = vrot.lane.b32.xlu0 %v8878_v44, %s9623_s27  ;;  %s9657_s27 = smov 112  }
0x1185   :  { %v2443_v41 = vpop.xlane.xlu0 %2442 }
0x1186   :  { %8179 = vrcp.f32 %v2443_v41 }
0x1189   :  { %v2446_v42 = vpop.xlane.xlu0 %2445 }
0x118a   :  { %8181 = vrcp.f32 %v2446_v42 }
0x118d   :  { %v2604_v53 = vpop.permute.xlu0 %2603 }
0x1193   :  { %v8180_v46 = vpop.eup %8179 }
0x1194   :  { %v2449_v48 = vmul.f32 %v8180_v46, %v8176_v11 }
0x1196   :  { %7774 = vmatmul.mubr.msk.f32.vlgmr.msra.gmra.mxu0 %vm256_vm2, %v2449_v48 }
0x1197   :  { %v8182_v50 = vpop.eup %8181  ;;  %7782 = vmatpush3.xpose.msk.msra.mxu0 %vm256_vm2, %v2606_v43  ;;  %7783 = vmatprep.mubr.msk.f32.mxu0 %vm8445_vm1, %v8444_v6 }
0x1198   :  { %v2450_v52 = vmul.f32 %v8182_v50, %v8178_v37  ;;  %7791 = vmatprep.subr.mxu0 %v8444_v6 }
0x119a   :  { %7779 = vmatmul.mubr.msk.f32.vlgmr.msra.gmra.mxu1 %vm256_vm2, %v2450_v52  ;;  %7784 = vmatmul.mubr.msk.f32.vlgmr.msra.gmra.mxu0 %vm256_vm2, %v2604_v53 }
0x119b   :  { %7787 = vmatpush3.xpose.msk.msra.mxu1 %vm256_vm2, %v2684_v51  ;;  %7788 = vmatprep.mubr.msk.f32.mxu1 %vm8445_vm1, %v8444_v6 }
0x119c   :  { %7796 = vmatprep.subr.mxu1 %v8444_v6  ;;  %7793 = vmatprep.mubr.msk.f32.mxu0 %vm8445_vm1, %v8444_v6 }
0x119e   :  { %7789 = vmatmul.mubr.msk.f32.vlgmr.msra.gmra.mxu1 %vm256_vm2, %v2682_v54 }
0x119f   :  { %7798 = vmatprep.mubr.msk.f32.mxu1 %vm8445_vm1, %v8444_v6 }
0x1256   :  { %v8965_v55 = vpop.f32.mrf.mxu0 }
0x1258   :  { %v7775_v47 = vpop.f32.mrf.mxu0 }
0x125a   :  { %v8967_v56 = vpop.f32.mrf.mxu1  ;;  %v2677_v57 = vpop.f32.mrf.mxu0 }
0x125b   :  { %v2759_v58 = vmul.f32 0.35355338, %v2677_v57 }
0x125c   :  { %v7780_v59 = vpop.f32.mrf.mxu1  ;;  %v7785_v60 = vpop.f32.mrf.mxu0 }
0x125d   :  { %v2761_v61 = vsel %vm256_vm2, %v2759_v58, -inf  ;;  %v3300_v60 = vld [vmem:[#allocation10 + $0x18] sm:$0xff] }
0x125e   :  { %2762 = vmax.xlane.f32.xlu0 %v2761_v61  ;;  %v2755_v49 = vpop.f32.mrf.mxu1  ;;  %v3299_v61 = vld [vmem:[#allocation10 + $0x10] sm:$0xff] }
0x125f   :  { %v2760_v62 = vmul.f32 0.35355338, %v2755_v49  ;;  %v3297_v49 = vld [vmem:[#allocation10] sm:$0xff] }
0x1260   :  { %v7790_v63 = vpop.f32.mrf.mxu1 }
0x1261   :  { %v2764_v0 = vsel %vm256_vm2, %v2760_v62, -inf }
0x1262   :  { %2765 = vmax.xlane.f32.xlu1 %v2764_v0 }
0x1273   :  { %2783 = vrot.lane.b32.xlu1 %v8870_v40, %s9625_s9 }
0x1274   :  { %2859 = vrot.lane.b32.xlu0 %v8868_v38, %s9625_s9  ;;  %s9661_s9 = smov 40  }
0x1277   :  { %2937 = vrot.lane.b32.xlu1 %v8870_v40, %s9619_s28 }
0x127b   :  { %3015 = vrot.lane.b32.xlu1 %v8868_v38, %s9619_s28 }
0x127f   :  { %3013 = vrot.lane.b32.xlu1 %v8886_v45, %s9619_s28 }
0x12e7   :  { %v2763_v1 = vpop.xlane.xlu0 %2762 }
0x12e8   :  { %v2767_v3 = vsub.f32 %v2759_v58, %v2763_v1 }
0x12ea   :  { %v2769_v4 = vmul.f32 1.442695, %v2767_v3 }
0x12eb   :  { %v2860_v7 = vpop.permute.xlu0 %2859  ;;  %v2766_v8 = vpop.xlane.xlu1 %2765 }
0x12ec   :  { %8183 = vpow2.f32 %v2769_v4  ;;  %v2768_v9 = vsub.f32 %v2760_v62, %v2766_v8  ;;  %7797 = vmatpush3.msra.mxu1 %v2860_v7 }
0x12ed   :  { %7806 = vmatprep.subr.mxu1 %v8444_v6 }
0x12ee   :  { %v2771_v12 = vmul.f32 1.442695, %v2768_v9 }
0x12ef   :  { %v2784_v5 = vpop.permute.xlu1 %2783 }
0x12f0   :  { %8185 = vpow2.f32 %v2771_v12  ;;  %7792 = vmatpush3.msra.mxu0 %v2784_v5 }
0x12f1   :  { %7801 = vmatprep.subr.mxu0 %v8444_v6 }
0x12f3   :  { %v2938_v20 = vpop.permute.xlu1 %2937 }
0x12f7   :  { %v3016_v23 = vpop.permute.xlu1 %3015 }
0x12f9   :  { %v8184_v13 = vpop.eup %8183 }
0x12fa   :  { %v2773_v2 = vsel %vm256_vm2, %v8184_v13, 0.0 }
0x12fb   :  { %2774 = vadd.xlane.f32.xlu0 %v2773_v2  ;;  %v3014_v10 = vpop.permute.xlu1 %3013 }
0x12fd   :  { %v8186_v45 = vpop.eup %8185 }
0x12fe   :  { %v2776_v14 = vsel %vm256_vm2, %v8186_v45, 0.0 }
0x12ff   :  { %2777 = vadd.xlane.f32.xlu0 %v2776_v14 }
0x1315   :  { %2935 = vrot.lane.b32.xlu0 %v8878_v44, %s9619_s28 }
0x1384   :  { %v2775_v17 = vpop.xlane.xlu0 %2774 }
0x1385   :  { %8187 = vrcp.f32 %v2775_v17 }
0x1388   :  { %v2778_v19 = vpop.xlane.xlu0 %2777 }
0x1389   :  { %8189 = vrcp.f32 %v2778_v19 }
0x138c   :  { %v2936_v44 = vpop.permute.xlu0 %2935 }
0x1392   :  { %v8188_v21 = vpop.eup %8187 }
0x1393   :  { %v2781_v15 = vmul.f32 %v8188_v21, %v8184_v13 }
0x1395   :  { %7794 = vmatmul.mubr.msk.f32.vlgmr.msra.gmra.mxu0 %vm256_vm2, %v2781_v15 }
0x1396   :  { %v8190_v22 = vpop.eup %8189  ;;  %7802 = vmatpush3.xpose.msk.msra.mxu0 %vm256_vm2, %v2938_v20  ;;  %7803 = vmatprep.mubr.msk.f32.mxu0 %vm8445_vm1, %v8444_v6 }
0x1397   :  { %v2782_v24 = vmul.f32 %v8190_v22, %v8186_v45  ;;  %7811 = vmatprep.subr.mxu0 %v8444_v6 }
0x1399   :  { %7799 = vmatmul.mubr.msk.f32.vlgmr.msra.gmra.mxu1 %vm256_vm2, %v2782_v24  ;;  %7804 = vmatmul.mubr.msk.f32.vlgmr.msra.gmra.mxu0 %vm256_vm2, %v2936_v44 }
0x139a   :  { %7807 = vmatpush3.xpose.msk.msra.mxu1 %vm256_vm2, %v3016_v23  ;;  %7808 = vmatprep.mubr.msk.f32.mxu1 %vm8445_vm1, %v8444_v6 }
0x139b   :  { %7816 = vmatprep.subr.mxu1 %v8444_v6  ;;  %7813 = vmatprep.mubr.msk.f32.mxu0 %vm8445_vm1, %v8444_v6 }
0x139d   :  { %7809 = vmatmul.mubr.msk.f32.vlgmr.msra.gmra.mxu1 %vm256_vm2, %v3014_v10 }
0x139e   :  { %7818 = vmatprep.mubr.msk.f32.mxu1 %vm8445_vm1, %v8444_v6 }
0x1455   :  { %v2855_v26 = vpop.f32.mrf.mxu0 }
0x1457   :  { %v7795_v25 = vpop.f32.mrf.mxu0 }
0x1459   :  { %v2931_v27 = vpop.f32.mrf.mxu1  ;;  %v3009_v28 = vpop.f32.mrf.mxu0 }
0x145a   :  { %v3091_v29 = vmul.f32 0.35355338, %v3009_v28 }
0x145b   :  { %v7800_v30 = vpop.f32.mrf.mxu1  ;;  %v7805_v31 = vpop.f32.mrf.mxu0 }
0x145c   :  { %v3093_v32 = vsel %vm256_vm2, %v3091_v29, -inf }
0x145d   :  { %3094 = vmax.xlane.f32.xlu0 %v3093_v32  ;;  %v3087_v33 = vpop.f32.mrf.mxu1  ;;  %v3438_v32 = vld [vmem:[#allocation11 + $0x18] sm:$0xff] }
0x145e   :  { %v3092_v11 = vmul.f32 0.35355338, %v3087_v33  ;;  %v3436_v33 = vld [vmem:[#allocation11 + $0x8] sm:$0xff] }
0x145f   :  { %v7810_v36 = vpop.f32.mrf.mxu1 }
0x1460   :  { %v3096_v37 = vsel %vm256_vm2, %v3092_v11, -inf  ;;  %v3536_v36 = vld [vmem:[%s9590_s15 + $0x38] sm:$0xff] }
0x1461   :  { %3097 = vmax.xlane.f32.xlu1 %v3096_v37  ;;  %v3535_v37 = vld [vmem:[%s9590_s15 + $0x30] sm:$0xff] }
0x1472   :  { %3115 = vrot.lane.b32.xlu1 %v8870_v40, %s9621_s13 }
0x1476   :  { %3269 = vrot.lane.b32.xlu1 %v8965_v55, %s9650_s26 }
0x147a   :  { %3271 = vrot.lane.b32.xlu1 %v8967_v56, %s9650_s26 }
0x147e   :  { %3279 = vrot.lane.b32.xlu1 %v2931_v27, %s9651_s24 }
0x14e6   :  { %v3095_v39 = vpop.xlane.xlu0 %3094 }
0x14e7   :  { %v3099_v41 = vsub.f32 %v3091_v29, %v3095_v39  ;;  %v3534_v39 = vld [vmem:[%s9590_s15 + $0x28] sm:$0xff] }
0x14e9   :  { %v3101_v42 = vmul.f32 1.442695, %v3099_v41  ;;  %v3533_v41 = vld [vmem:[%s9590_s15 + $0x20] sm:$0xff] }
0x14ea   :  { %v3098_v43 = vpop.xlane.xlu1 %3097 }
0x14eb   :  { %8191 = vpow2.f32 %v3101_v42  ;;  %v3100_v46 = vsub.f32 %v3092_v11, %v3098_v43  ;;  %v3435_v11 = vld [vmem:[#allocation11] sm:$0xff] }
0x14ed   :  { %v3103_v48 = vmul.f32 1.442695, %v3100_v46 }
0x14ee   :  { %v3116_v50 = vpop.permute.xlu1 %3115 }
0x14ef   :  { %8193 = vpow2.f32 %v3103_v48  ;;  %7812 = vmatpush3.msra.mxu0 %v3116_v50 }
0x14f0   :  { %7821 = vmatprep.subr.mxu0 %v3300_v60 }
0x14f2   :  { %v3270_v3 = vpop.permute.xlu1 %3269 }
0x14f3   :  { %v3291_v8 = vsel %vm256_vm2, %v8927_v16, %v3270_v3  ;;  %v7276_v16 = vld [vmem:[%s9587_s12] ss:$0 sm:$0xff] }
0x14f6   :  { %v3272_v4 = vpop.permute.xlu1 %3271 }
0x14f7   :  { %v3292_v2 = vsel %vm256_vm2, %v8929_v18, %v3272_v4 }
0x14f8   :  { %v8192_v51 = vpop.eup %8191 }
0x14f9   :  { %v3105_v40 = vsel %vm256_vm2, %v8192_v51, 0.0 }
0x14fa   :  { %3106 = vadd.xlane.f32.xlu0 %v3105_v40  ;;  %v3280_v9 = vpop.permute.xlu1 %3279 }
0x14fb   :  { %v3294_v45 = vsel %vm1614_vm4, %v3292_v2, %v3280_v9 }
0x14fc   :  { %v8194_v52 = vpop.eup %8193 }
0x14fd   :  { %v3108_v53 = vsel %vm256_vm2, %v8194_v52, 0.0 }
0x14fe   :  { %3109 = vadd.xlane.f32.xlu0 %v3108_v53 }
0x1514   :  { %3191 = vrot.lane.b32.xlu0 %v8868_v38, %s9621_s13  ;;  %v3298_v38 = vld [vmem:[#allocation10 + $0x8] sm:$0xff]  ;;  %s9658_s13 = smov 48  }
0x1518   :  { %3277 = vrot.lane.b32.xlu0 %v2855_v26, %s9651_s24 }
0x1583   :  { %v3107_v54 = vpop.xlane.xlu0 %3106 }
0x1584   :  { %8195 = vrcp.f32 %v3107_v54  ;;  %v7280_v54 = vld [vmem:[%s9595_s20] ss:$0 sm:$0xff] }
0x1587   :  { %v3110_v55 = vpop.xlane.xlu0 %3109 }
0x1588   :  { %8197 = vrcp.f32 %v3110_v55 }
0x158b   :  { %v3192_v47 = vpop.permute.xlu0 %3191 }
0x158c   :  { %7817 = vmatpush3.msra.mxu1 %v3192_v47 }
0x158d   :  { %7832 = vmatprep.subr.mxu1 %v3438_v32 }
0x158f   :  { %v3278_v7 = vpop.permute.xlu0 %3277 }
0x1590   :  { %v3293_v12 = vsel %vm1614_vm4, %v3291_v8, %v3278_v7  ;;  %v7284_v8 = vld [vmem:[%s9591_s16] ss:$0 sm:$0xff] }
0x1591   :  { %v8196_v56 = vpop.eup %8195 }
0x1592   :  { %v3113_v57 = vmul.f32 %v8196_v56, %v8192_v51 }
0x1594   :  { %7814 = vmatmul.mubr.msk.f32.vlgmr.msra.gmra.mxu0 %vm256_vm2, %v3113_v57 }
0x1595   :  { %v8198_v58 = vpop.eup %8197  ;;  %7822 = vmatpush3.msra.mxu0 %v3300_v60  ;;  %v3532_v60 = vld [vmem:[%s9590_s15 + $0x18] sm:$0xff] }
0x1596   :  { %v3114_v59 = vmul.f32 %v8198_v58, %v8194_v52  ;;  %7823 = vmatprep.subr.mxu0 %v3299_v61  ;;  %v7279_v52 = vld [vmem:[%s9594_s19] ss:$0 sm:$0xff] }
0x1597   :  { %7824 = vmatpush3.msra.mxu0 %v3299_v61  ;;  %v3531_v61 = vld [vmem:[%s9590_s15 + $0x10] sm:$0xff] }
0x1598   :  { %7819 = vmatmul.mubr.msk.f32.vlgmr.msra.gmra.mxu1 %vm256_vm2, %v3114_v59  ;;  %7825 = vmatprep.subr.mxu0 %v3298_v38 }
0x1599   :  { %7826 = vmatpush3.msra.mxu0 %v3298_v38  ;;  %7833 = vmatpush3.msra.mxu1 %v3438_v32  ;;  %v3530_v38 = vld [vmem:[%s9590_s15 + $0x8] sm:$0xff] }
0x159a   :  { %7827 = vmatprep.subr.mxu0 %v3297_v49 }
0x159b   :  { %7828 = vmatpush3.msra.mxu0 %v3297_v49  ;;  %v3529_v49 = vld [vmem:[%s9590_s15] sm:$0xff] }
0x159c   :  { %7843 = vmatprep.subr.mxu0 %v3536_v36 }
0x1654   :  { %v3187_v62 = vpop.f32.mrf.mxu0 }
0x1655   :  { %3285 = vrot.lane.b32.xlu0 %v3187_v62, %s9652_s7  ;;  %v7281_v62 = vld [vmem:[%s9589_s14] ss:$0 sm:$0xff] }
0x1656   :  { %v7815_v63 = vpop.f32.mrf.mxu0 }
0x1658   :  { %v3263_v0 = vpop.f32.mrf.mxu1 }
0x1659   :  { %3287 = vrot.lane.b32.xlu1 %v3263_v0, %s9652_s7 }
0x165a   :  { %v7820_v1 = vpop.f32.mrf.mxu1 }
0x16c7   :  { %v3286_v5 = vpop.permute.xlu0 %3285 }
0x16c8   :  { %v3295_v13 = vsel %vm1617_vm3, %v3293_v12, %v3286_v5 }
0x16c9   :  { %7829 = vmatprep.mubr.msk.f32.mxu0 %vm171_vm0, %v3295_v13 }
0x16cb   :  { %v3288_v14 = vpop.permute.xlu1 %3287 }
0x16cc   :  { %v3296_v17 = vsel %vm1617_vm3, %v3294_v45, %v3288_v14 }
0x16cd   :  { %7830 = vmatmul.mubr.msk.f32.vlgmr.msra.gmra.mxu0 %vm171_vm0, %v3296_v17 }
0x16ce   :  { %7844 = vmatpush3.msra.mxu0 %v3536_v36 }
0x16cf   :  { %7845 = vmatprep.subr.mxu0 %v3535_v37 }
0x16d0   :  { %7846 = vmatpush3.msra.mxu0 %v3535_v37 }
0x16d1   :  { %7847 = vmatprep.subr.mxu0 %v3534_v39 }
0x16d2   :  { %7848 = vmatpush3.msra.mxu0 %v3534_v39 }
0x16d3   :  { %7849 = vmatprep.subr.mxu0 %v3533_v41 }
0x16d4   :  { %7850 = vmatpush3.msra.mxu0 %v3533_v41  ;;  %v7288_v41 = vld [vmem:[%s9597_s22] ss:$0 sm:$0xff] }
0x16d5   :  { %7851 = vmatprep.subr.mxu0 %v3532_v60 }
0x16d6   :  { %7852 = vmatpush3.msra.mxu0 %v3532_v60 }
0x16d7   :  { %7853 = vmatprep.subr.mxu0 %v3531_v61 }
0x16d8   :  { %7854 = vmatpush3.msra.mxu0 %v3531_v61 }
0x16d9   :  { %7855 = vmatprep.subr.mxu0 %v3530_v38 }
0x16da   :  { %7856 = vmatpush3.msra.mxu0 %v3530_v38 }
0x16db   :  { %7857 = vmatprep.subr.mxu0 %v3529_v49 }
0x16dc   :  { %7858 = vmatpush3.msra.mxu0 %v3529_v49 }
0x16dd   :  { %7883 = vmatprep.subr.mxu0 %v8444_v6 }
0x178d   :  { %v7831_v19 = vpop.f32.mrf.mxu0 }
0x178e   :  { %v3386_v20 = vadd.f32 %v7831_v19, %v7276_v16 }
0x178f   :  { %v3380_v21 = vpop.f32.mrf.mxu0 }
0x1790   :  { %v3390_v15 = vadd.f32 %v3386_v20, %v8859_v35  ;;  %v3381_v22 = vadd.f32 %v7276_v16, %v3380_v21 }
0x1792   :  { %v3396_v23 = vsel %vm171_vm0, %v3390_v15, 0.0  ;;  %v3389_v18 = vadd.f32 %v3381_v22, %v8855_v34  ;;  %v3437_v34 = vld [vmem:[#allocation11 + $0x10] sm:$0xff] }
0x1793   :  { %3397 = vadd.xlane.f32.xlu1 %v3396_v23  ;;  %7834 = vmatprep.subr.mxu1 %v3437_v34 }
0x1794   :  { %v3393_v24 = vsel %vm171_vm0, %v3389_v18, 0.0  ;;  %7835 = vmatpush3.msra.mxu1 %v3437_v34 }
0x1795   :  { %3394 = vadd.xlane.f32.xlu0 %v3393_v24  ;;  %7836 = vmatprep.subr.mxu1 %v3436_v33 }
0x1796   :  { %7837 = vmatpush3.msra.mxu1 %v3436_v33  ;;  %v7287_v33 = vld [vmem:[%s9596_s21] ss:$0 sm:$0xff] }
0x1797   :  { %7838 = vmatprep.subr.mxu1 %v3435_v11 }
0x1798   :  { %7839 = vmatpush3.msra.mxu1 %v3435_v11 }
0x181c   :  { %v3398_v44 = vpop.xlane.xlu1 %3397 }
0x181d   :  { %v3400_v10 = vmul.f32 0.03125, %v3398_v44 }
0x181e   :  { %v3395_v26 = vpop.xlane.xlu0 %3394 }
0x181f   :  { %v3399_v25 = vmul.f32 0.03125, %v3395_v26  ;;  %v3402_v27 = vsub.f32 %v3390_v15, %v3400_v10  ;;  %v7292_v10 = vld [vmem:[%s9645_s25 + $0x38] sm:$0xff]  ;;  %v7291_v26 = vld [vmem:[%s9645_s25 + $0x30] sm:$0xff] }
0x1820   :  { %7862 = vmatprep.subr.mxu1 %v7292_v10 }
0x1821   :  { %v3401_v28 = vsub.f32 %v3389_v18, %v3399_v25  ;;  %v3404_v31 = vmul.f32 %v3402_v27, %v3402_v27  ;;  %v7290_v25 = vld [vmem:[%s9645_s25 + $0x28] sm:$0xff] }
0x1823   :  { %v3403_v29 = vmul.f32 %v3401_v28, %v3401_v28  ;;  %v3408_v35 = vsel %vm171_vm0, %v3404_v31, 0.0 }
0x1825   :  { %v3405_v30 = vsel %vm171_vm0, %v3403_v29, 0.0 }
0x1826   :  { %3406 = vadd.xlane.f32.xlu0 %v3405_v30 }
0x182a   :  { %3409 = vadd.xlane.f32.xlu0 %v3408_v35 }
0x18af   :  { %v3407_v42 = vpop.xlane.xlu0 %3406 }
0x18b0   :  { %v3411_v43 = vmul.f32 0.03125, %v3407_v42 }
0x18b2   :  { %v3413_v46 = vadd.f32 1e-05, %v3411_v43 }
0x18b3   :  { %v3410_v48 = vpop.xlane.xlu0 %3409 }
0x18b4   :  { %8199 = vrsqrt.f32 %v3413_v46  ;;  %v3412_v50 = vmul.f32 0.03125, %v3410_v48  ;;  %v7294_v48 = vld [vmem:[%s9646_s0 + $0x1] ss:$0 sm:$0xff]  ;;  %s9653_s0 = smov 64  }
0x18b6   :  { %v3414_v51 = vadd.f32 1e-05, %v3412_v50 }
0x18b8   :  { %8201 = vrsqrt.f32 %v3414_v51 }
0x18c1   :  { %v8200_v40 = vpop.eup %8199 }
0x18c2   :  { %v3417_v53 = vmul.f32 %v8200_v40, %v3401_v28 }
0x18c4   :  { %v3425_v55 = vmul.f32 %v7279_v52, %v3417_v53 }
0x18c5   :  { %v8202_v47 = vpop.eup %8201 }
0x18c6   :  { %v3418_v56 = vmul.f32 %v8202_v47, %v3402_v27  ;;  %v3433_v57 = vadd.f32 %v7280_v54, %v3425_v55  ;;  %v7289_v27 = vld [vmem:[%s9645_s25 + $0x20] sm:$0xff]  ;;  %s9659_s25 = smov 72  }
0x18c8   :  { %v3426_v58 = vmul.f32 %v7279_v52, %v3418_v56  ;;  %7840 = vmatprep.mubr.msk.f32.mxu1 %vm171_vm0, %v3433_v57 }
0x18ca   :  { %v3434_v59 = vadd.f32 %v7280_v54, %v3426_v58 }
0x18cc   :  { %7841 = vmatmul.mubr.msk.f32.vlgmr.msra.gmra.mxu1 %vm171_vm0, %v3434_v59 }
0x18cd   :  { %7863 = vmatpush3.msra.mxu1 %v7292_v10 }
0x18ce   :  { %7864 = vmatprep.subr.mxu1 %v7291_v26 }
0x18cf   :  { %7865 = vmatpush3.msra.mxu1 %v7291_v26 }
0x18d0   :  { %7866 = vmatprep.subr.mxu1 %v7290_v25 }
0x18d1   :  { %7867 = vmatpush3.msra.mxu1 %v7290_v25 }
0x18d2   :  { %7868 = vmatprep.subr.mxu1 %v7289_v27 }
0x18d3   :  { %7869 = vmatpush3.msra.mxu1 %v7289_v27 }
0x18d4   :  { %7873 = vmatprep.subr.mxu1 %v8444_v6 }
0x198c   :  { %v7842_v63 = vpop.f32.mrf.mxu1 }
0x198d   :  { %v3524_v0 = vadd.f32 %v7842_v63, %v7281_v62 }
0x198e   :  { %v3518_v1 = vpop.f32.mrf.mxu1 }
0x198f   :  { %v3519_v3 = vadd.f32 %v7281_v62, %v3518_v1  ;;  %v3528_v7 = vmax.f32 %v3524_v0, 0.0 }
0x1991   :  { %v3527_v4 = vmax.f32 %v3519_v3, 0.0 }
0x1993   :  { %7859 = vmatprep.mubr.msk.f32.mxu0 %vm3544_vm5, %v3527_v4 }
0x1994   :  { %7860 = vmatmul.mubr.msk.f32.vlgmr.msra.gmra.mxu0 %vm3544_vm5, %v3528_v7 }
0x1995   :  { %7885 = vmatprep.mubr.msk.f32.mxu0 %vm8445_vm1, %v8444_v6 }
0x1a54   :  { %v7861_v9 = vpop.f32.mrf.mxu0 }
0x1a55   :  { %v3623_v12 = vadd.f32 %v7861_v9, %v7284_v8 }
0x1a56   :  { %v3617_v5 = vpop.f32.mrf.mxu0 }
0x1a57   :  { %v3618_v13 = vadd.f32 %v7284_v8, %v3617_v5  ;;  %v3627_v2 = vadd.f32 %v3623_v12, %v3434_v59 }
0x1a59   :  { %v3626_v45 = vadd.f32 %v3618_v13, %v3433_v57  ;;  %v3633_v14 = vsel %vm171_vm0, %v3627_v2, 0.0  ;;  %v9139_v57 = vld [vmem:[#allocation7] sm:$0xff] }
0x1a5a   :  { %3634 = vadd.xlane.f32.xlu0 %v3633_v14 }
0x1a5b   :  { %v3630_v17 = vsel %vm171_vm0, %v3626_v45, 0.0 }
0x1a5c   :  { %3631 = vadd.xlane.f32.xlu1 %v3630_v17 }
0x1ae3   :  { %v3635_v16 = vpop.xlane.xlu0 %3634 }
0x1ae4   :  { %v3637_v19 = vmul.f32 0.03125, %v3635_v16 }
0x1ae5   :  { %v3632_v20 = vpop.xlane.xlu1 %3631 }
0x1ae6   :  { %v3639_v21 = vsub.f32 %v3627_v2, %v3637_v19  ;;  %v3636_v15 = vmul.f32 0.03125, %v3632_v20 }
0x1ae8   :  { %v3638_v22 = vsub.f32 %v3626_v45, %v3636_v15  ;;  %v3641_v23 = vmul.f32 %v3639_v21, %v3639_v21 }
0x1aea   :  { %v3645_v18 = vsel %vm171_vm0, %v3641_v23, 0.0  ;;  %v3640_v24 = vmul.f32 %v3638_v22, %v3638_v22 }
0x1aeb   :  { %3646 = vadd.xlane.f32.xlu0 %v3645_v18 }
0x1aec   :  { %v3642_v44 = vsel %vm171_vm0, %v3640_v24, 0.0 }
0x1aed   :  { %3643 = vadd.xlane.f32.xlu1 %v3642_v44 }
0x1b74   :  { %v3647_v28 = vpop.xlane.xlu0 %3646 }
0x1b75   :  { %v3649_v29 = vmul.f32 0.03125, %v3647_v28 }
0x1b76   :  { %v3644_v30 = vpop.xlane.xlu1 %3643 }
0x1b77   :  { %v3651_v31 = vadd.f32 1e-05, %v3649_v29  ;;  %v3648_v35 = vmul.f32 0.03125, %v3644_v30 }
0x1b79   :  { %8203 = vrsqrt.f32 %v3651_v31  ;;  %v3650_v32 = vadd.f32 1e-05, %v3648_v35 }
0x1b7b   :  { %8205 = vrsqrt.f32 %v3650_v32 }
0x1b86   :  { %v8204_v34 = vpop.eup %8203 }
0x1b87   :  { %v3655_v11 = vmul.f32 %v8204_v34, %v3639_v21 }
0x1b88   :  { %v8206_v36 = vpop.eup %8205 }
0x1b89   :  { %v3654_v37 = vmul.f32 %v8206_v36, %v3638_v22  ;;  %v3663_v39 = vmul.f32 %v7287_v33, %v3655_v11 }
0x1b8b   :  { %v3662_v42 = vmul.f32 %v7287_v33, %v3654_v37  ;;  %v9108_v46 = vadd.f32 %v7288_v41, %v3663_v39 }
0x1b8d   :  { %v9106_v43 = vadd.f32 %v7288_v41, %v3662_v42 }
0x1b8f   :  { %7870 = vmatprep.mubr.msk.f32.mxu1 %vm171_vm0, %v9106_v43 }
0x1b90   :  { %7871 = vmatmul.mubr.msk.f32.vlgmr.msra.gmra.mxu1 %vm171_vm0, %v9108_v46 }
0x1b91   :  { %7875 = vmatprep.mubr.msk.f32.mxu1 %vm8445_vm1, %v8444_v6 }
0x1c50   :  { %v7872_v50 = vpop.f32.mrf.mxu1 }
0x1c51   :  { %v9119_v51 = vadd.f32 %v7872_v50, %v7294_v48 }
0x1c52   :  { %v3757_v40 = vpop.f32.mrf.mxu1 }
0x1c53   :  { %v9121_v52 = vadd.f32 %v7294_v48, %v3757_v40  ;;  %3844 = vrot.lane.b32.xlu0 %v9119_v51, %s9631_s5 }
0x1c55   :  { %3767 = vrot.lane.b32.xlu1 %v9121_v52, %s9631_s5 }
0x1cc5   :  { %v3845_v54 = vpop.permute.xlu0 %3844 }
0x1cc7   :  { %v3768_v53 = vpop.permute.xlu1 %3767 }
0x1cc8   :  { %7874 = vmatpush3.xpose.msk.msra.mxu1 %vm256_vm2, %v3768_v53 }
0x1cc9   :  { %7878 = vmatprep.subr.mxu1 %v8444_v6 }
0x1ccb   :  { %7876 = vmatmul.mubr.msk.f32.vlgmr.msra.gmra.mxu1 %vm256_vm2, %v9121_v52 }
0x1ccc   :  { %7879 = vmatpush3.xpose.msk.msra.mxu1 %vm256_vm2, %v3845_v54  ;;  %7880 = vmatprep.mubr.msk.f32.mxu1 %vm8445_vm1, %v8444_v6 }
0x1ccd   :  { %7888 = vmatprep.subr.mxu1 %v8444_v6 }
0x1ccf   :  { %7881 = vmatmul.mubr.msk.f32.vlgmr.msra.gmra.mxu1 %vm256_vm2, %v9119_v51 }
0x1cd0   :  { %7890 = vmatprep.mubr.msk.f32.mxu1 %vm8445_vm1, %v8444_v6 }
0x1d8b   :  { %v3839_v55 = vpop.f32.mrf.mxu1 }
0x1d8c   :  { %v3920_v47 = vmul.f32 0.35355338, %v3839_v55 }
0x1d8d   :  { %v7877_v56 = vpop.f32.mrf.mxu1 }
0x1d8e   :  { %v3922_v58 = vadd.f32 %v9139_v57, %v3920_v47 }
0x1d8f   :  { %v3916_v59 = vpop.f32.mrf.mxu1 }
0x1d90   :  { %v3921_v60 = vmul.f32 0.35355338, %v3916_v59  ;;  %v3924_v61 = vsel %vm256_vm2, %v3922_v58, -inf }
0x1d91   :  { %3925 = vmax.xlane.f32.xlu1 %v3924_v61  ;;  %v7882_v38 = vpop.f32.mrf.mxu1 }
0x1d92   :  { %v3923_v49 = vadd.f32 %v9139_v57, %v3921_v60 }
0x1d94   :  { %v3927_v62 = vsel %vm256_vm2, %v3923_v49, -inf }
0x1d95   :  { %3928 = vmax.xlane.f32.xlu0 %v3927_v62 }
0x1da2   :  { %3946 = vrot.lane.b32.xlu1 %v9121_v52, %s9653_s0 }
0x1da6   :  { %4100 = vrot.lane.b32.xlu1 %v9121_v52, %s9629_s2 }
0x1daa   :  { %4178 = vrot.lane.b32.xlu1 %v9119_v51, %s9629_s2 }
0x1dab   :  { %4022 = vrot.lane.b32.xlu0 %v9119_v51, %s9653_s0 }
0x1e1a   :  { %v3926_v63 = vpop.xlane.xlu1 %3925 }
0x1e1b   :  { %v3930_v0 = vsub.f32 %v3922_v58, %v3926_v63 }
0x1e1d   :  { %v3932_v1 = vmul.f32 1.442695, %v3930_v0 }
0x1e1e   :  { %v3947_v3 = vpop.permute.xlu1 %3946  ;;  %v3929_v4 = vpop.xlane.xlu0 %3928 }
0x1e1f   :  { %8207 = vpow2.f32 %v3932_v1  ;;  %v3931_v7 = vsub.f32 %v3923_v49, %v3929_v4  ;;  %7884 = vmatpush3.msra.mxu0 %v3947_v3 }
0x1e20   :  { %7893 = vmatprep.subr.mxu0 %v8444_v6 }
0x1e21   :  { %v3934_v8 = vmul.f32 1.442695, %v3931_v7 }
0x1e22   :  { %v4023_v9 = vpop.permute.xlu0 %4022  ;;  %v4101_v45 = vpop.permute.xlu1 %4100 }
0x1e23   :  { %8209 = vpow2.f32 %v3934_v8  ;;  %7889 = vmatpush3.msra.mxu1 %v4023_v9 }
0x1e24   :  { %7898 = vmatprep.subr.mxu1 %v8444_v6 }
0x1e26   :  { %v4179_v14 = vpop.permute.xlu1 %4178 }
0x1e2c   :  { %v8208_v12 = vpop.eup %8207 }
0x1e2d   :  { %v3936_v5 = vsel %vm256_vm2, %v8208_v12, 0.0 }
0x1e2e   :  { %3937 = vadd.xlane.f32.xlu1 %v3936_v5 }
0x1e30   :  { %v8210_v13 = vpop.eup %8209 }
0x1e31   :  { %v3939_v2 = vsel %vm256_vm2, %v8210_v13, 0.0 }
0x1e32   :  { %3940 = vadd.xlane.f32.xlu0 %v3939_v2 }
0x1e3f   :  { %4176 = vrot.lane.b32.xlu1 %v9119_v51, %s9654_s30 }
0x1e48   :  { %4098 = vrot.lane.b32.xlu0 %v9121_v52, %s9654_s30 }
0x1eb7   :  { %v3938_v17 = vpop.xlane.xlu1 %3937 }
0x1eb8   :  { %8211 = vrcp.f32 %v3938_v17 }
0x1ebb   :  { %v3941_v16 = vpop.xlane.xlu0 %3940  ;;  %v4177_v23 = vpop.permute.xlu1 %4176 }
0x1ebc   :  { %8213 = vrcp.f32 %v3941_v16 }
0x1ebf   :  { %v4099_v22 = vpop.permute.xlu0 %4098 }
0x1ec5   :  { %v8212_v19 = vpop.eup %8211 }
0x1ec6   :  { %v3944_v20 = vmul.f32 %v8212_v19, %v8208_v12 }
0x1ec8   :  { %7886 = vmatmul.mubr.msk.f32.vlgmr.msra.gmra.mxu0 %vm256_vm2, %v3944_v20 }
0x1ec9   :  { %v8214_v21 = vpop.eup %8213  ;;  %7894 = vmatpush3.xpose.msk.msra.mxu0 %vm256_vm2, %v4101_v45  ;;  %7895 = vmatprep.mubr.msk.f32.mxu0 %vm8445_vm1, %v8444_v6 }
0x1eca   :  { %v3945_v15 = vmul.f32 %v8214_v21, %v8210_v13  ;;  %7903 = vmatprep.subr.mxu0 %v8444_v6 }
0x1ecc   :  { %7891 = vmatmul.mubr.msk.f32.vlgmr.msra.gmra.mxu1 %vm256_vm2, %v3945_v15  ;;  %7896 = vmatmul.mubr.msk.f32.vlgmr.msra.gmra.mxu0 %vm256_vm2, %v4099_v22 }
0x1ecd   :  { %7899 = vmatpush3.xpose.msk.msra.mxu1 %vm256_vm2, %v4179_v14  ;;  %7900 = vmatprep.mubr.msk.f32.mxu1 %vm8445_vm1, %v8444_v6 }
0x1ece   :  { %7908 = vmatprep.subr.mxu1 %v8444_v6  ;;  %7905 = vmatprep.mubr.msk.f32.mxu0 %vm8445_vm1, %v8444_v6 }
0x1ed0   :  { %7901 = vmatmul.mubr.msk.f32.vlgmr.msra.gmra.mxu1 %vm256_vm2, %v4177_v23 }
0x1ed1   :  { %7910 = vmatprep.mubr.msk.f32.mxu1 %vm8445_vm1, %v8444_v6 }
0x1f88   :  { %v9177_v18 = vpop.f32.mrf.mxu0 }
0x1f8a   :  { %v7887_v24 = vpop.f32.mrf.mxu0 }
0x1f8c   :  { %v9179_v44 = vpop.f32.mrf.mxu1  ;;  %v4172_v10 = vpop.f32.mrf.mxu0 }
0x1f8d   :  { %v4254_v26 = vmul.f32 0.35355338, %v4172_v10 }
0x1f8e   :  { %v7892_v25 = vpop.f32.mrf.mxu1  ;;  %v7897_v27 = vpop.f32.mrf.mxu0 }
0x1f8f   :  { %v4256_v28 = vadd.f32 %v9139_v57, %v4254_v26 }
0x1f90   :  { %v4250_v29 = vpop.f32.mrf.mxu1 }
0x1f91   :  { %v4255_v30 = vmul.f32 0.35355338, %v4250_v29  ;;  %v4258_v31 = vsel %vm256_vm2, %v4256_v28, -inf }
0x1f92   :  { %4259 = vmax.xlane.f32.xlu0 %v4258_v31  ;;  %v7902_v35 = vpop.f32.mrf.mxu1 }
0x1f93   :  { %v4257_v32 = vadd.f32 %v9139_v57, %v4255_v30 }
0x1f95   :  { %v4261_v34 = vsel %vm256_vm2, %v4257_v32, -inf }
0x1f96   :  { %4262 = vmax.xlane.f32.xlu1 %v4261_v34 }
0x1fa7   :  { %4280 = vrot.lane.b32.xlu1 %v9121_v52, %s9655_s4 }
0x1fa8   :  { %4356 = vrot.lane.b32.xlu0 %v9119_v51, %s9655_s4 }
0x1fab   :  { %4434 = vrot.lane.b32.xlu1 %v9121_v52, %s9656_s29 }
0x1faf   :  { %4512 = vrot.lane.b32.xlu1 %v9119_v51, %s9656_s29 }
0x1fb3   :  { %4510 = vrot.lane.b32.xlu1 %v9119_v51, %s9657_s27 }
0x201b   :  { %v4260_v33 = vpop.xlane.xlu0 %4259 }
0x201c   :  { %v4264_v11 = vsub.f32 %v4256_v28, %v4260_v33 }
0x201e   :  { %v4266_v36 = vmul.f32 1.442695, %v4264_v11 }
0x201f   :  { %v4357_v37 = vpop.permute.xlu0 %4356  ;;  %v4263_v39 = vpop.xlane.xlu1 %4262 }
0x2020   :  { %8215 = vpow2.f32 %v4266_v36  ;;  %v4265_v41 = vsub.f32 %v4257_v32, %v4263_v39  ;;  %7909 = vmatpush3.msra.mxu1 %v4357_v37 }
0x2021   :  { %7918 = vmatprep.subr.mxu1 %v8444_v6 }
0x2022   :  { %v4268_v42 = vmul.f32 1.442695, %v4265_v41 }
0x2023   :  { %v4281_v48 = vpop.permute.xlu1 %4280 }
0x2024   :  { %8217 = vpow2.f32 %v4268_v42  ;;  %7904 = vmatpush3.msra.mxu0 %v4281_v48 }
0x2025   :  { %7913 = vmatprep.subr.mxu0 %v8444_v6 }
0x2027   :  { %v4435_v56 = vpop.permute.xlu1 %4434 }
0x202b   :  { %v4513_v61 = vpop.permute.xlu1 %4512 }
0x202d   :  { %v8216_v50 = vpop.eup %8215 }
0x202e   :  { %v4270_v40 = vsel %vm256_vm2, %v8216_v50, 0.0 }
0x202f   :  { %4271 = vadd.xlane.f32.xlu0 %v4270_v40  ;;  %v4511_v62 = vpop.permute.xlu1 %4510 }
0x2031   :  { %v8218_v53 = vpop.eup %8217 }
0x2032   :  { %v4273_v54 = vsel %vm256_vm2, %v8218_v53, 0.0 }
0x2033   :  { %4274 = vadd.xlane.f32.xlu0 %v4273_v54 }
0x2049   :  { %4432 = vrot.lane.b32.xlu0 %v9121_v52, %s9657_s27 }
0x20b8   :  { %v4272_v55 = vpop.xlane.xlu0 %4271 }
0x20b9   :  { %8219 = vrcp.f32 %v4272_v55 }
0x20bc   :  { %v4275_v47 = vpop.xlane.xlu0 %4274 }
0x20bd   :  { %8221 = vrcp.f32 %v4275_v47 }
0x20c0   :  { %v4433_v49 = vpop.permute.xlu0 %4432 }
0x20c6   :  { %v8220_v58 = vpop.eup %8219 }
0x20c7   :  { %v4278_v59 = vmul.f32 %v8220_v58, %v8216_v50 }
0x20c9   :  { %7906 = vmatmul.mubr.msk.f32.vlgmr.msra.gmra.mxu0 %vm256_vm2, %v4278_v59 }
0x20ca   :  { %v8222_v60 = vpop.eup %8221  ;;  %7914 = vmatpush3.xpose.msk.msra.mxu0 %vm256_vm2, %v4435_v56  ;;  %7915 = vmatprep.mubr.msk.f32.mxu0 %vm8445_vm1, %v8444_v6 }
0x20cb   :  { %v4279_v38 = vmul.f32 %v8222_v60, %v8218_v53  ;;  %7923 = vmatprep.subr.mxu0 %v8444_v6 }
0x20cd   :  { %7911 = vmatmul.mubr.msk.f32.vlgmr.msra.gmra.mxu1 %vm256_vm2, %v4279_v38  ;;  %7916 = vmatmul.mubr.msk.f32.vlgmr.msra.gmra.mxu0 %vm256_vm2, %v4433_v49 }
0x20ce   :  { %7919 = vmatpush3.xpose.msk.msra.mxu1 %vm256_vm2, %v4513_v61  ;;  %7920 = vmatprep.mubr.msk.f32.mxu1 %vm8445_vm1, %v8444_v6 }
0x20cf   :  { %7928 = vmatprep.subr.mxu1 %v8444_v6  ;;  %7925 = vmatprep.mubr.msk.f32.mxu0 %vm8445_vm1, %v8444_v6 }
0x20d1   :  { %7921 = vmatmul.mubr.msk.f32.vlgmr.msra.gmra.mxu1 %vm256_vm2, %v4511_v62 }
0x20d2   :  { %7930 = vmatprep.mubr.msk.f32.mxu1 %vm8445_vm1, %v8444_v6 }
0x2189   :  { %v9217_v63 = vpop.f32.mrf.mxu0 }
0x218b   :  { %v7907_v0 = vpop.f32.mrf.mxu0 }
0x218d   :  { %v9219_v1 = vpop.f32.mrf.mxu1  ;;  %v4506_v3 = vpop.f32.mrf.mxu0 }
0x218e   :  { %v4588_v4 = vmul.f32 0.35355338, %v4506_v3 }
0x218f   :  { %v7912_v7 = vpop.f32.mrf.mxu1  ;;  %v7917_v8 = vpop.f32.mrf.mxu0 }
0x2190   :  { %v4590_v9 = vadd.f32 %v9139_v57, %v4588_v4 }
0x2191   :  { %v4584_v12 = vpop.f32.mrf.mxu1 }
0x2192   :  { %v4589_v5 = vmul.f32 0.35355338, %v4584_v12  ;;  %v4592_v13 = vsel %vm256_vm2, %v4590_v9, -inf }
0x2193   :  { %4593 = vmax.xlane.f32.xlu0 %v4592_v13  ;;  %v7922_v2 = vpop.f32.mrf.mxu1  ;;  %v7323_v13 = vld [vmem:[%s9647_s1 + $0x30] sm:$0xff] }
0x2194   :  { %v4591_v45 = vadd.f32 %v9139_v57, %v4589_v5  ;;  %v7322_v2 = vld [vmem:[%s9647_s1 + $0x28] sm:$0xff] }
0x2196   :  { %v4595_v14 = vsel %vm256_vm2, %v4591_v45, -inf }
0x2197   :  { %4596 = vmax.xlane.f32.xlu1 %v4595_v14 }
0x21a8   :  { %4614 = vrot.lane.b32.xlu1 %v9121_v52, %s9658_s13 }
0x21a9   :  { %4690 = vrot.lane.b32.xlu0 %v9119_v51, %s9658_s13 }
0x21ac   :  { %4768 = vrot.lane.b32.xlu1 %v9121_v52, %s9659_s25 }
0x21b0   :  { %4846 = vrot.lane.b32.xlu1 %v9119_v51, %s9659_s25 }
0x21b4   :  { %4844 = vrot.lane.b32.xlu1 %v9119_v51, %s9660_s6 }
0x221c   :  { %v4594_v17 = vpop.xlane.xlu0 %4593 }
0x221d   :  { %v4598_v16 = vsub.f32 %v4590_v9, %v4594_v17 }
0x221f   :  { %v4600_v19 = vmul.f32 1.442695, %v4598_v16 }
0x2220   :  { %v4691_v20 = vpop.permute.xlu0 %4690  ;;  %v4597_v21 = vpop.xlane.xlu1 %4596 }
0x2221   :  { %8223 = vpow2.f32 %v4600_v19  ;;  %v4599_v15 = vsub.f32 %v4591_v45, %v4597_v21  ;;  %7929 = vmatpush3.msra.mxu1 %v4691_v20  ;;  %v7321_v45 = vld [vmem:[%s9647_s1 + $0x20] sm:$0xff] }
0x2222   :  { %7938 = vmatprep.subr.mxu1 %v8444_v6 }
0x2223   :  { %v4602_v22 = vmul.f32 1.442695, %v4599_v15 }
0x2224   :  { %v4615_v23 = vpop.permute.xlu1 %4614 }
0x2225   :  { %8225 = vpow2.f32 %v4602_v22  ;;  %7924 = vmatpush3.msra.mxu0 %v4615_v23 }
0x2226   :  { %7933 = vmatprep.subr.mxu0 %v8444_v6 }
0x2228   :  { %v4769_v29 = vpop.permute.xlu1 %4768 }
0x222c   :  { %v4847_v32 = vpop.permute.xlu1 %4846 }
0x222e   :  { %v8224_v24 = vpop.eup %8223 }
0x222f   :  { %v4604_v10 = vsel %vm256_vm2, %v8224_v24, 0.0 }
0x2230   :  { %4605 = vadd.xlane.f32.xlu0 %v4604_v10  ;;  %v4845_v11 = vpop.permute.xlu1 %4844 }
0x2232   :  { %v8226_v26 = vpop.eup %8225 }
0x2233   :  { %v4607_v25 = vsel %vm256_vm2, %v8226_v26, 0.0 }
0x2234   :  { %4608 = vadd.xlane.f32.xlu0 %v4607_v25 }
0x224a   :  { %4766 = vrot.lane.b32.xlu0 %v9121_v52, %s9660_s6 }
0x22b9   :  { %v4606_v27 = vpop.xlane.xlu0 %4605 }
0x22ba   :  { %8227 = vrcp.f32 %v4606_v27 }
0x22bd   :  { %v4609_v28 = vpop.xlane.xlu0 %4608 }
0x22be   :  { %8229 = vrcp.f32 %v4609_v28 }
0x22c1   :  { %v4767_v33 = vpop.permute.xlu0 %4766 }
0x22c7   :  { %v8228_v30 = vpop.eup %8227 }
0x22c8   :  { %v4612_v31 = vmul.f32 %v8228_v30, %v8224_v24  ;;  %v8284_v30 = vld [vmem:[#allocation5] sm:$0xff] }
0x22ca   :  { %7926 = vmatmul.mubr.msk.f32.vlgmr.msra.gmra.mxu0 %vm256_vm2, %v4612_v31 }
0x22cb   :  { %v8230_v35 = vpop.eup %8229  ;;  %7934 = vmatpush3.xpose.msk.msra.mxu0 %vm256_vm2, %v4769_v29  ;;  %7935 = vmatprep.mubr.msk.f32.mxu0 %vm8445_vm1, %v8444_v6 }
0x22cc   :  { %v4613_v34 = vmul.f32 %v8230_v35, %v8226_v26  ;;  %7943 = vmatprep.subr.mxu0 %v8444_v6 }
0x22ce   :  { %7931 = vmatmul.mubr.msk.f32.vlgmr.msra.gmra.mxu1 %vm256_vm2, %v4613_v34  ;;  %7936 = vmatmul.mubr.msk.f32.vlgmr.msra.gmra.mxu0 %vm256_vm2, %v4767_v33 }
0x22cf   :  { %7939 = vmatpush3.xpose.msk.msra.mxu1 %vm256_vm2, %v4847_v32  ;;  %7940 = vmatprep.mubr.msk.f32.mxu1 %vm8445_vm1, %v8444_v6 }
0x22d0   :  { %7948 = vmatprep.subr.mxu1 %v8444_v6  ;;  %7945 = vmatprep.mubr.msk.f32.mxu0 %vm8445_vm1, %v8444_v6 }
0x22d2   :  { %7941 = vmatmul.mubr.msk.f32.vlgmr.msra.gmra.mxu1 %vm256_vm2, %v4845_v11 }
0x22d3   :  { %7950 = vmatprep.mubr.msk.f32.mxu1 %vm8445_vm1, %v8444_v6 }
0x238a   :  { %v4686_v36 = vpop.f32.mrf.mxu0 }
0x238c   :  { %v7927_v37 = vpop.f32.mrf.mxu0 }
0x238e   :  { %v4762_v39 = vpop.f32.mrf.mxu1  ;;  %v4840_v41 = vpop.f32.mrf.mxu0 }
0x238f   :  { %v4922_v42 = vmul.f32 0.35355338, %v4840_v41 }
0x2390   :  { %v7932_v48 = vpop.f32.mrf.mxu1  ;;  %v7937_v50 = vpop.f32.mrf.mxu0 }
0x2391   :  { %v4924_v40 = vadd.f32 %v9139_v57, %v4922_v42 }
0x2392   :  { %v4918_v53 = vpop.f32.mrf.mxu1 }
0x2393   :  { %v4923_v54 = vmul.f32 0.35355338, %v4918_v53  ;;  %v4926_v55 = vsel %vm256_vm2, %v4924_v40, -inf }
0x2394   :  { %4927 = vmax.xlane.f32.xlu0 %v4926_v55  ;;  %v7942_v47 = vpop.f32.mrf.mxu1  ;;  %v5369_v55 = vld [vmem:[#allocation8 + $0x30] sm:$0xff] }
0x2395   :  { %v4925_v56 = vadd.f32 %v9139_v57, %v4923_v54  ;;  %v7336_v47 = vld [vmem:[%s9649_s3 + $0x38] sm:$0xff] }
0x2397   :  { %v4929_v58 = vsel %vm256_vm2, %v4925_v56, -inf }
0x2398   :  { %4930 = vmax.xlane.f32.xlu1 %v4929_v58  ;;  %v5368_v58 = vld [vmem:[#allocation8 + $0x28] sm:$0xff] }
0x23a9   :  { %4948 = vrot.lane.b32.xlu1 %v9121_v52, %s9661_s9 }
0x23ad   :  { %5102 = vrot.lane.b32.xlu1 %v9217_v63, %s9650_s26 }
0x23b1   :  { %5104 = vrot.lane.b32.xlu1 %v9219_v1, %s9650_s26 }
0x23b5   :  { %5112 = vrot.lane.b32.xlu1 %v4762_v39, %s9651_s24 }
0x241d   :  { %v4928_v59 = vpop.xlane.xlu0 %4927 }
0x241e   :  { %v4932_v60 = vsub.f32 %v4924_v40, %v4928_v59  ;;  %v7334_v59 = vld [vmem:[%s9649_s3 + $0x28] sm:$0xff] }
0x2420   :  { %v4934_v61 = vmul.f32 1.442695, %v4932_v60  ;;  %v5367_v60 = vld [vmem:[#allocation8 + $0x20] sm:$0xff] }
0x2421   :  { %v4931_v38 = vpop.xlane.xlu1 %4930 }
0x2422   :  { %8231 = vpow2.f32 %v4934_v61  ;;  %v4933_v57 = vsub.f32 %v4925_v56, %v4931_v38  ;;  %v7335_v56 = vld [vmem:[%s9649_s3 + $0x30] sm:$0xff]  ;;  %v8285_v61 = vld [vmem:[#allocation5 + $0x8] sm:$0xff]  ;;  %v7333_v38 = vld [vmem:[%s9649_s3 + $0x20] sm:$0xff] }
0x2424   :  { %v4936_v49 = vmul.f32 1.442695, %v4933_v57 }
0x2425   :  { %v4949_v62 = vpop.permute.xlu1 %4948 }
0x2426   :  { %8233 = vpow2.f32 %v4936_v49  ;;  %7944 = vmatpush3.msra.mxu0 %v4949_v62 }
0x2429   :  { %v5103_v20 = vpop.permute.xlu1 %5102 }
0x242a   :  { %v5124_v22 = vsel %vm256_vm2, %v9177_v18, %v5103_v20  ;;  %v7326_v18 = vld [vmem:[%s9648_s11 + $0x1] ss:$0 sm:$0xff] }
0x242b   :  { %v7338_v20 = vld [vmem:[%s9583_s8 + $0x1] ss:$0 sm:$0xff]  ;;  %s9662_s8 = smov 96  }
0x242d   :  { %v5105_v21 = vpop.permute.xlu1 %5104 }
0x242e   :  { %v5125_v25 = vsel %vm256_vm2, %v9179_v44, %v5105_v21 }
0x242f   :  { %v8232_v0 = vpop.eup %8231 }
0x2430   :  { %v4938_v52 = vsel %vm256_vm2, %v8232_v0, 0.0 }
0x2431   :  { %4939 = vadd.xlane.f32.xlu0 %v4938_v52  ;;  %v5113_v23 = vpop.permute.xlu1 %5112 }
0x2432   :  { %v5127_v27 = vsel %vm1614_vm4, %v5125_v25, %v5113_v23 }
0x2433   :  { %v8234_v63 = vpop.eup %8233 }
0x2434   :  { %v4941_v3 = vsel %vm256_vm2, %v8234_v63, 0.0 }
0x2435   :  { %4942 = vadd.xlane.f32.xlu0 %v4941_v3 }
0x244b   :  { %5024 = vrot.lane.b32.xlu0 %v9119_v51, %s9661_s9  ;;  %v7324_v51 = vld [vmem:[%s9647_s1 + $0x38] sm:$0xff] }
0x244c   :  { %7953 = vmatprep.subr.mxu0 %v7324_v51 }
0x244f   :  { %5110 = vrot.lane.b32.xlu0 %v4686_v36, %s9651_s24 }
0x24ba   :  { %v4940_v1 = vpop.xlane.xlu0 %4939 }
0x24bb   :  { %8235 = vrcp.f32 %v4940_v1  ;;  %v7331_v1 = vld [vmem:[%s9592_s17 + $0x1] ss:$0 sm:$0xff] }
0x24be   :  { %v4943_v4 = vpop.xlane.xlu0 %4942 }
0x24bf   :  { %8237 = vrcp.f32 %v4943_v4 }
0x24c2   :  { %v5025_v7 = vpop.permute.xlu0 %5024 }
0x24c3   :  { %7949 = vmatpush3.msra.mxu1 %v5025_v7  ;;  %v7332_v7 = vld [vmem:[%s9593_s18 + $0x1] ss:$0 sm:$0xff] }
0x24c4   :  { %7964 = vmatprep.subr.mxu1 %v7336_v47 }
0x24c6   :  { %v5111_v15 = vpop.permute.xlu0 %5110 }
0x24c7   :  { %v5126_v24 = vsel %vm1614_vm4, %v5124_v22, %v5111_v15 }
0x24c8   :  { %v8236_v8 = vpop.eup %8235 }
0x24c9   :  { %v4946_v9 = vmul.f32 %v8236_v8, %v8232_v0 }
0x24cb   :  { %7946 = vmatmul.mubr.msk.f32.vlgmr.msra.gmra.mxu0 %vm256_vm2, %v4946_v9 }
0x24cc   :  { %v8238_v12 = vpop.eup %8237  ;;  %7954 = vmatpush3.msra.mxu0 %v7324_v51 }
0x24cd   :  { %v4947_v5 = vmul.f32 %v8238_v12, %v8234_v63  ;;  %7955 = vmatprep.subr.mxu0 %v7323_v13 }
0x24ce   :  { %7956 = vmatpush3.msra.mxu0 %v7323_v13 }
0x24cf   :  { %7951 = vmatmul.mubr.msk.f32.vlgmr.msra.gmra.mxu1 %vm256_vm2, %v4947_v5  ;;  %7957 = vmatprep.subr.mxu0 %v7322_v2 }
0x24d0   :  { %7958 = vmatpush3.msra.mxu0 %v7322_v2  ;;  %7965 = vmatpush3.msra.mxu1 %v7336_v47  ;;  %v7342_v2 = vld [vmem:[%s9585_s10 + $0x1] ss:$0 sm:$0xff]  ;;  %s9663_s10 = smov 88  }
0x24d1   :  { %7959 = vmatprep.subr.mxu0 %v7321_v45  ;;  %7966 = vmatprep.subr.mxu1 %v7335_v56 }
0x24d2   :  { %7960 = vmatpush3.msra.mxu0 %v7321_v45  ;;  %7967 = vmatpush3.msra.mxu1 %v7335_v56 }
0x24d3   :  { %7968 = vmatprep.subr.mxu1 %v7334_v59 }
0x24d4   :  { %7969 = vmatpush3.msra.mxu1 %v7334_v59 }
0x24d5   :  { %7970 = vmatprep.subr.mxu1 %v7333_v38 }
0x24d6   :  { %7971 = vmatpush3.msra.mxu1 %v7333_v38 }
0x24d7   :  { %7986 = vmatprep.subr.mxu1 %v8444_v6 }
0x258b   :  { %v5020_v14 = vpop.f32.mrf.mxu0 }
0x258c   :  { %5118 = vrot.lane.b32.xlu0 %v5020_v14, %s9652_s7 }
0x258d   :  { %v7947_v17 = vpop.f32.mrf.mxu0 }
0x258f   :  { %v5096_v16 = vpop.f32.mrf.mxu1 }
0x2590   :  { %5120 = vrot.lane.b32.xlu1 %v5096_v16, %s9652_s7 }
0x2591   :  { %v7952_v19 = vpop.f32.mrf.mxu1 }
0x25fe   :  { %v5119_v10 = vpop.permute.xlu0 %5118 }
0x25ff   :  { %v5128_v26 = vsel %vm1617_vm3, %v5126_v24, %v5119_v10 }
0x2600   :  { %7961 = vmatprep.mubr.msk.f32.mxu0 %vm171_vm0, %v5128_v26 }
0x2602   :  { %v5121_v28 = vpop.permute.xlu1 %5120 }
0x2603   :  { %v5129_v29 = vsel %vm1617_vm3, %v5127_v27, %v5121_v28 }
0x2604   :  { %7962 = vmatmul.mubr.msk.f32.vlgmr.msra.gmra.mxu0 %vm171_vm0, %v5129_v29 }
0x2605   :  { %7983 = vmatprep.mubr.msk.f32.mxu0 %vm171_vm0, %v8284_v30 }
0x26c4   :  { %v7963_v31 = vpop.f32.mrf.mxu0 }
0x26c5   :  { %v5221_v35 = vadd.f32 %v7963_v31, %v7326_v18 }
0x26c6   :  { %v5215_v32 = vpop.f32.mrf.mxu0 }
0x26c7   :  { %v5225_v34 = vadd.f32 %v5221_v35, %v9108_v46  ;;  %v5216_v44 = vadd.f32 %v7326_v18, %v5215_v32 }
0x26c9   :  { %v5224_v33 = vadd.f32 %v5216_v44, %v9106_v43  ;;  %v5233_v11 = vsel %vm171_vm0, %v5225_v34, 0.0  ;;  %v5370_v43 = vld [vmem:[#allocation8 + $0x38] sm:$0xff] }
0x26ca   :  { %5234 = vadd.xlane.f32.xlu1 %v5233_v11  ;;  %7975 = vmatprep.subr.mxu0 %v5370_v43 }
0x26cb   :  { %v5230_v36 = vsel %vm171_vm0, %v5224_v33, 0.0  ;;  %7976 = vmatpush3.msra.mxu0 %v5370_v43 }
0x26cc   :  { %5231 = vadd.xlane.f32.xlu0 %v5230_v36  ;;  %7977 = vmatprep.subr.mxu0 %v5369_v55 }
0x26cd   :  { %7978 = vmatpush3.msra.mxu0 %v5369_v55 }
0x26ce   :  { %7979 = vmatprep.subr.mxu0 %v5368_v58 }
0x26cf   :  { %7980 = vmatpush3.msra.mxu0 %v5368_v58 }
0x26d0   :  { %7981 = vmatprep.subr.mxu0 %v5367_v60 }
0x26d1   :  { %7982 = vmatpush3.msra.mxu0 %v5367_v60 }
0x26d2   :  { %7984 = vmatmul.mubr.msk.f32.vlgmr.msra.gmra.mxu0 %vm171_vm0, %v8285_v61  ;;  %7996 = vmatprep.subr.mxu0 %v8444_v6 }
0x26d3   :  { %7998 = vmatprep.mubr.msk.f32.mxu0 %vm8445_vm1, %v8444_v6 }
0x2753   :  { %v5235_v37 = vpop.xlane.xlu1 %5234 }
0x2754   :  { %v5237_v39 = vmul.f32 0.03125, %v5235_v37 }
0x2755   :  { %v5232_v41 = vpop.xlane.xlu0 %5231 }
0x2756   :  { %v5236_v42 = vmul.f32 0.03125, %v5232_v41  ;;  %v5239_v48 = vsub.f32 %v5225_v34, %v5237_v39 }
0x2758   :  { %v5238_v50 = vsub.f32 %v5224_v33, %v5236_v42  ;;  %v5241_v54 = vmul.f32 %v5239_v48, %v5239_v48 }
0x275a   :  { %v5240_v40 = vmul.f32 %v5238_v50, %v5238_v50  ;;  %v5245_v46 = vsel %vm171_vm0, %v5241_v54, 0.0 }
0x275c   :  { %v5242_v53 = vsel %vm171_vm0, %v5240_v40, 0.0 }
0x275d   :  { %5243 = vadd.xlane.f32.xlu0 %v5242_v53 }
0x2761   :  { %5246 = vadd.xlane.f32.xlu0 %v5245_v46 }
0x2792   :  { %v7985_v45 = vpop.f32.mrf.mxu0 }
0x2793   :  { %v9345_v14 = vadd.f32 %v7985_v45, %v7342_v2 }
0x2794   :  { %v5445_v17 = vpop.f32.mrf.mxu0 }
0x2795   :  { %v9347_v16 = vadd.f32 %v7342_v2, %v5445_v17 }
0x27e6   :  { %v5244_v57 = vpop.xlane.xlu0 %5243 }
0x27e7   :  { %v5248_v49 = vmul.f32 0.03125, %v5244_v57 }
0x27e9   :  { %v5250_v62 = vadd.f32 1e-05, %v5248_v49 }
0x27ea   :  { %v5247_v0 = vpop.xlane.xlu0 %5246 }
0x27eb   :  { %8239 = vrsqrt.f32 %v5250_v62  ;;  %v5249_v52 = vmul.f32 0.03125, %v5247_v0 }
0x27ed   :  { %v5251_v63 = vadd.f32 1e-05, %v5249_v52 }
0x27ef   :  { %8241 = vrsqrt.f32 %v5251_v63 }
0x27f8   :  { %v8240_v3 = vpop.eup %8239 }
0x27f9   :  { %v5254_v4 = vmul.f32 %v8240_v3, %v5238_v50 }
0x27fb   :  { %v5262_v8 = vmul.f32 %v7331_v1, %v5254_v4 }
0x27fc   :  { %v8242_v9 = vpop.eup %8241 }
0x27fd   :  { %v5255_v12 = vmul.f32 %v8242_v9, %v5239_v48  ;;  %v9332_v5 = vadd.f32 %v7332_v7, %v5262_v8 }
0x27ff   :  { %v5263_v51 = vmul.f32 %v7331_v1, %v5255_v12  ;;  %7972 = vmatprep.mubr.msk.f32.mxu1 %vm171_vm0, %v9332_v5 }
0x2801   :  { %v9336_v13 = vadd.f32 %v7332_v7, %v5263_v51 }
0x2803   :  { %7973 = vmatmul.mubr.msk.f32.vlgmr.msra.gmra.mxu1 %vm171_vm0, %v9336_v13 }
0x2804   :  { %7988 = vmatprep.mubr.msk.f32.mxu1 %vm8445_vm1, %v8444_v6  ;;  %7987 = vmatpush3.xpose.msk.msra.mxu1 %vm256_vm2, %v9347_v16 }
0x2805   :  { %7991 = vmatprep.subr.mxu1 %v8444_v6 }
0x28c3   :  { %v7974_v19 = vpop.f32.mrf.mxu1 }
0x28c4   :  { %v9363_v22 = vadd.f32 %v7974_v19, %v7338_v20 }
0x28c5   :  { %v5357_v21 = vpop.f32.mrf.mxu1 }
0x28c6   :  { %v9355_v15 = vadd.f32 %v7338_v20, %v5357_v21 }
0x28c8   :  { %7989 = vmatmul.mubr.msk.f32.vlgmr.msra.gmra.mxu1 %vm256_vm2, %v9355_v15 }
0x28c9   :  { %7992 = vmatpush3.xpose.msk.msra.mxu1 %vm256_vm2, %v9345_v14  ;;  %7993 = vmatprep.mubr.msk.f32.mxu1 %vm8445_vm1, %v8444_v6 }
0x28ca   :  { %8001 = vmatprep.subr.mxu1 %v8444_v6 }
0x28cc   :  { %7994 = vmatmul.mubr.msk.f32.vlgmr.msra.gmra.mxu1 %vm256_vm2, %v9363_v22 }
0x28cd   :  { %8003 = vmatprep.mubr.msk.f32.mxu1 %vm8445_vm1, %v8444_v6 }
0x2988   :  { %v5526_v23 = vpop.f32.mrf.mxu1 }
0x2989   :  { %v5606_v24 = vmul.f32 0.35355338, %v5526_v23 }
0x298a   :  { %v7990_v10 = vpop.f32.mrf.mxu1 }
0x298b   :  { %v5608_v26 = vsel %vm256_vm2, %v5606_v24, -inf }
0x298c   :  { %5609 = vmax.xlane.f32.xlu1 %v5608_v26  ;;  %v5602_v25 = vpop.f32.mrf.mxu1 }
0x298d   :  { %v5607_v27 = vmul.f32 0.35355338, %v5602_v25 }
0x298e   :  { %v7995_v28 = vpop.f32.mrf.mxu1 }
0x298f   :  { %v5611_v29 = vsel %vm256_vm2, %v5607_v27, -inf }
0x2990   :  { %5612 = vmax.xlane.f32.xlu0 %v5611_v29 }
0x299d   :  { %5630 = vrot.lane.b32.xlu1 %v9347_v16, %s9662_s8 }
0x29a1   :  { %5784 = vrot.lane.b32.xlu1 %v9347_v16, %s9654_s30 }
0x29a5   :  { %5862 = vrot.lane.b32.xlu1 %v9345_v14, %s9654_s30 }
0x29a6   :  { %5706 = vrot.lane.b32.xlu0 %v9345_v14, %s9662_s8 }
0x2a15   :  { %v5610_v30 = vpop.xlane.xlu1 %5609 }
0x2a16   :  { %v5614_v18 = vsub.f32 %v5606_v24, %v5610_v30 }
0x2a18   :  { %v5616_v31 = vmul.f32 1.442695, %v5614_v18 }
0x2a19   :  { %v5631_v35 = vpop.permute.xlu1 %5630  ;;  %v5613_v32 = vpop.xlane.xlu0 %5612 }
0x2a1a   :  { %8243 = vpow2.f32 %v5616_v31  ;;  %v5615_v34 = vsub.f32 %v5607_v27, %v5613_v32  ;;  %7997 = vmatpush3.msra.mxu0 %v5631_v35 }
0x2a1b   :  { %8006 = vmatprep.subr.mxu0 %v8444_v6 }
0x2a1c   :  { %v5618_v44 = vmul.f32 1.442695, %v5615_v34 }
0x2a1d   :  { %v5707_v33 = vpop.permute.xlu0 %5706  ;;  %v5785_v41 = vpop.permute.xlu1 %5784 }
0x2a1e   :  { %8245 = vpow2.f32 %v5618_v44  ;;  %8002 = vmatpush3.msra.mxu1 %v5707_v33 }
0x2a1f   :  { %8011 = vmatprep.subr.mxu1 %v8444_v6 }
0x2a21   :  { %v5863_v42 = vpop.permute.xlu1 %5862 }
0x2a27   :  { %v8244_v11 = vpop.eup %8243 }
0x2a28   :  { %v5620_v36 = vsel %vm256_vm2, %v8244_v11, 0.0 }
0x2a29   :  { %5621 = vadd.xlane.f32.xlu1 %v5620_v36 }
0x2a2b   :  { %v8246_v37 = vpop.eup %8245 }
0x2a2c   :  { %v5623_v39 = vsel %vm256_vm2, %v8246_v37, 0.0 }
0x2a2d   :  { %5624 = vadd.xlane.f32.xlu0 %v5623_v39 }
0x2a3a   :  { %5860 = vrot.lane.b32.xlu1 %v9363_v22, %s9654_s30 }
0x2a43   :  { %5782 = vrot.lane.b32.xlu0 %v9355_v15, %s9654_s30 }
0x2ab2   :  { %v5622_v48 = vpop.xlane.xlu1 %5621 }
0x2ab3   :  { %8247 = vrcp.f32 %v5622_v48 }
0x2ab6   :  { %v5625_v50 = vpop.xlane.xlu0 %5624  ;;  %v5861_v55 = vpop.permute.xlu1 %5860 }
0x2ab7   :  { %8249 = vrcp.f32 %v5625_v50 }
0x2aba   :  { %v5783_v43 = vpop.permute.xlu0 %5782 }
0x2ac0   :  { %v8248_v40 = vpop.eup %8247 }
0x2ac1   :  { %v5628_v53 = vmul.f32 %v8248_v40, %v8244_v11 }
0x2ac3   :  { %7999 = vmatmul.mubr.msk.f32.vlgmr.msra.gmra.mxu0 %vm256_vm2, %v5628_v53 }
0x2ac4   :  { %v8250_v54 = vpop.eup %8249  ;;  %8007 = vmatpush3.xpose.msk.msra.mxu0 %vm256_vm2, %v5785_v41  ;;  %8008 = vmatprep.mubr.msk.f32.mxu0 %vm8445_vm1, %v8444_v6 }
0x2ac5   :  { %v5629_v46 = vmul.f32 %v8250_v54, %v8246_v37  ;;  %8016 = vmatprep.subr.mxu0 %v8444_v6 }
0x2ac7   :  { %8004 = vmatmul.mubr.msk.f32.vlgmr.msra.gmra.mxu1 %vm256_vm2, %v5629_v46  ;;  %8009 = vmatmul.mubr.msk.f32.vlgmr.msra.gmra.mxu0 %vm256_vm2, %v5783_v43 }
0x2ac8   :  { %8012 = vmatpush3.xpose.msk.msra.mxu1 %vm256_vm2, %v5863_v42  ;;  %8013 = vmatprep.mubr.msk.f32.mxu1 %vm8445_vm1, %v8444_v6 }
0x2ac9   :  { %8021 = vmatprep.subr.mxu1 %v8444_v6  ;;  %8018 = vmatprep.mubr.msk.f32.mxu0 %vm8445_vm1, %v8444_v6 }
0x2acb   :  { %8014 = vmatmul.mubr.msk.f32.vlgmr.msra.gmra.mxu1 %vm256_vm2, %v5861_v55 }
0x2acc   :  { %8023 = vmatprep.mubr.msk.f32.mxu1 %vm8445_vm1, %v8444_v6 }
0x2b83   :  { %v9404_v47 = vpop.f32.mrf.mxu0 }
0x2b85   :  { %v8000_v56 = vpop.f32.mrf.mxu0 }
0x2b87   :  { %v9406_v58 = vpop.f32.mrf.mxu1  ;;  %v5856_v59 = vpop.f32.mrf.mxu0 }
0x2b88   :  { %v5938_v60 = vmul.f32 0.35355338, %v5856_v59 }
0x2b89   :  { %v8005_v61 = vpop.f32.mrf.mxu1  ;;  %v8010_v38 = vpop.f32.mrf.mxu0 }
0x2b8a   :  { %v5940_v57 = vsel %vm256_vm2, %v5938_v60, -inf }
0x2b8b   :  { %5941 = vmax.xlane.f32.xlu0 %v5940_v57  ;;  %v5934_v49 = vpop.f32.mrf.mxu1 }
0x2b8c   :  { %v5939_v62 = vmul.f32 0.35355338, %v5934_v49 }
0x2b8d   :  { %v8015_v0 = vpop.f32.mrf.mxu1 }
0x2b8e   :  { %v5943_v52 = vsel %vm256_vm2, %v5939_v62, -inf }
0x2b8f   :  { %5944 = vmax.xlane.f32.xlu1 %v5943_v52 }
0x2ba0   :  { %5962 = vrot.lane.b32.xlu1 %v9347_v16, %s9663_s10 }
0x2ba1   :  { %6038 = vrot.lane.b32.xlu0 %v9345_v14, %s9663_s10 }
0x2ba4   :  { %6116 = vrot.lane.b32.xlu1 %v9347_v16, %s9657_s27 }
0x2ba8   :  { %6194 = vrot.lane.b32.xlu1 %v9345_v14, %s9657_s27 }
0x2bac   :  { %6192 = vrot.lane.b32.xlu1 %v9363_v22, %s9657_s27 }
0x2c14   :  { %v5942_v63 = vpop.xlane.xlu0 %5941 }
0x2c15   :  { %v5946_v3 = vsub.f32 %v5938_v60, %v5942_v63 }
0x2c17   :  { %v5948_v1 = vmul.f32 1.442695, %v5946_v3 }
0x2c18   :  { %v6039_v4 = vpop.permute.xlu0 %6038  ;;  %v5945_v7 = vpop.xlane.xlu1 %5944 }
0x2c19   :  { %8251 = vpow2.f32 %v5948_v1  ;;  %v5947_v8 = vsub.f32 %v5939_v62, %v5945_v7  ;;  %8022 = vmatpush3.msra.mxu1 %v6039_v4 }
0x2c1a   :  { %8031 = vmatprep.subr.mxu1 %v8444_v6 }
0x2c1b   :  { %v5950_v9 = vmul.f32 1.442695, %v5947_v8 }
0x2c1c   :  { %v5963_v12 = vpop.permute.xlu1 %5962 }
0x2c1d   :  { %8253 = vpow2.f32 %v5950_v9  ;;  %8017 = vmatpush3.msra.mxu0 %v5963_v12 }
0x2c1e   :  { %8026 = vmatprep.subr.mxu0 %v8444_v6 }
0x2c20   :  { %v6117_v21 = vpop.permute.xlu1 %6116 }
0x2c24   :  { %v6195_v26 = vpop.permute.xlu1 %6194 }
0x2c26   :  { %v8252_v51 = vpop.eup %8251 }
0x2c27   :  { %v5952_v2 = vsel %vm256_vm2, %v8252_v51, 0.0 }
0x2c28   :  { %5953 = vadd.xlane.f32.xlu0 %v5952_v2  ;;  %v6193_v28 = vpop.permute.xlu1 %6192 }
0x2c2a   :  { %v8254_v45 = vpop.eup %8253 }
0x2c2b   :  { %v5955_v17 = vsel %vm256_vm2, %v8254_v45, 0.0 }
0x2c2c   :  { %5956 = vadd.xlane.f32.xlu0 %v5955_v17 }
0x2c42   :  { %6114 = vrot.lane.b32.xlu0 %v9355_v15, %s9657_s27 }
0x2cb1   :  { %v5954_v19 = vpop.xlane.xlu0 %5953 }
0x2cb2   :  { %8255 = vrcp.f32 %v5954_v19 }
0x2cb5   :  { %v5957_v20 = vpop.xlane.xlu0 %5956 }
0x2cb6   :  { %8257 = vrcp.f32 %v5957_v20 }
0x2cb9   :  { %v6115_v27 = vpop.permute.xlu0 %6114 }
0x2cbf   :  { %v8256_v23 = vpop.eup %8255 }
0x2cc0   :  { %v5960_v24 = vmul.f32 %v8256_v23, %v8252_v51 }
0x2cc2   :  { %8019 = vmatmul.mubr.msk.f32.vlgmr.msra.gmra.mxu0 %vm256_vm2, %v5960_v24 }
0x2cc3   :  { %v8258_v10 = vpop.eup %8257  ;;  %8027 = vmatpush3.xpose.msk.msra.mxu0 %vm256_vm2, %v6117_v21  ;;  %8028 = vmatprep.mubr.msk.f32.mxu0 %vm8445_vm1, %v8444_v6 }
0x2cc4   :  { %v5961_v25 = vmul.f32 %v8258_v10, %v8254_v45  ;;  %8036 = vmatprep.subr.mxu0 %v8444_v6 }
0x2cc6   :  { %8024 = vmatmul.mubr.msk.f32.vlgmr.msra.gmra.mxu1 %vm256_vm2, %v5961_v25  ;;  %8029 = vmatmul.mubr.msk.f32.vlgmr.msra.gmra.mxu0 %vm256_vm2, %v6115_v27 }
0x2cc7   :  { %8032 = vmatpush3.xpose.msk.msra.mxu1 %vm256_vm2, %v6195_v26  ;;  %8033 = vmatprep.mubr.msk.f32.mxu1 %vm8445_vm1, %v8444_v6 }
0x2cc8   :  { %8041 = vmatprep.subr.mxu1 %v8444_v6  ;;  %8038 = vmatprep.mubr.msk.f32.mxu0 %vm8445_vm1, %v8444_v6 }
0x2cca   :  { %8034 = vmatmul.mubr.msk.f32.vlgmr.msra.gmra.mxu1 %vm256_vm2, %v6193_v28 }
0x2ccb   :  { %8043 = vmatprep.mubr.msk.f32.mxu1 %vm8445_vm1, %v8444_v6 }
0x2d82   :  { %v9442_v29 = vpop.f32.mrf.mxu0 }
0x2d84   :  { %v8020_v30 = vpop.f32.mrf.mxu0 }
0x2d86   :  { %v9444_v18 = vpop.f32.mrf.mxu1  ;;  %v6188_v31 = vpop.f32.mrf.mxu0 }
0x2d87   :  { %v6270_v35 = vmul.f32 0.35355338, %v6188_v31 }
0x2d88   :  { %v8025_v32 = vpop.f32.mrf.mxu1  ;;  %v8030_v34 = vpop.f32.mrf.mxu0 }
0x2d89   :  { %v6272_v44 = vsel %vm256_vm2, %v6270_v35, -inf  ;;  %v6812_v32 = vld [vmem:[#allocation10 + $0x38] sm:$0xff]  ;;  %v6811_v34 = vld [vmem:[#allocation10 + $0x30] sm:$0xff] }
0x2d8a   :  { %6273 = vmax.xlane.f32.xlu0 %v6272_v44  ;;  %v6266_v33 = vpop.f32.mrf.mxu1  ;;  %v6809_v44 = vld [vmem:[#allocation10 + $0x20] sm:$0xff] }
0x2d8b   :  { %v6271_v11 = vmul.f32 0.35355338, %v6266_v33 }
0x2d8c   :  { %v8035_v36 = vpop.f32.mrf.mxu1 }
0x2d8d   :  { %v6275_v37 = vsel %vm256_vm2, %v6271_v11, -inf }
0x2d8e   :  { %6276 = vmax.xlane.f32.xlu1 %v6275_v37 }
0x2d9f   :  { %6294 = vrot.lane.b32.xlu1 %v9347_v16, %s9656_s29 }
0x2da0   :  { %6370 = vrot.lane.b32.xlu0 %v9345_v14, %s9656_s29 }
0x2da3   :  { %6448 = vrot.lane.b32.xlu1 %v9347_v16, %s9660_s6 }
0x2da7   :  { %6526 = vrot.lane.b32.xlu1 %v9345_v14, %s9660_s6 }
0x2dab   :  { %6524 = vrot.lane.b32.xlu1 %v9363_v22, %s9660_s6 }
0x2e13   :  { %v6274_v39 = vpop.xlane.xlu0 %6273 }
0x2e14   :  { %v6278_v41 = vsub.f32 %v6270_v35, %v6274_v39 }
0x2e16   :  { %v6280_v42 = vmul.f32 1.442695, %v6278_v41 }
0x2e17   :  { %v6371_v48 = vpop.permute.xlu0 %6370  ;;  %v6277_v50 = vpop.xlane.xlu1 %6276 }
0x2e18   :  { %8259 = vpow2.f32 %v6280_v42  ;;  %v6279_v40 = vsub.f32 %v6271_v11, %v6277_v50  ;;  %8042 = vmatpush3.msra.mxu1 %v6371_v48 }
0x2e19   :  { %8051 = vmatprep.subr.mxu1 %v8444_v6 }
0x2e1a   :  { %v6282_v53 = vmul.f32 1.442695, %v6279_v40 }
0x2e1b   :  { %v6295_v54 = vpop.permute.xlu1 %6294 }
0x2e1c   :  { %8261 = vpow2.f32 %v6282_v53  ;;  %8037 = vmatpush3.msra.mxu0 %v6295_v54 }
0x2e1d   :  { %8046 = vmatprep.subr.mxu0 %v8444_v6 }
0x2e1f   :  { %v6449_v60 = vpop.permute.xlu1 %6448 }
0x2e23   :  { %v6527_v49 = vpop.permute.xlu1 %6526 }
0x2e25   :  { %v8260_v46 = vpop.eup %8259 }
0x2e26   :  { %v6284_v43 = vsel %vm256_vm2, %v8260_v46, 0.0 }
0x2e27   :  { %6285 = vadd.xlane.f32.xlu0 %v6284_v43  ;;  %v6525_v0 = vpop.permute.xlu1 %6524 }
0x2e29   :  { %v8262_v22 = vpop.eup %8261 }
0x2e2a   :  { %v6287_v55 = vsel %vm256_vm2, %v8262_v22, 0.0 }
0x2e2b   :  { %6288 = vadd.xlane.f32.xlu0 %v6287_v55 }
0x2e41   :  { %6446 = vrot.lane.b32.xlu0 %v9355_v15, %s9660_s6 }
0x2eb0   :  { %v6286_v56 = vpop.xlane.xlu0 %6285 }
0x2eb1   :  { %8263 = vrcp.f32 %v6286_v56 }
0x2eb4   :  { %v6289_v59 = vpop.xlane.xlu0 %6288 }
0x2eb5   :  { %8265 = vrcp.f32 %v6289_v59 }
0x2eb8   :  { %v6447_v15 = vpop.permute.xlu0 %6446 }
0x2ebe   :  { %v8264_v61 = vpop.eup %8263 }
0x2ebf   :  { %v6292_v38 = vmul.f32 %v8264_v61, %v8260_v46 }
0x2ec1   :  { %8039 = vmatmul.mubr.msk.f32.vlgmr.msra.gmra.mxu0 %vm256_vm2, %v6292_v38 }
0x2ec2   :  { %v8266_v57 = vpop.eup %8265  ;;  %8047 = vmatpush3.xpose.msk.msra.mxu0 %vm256_vm2, %v6449_v60  ;;  %8048 = vmatprep.mubr.msk.f32.mxu0 %vm8445_vm1, %v8444_v6 }
0x2ec3   :  { %v6293_v62 = vmul.f32 %v8266_v57, %v8262_v22  ;;  %8056 = vmatprep.subr.mxu0 %v8444_v6 }
0x2ec5   :  { %8044 = vmatmul.mubr.msk.f32.vlgmr.msra.gmra.mxu1 %vm256_vm2, %v6293_v62  ;;  %8049 = vmatmul.mubr.msk.f32.vlgmr.msra.gmra.mxu0 %vm256_vm2, %v6447_v15 }
0x2ec6   :  { %8052 = vmatpush3.xpose.msk.msra.mxu1 %vm256_vm2, %v6527_v49  ;;  %8053 = vmatprep.mubr.msk.f32.mxu1 %vm8445_vm1, %v8444_v6 }
0x2ec7   :  { %8061 = vmatprep.subr.mxu1 %v8444_v6  ;;  %8058 = vmatprep.mubr.msk.f32.mxu0 %vm8445_vm1, %v8444_v6 }
0x2ec9   :  { %8054 = vmatmul.mubr.msk.f32.vlgmr.msra.gmra.mxu1 %vm256_vm2, %v6525_v0 }
0x2eca   :  { %8063 = vmatprep.mubr.msk.f32.mxu1 %vm8445_vm1, %v8444_v6 }
0x2f81   :  { %v6366_v52 = vpop.f32.mrf.mxu0 }
0x2f83   :  { %v8040_v63 = vpop.f32.mrf.mxu0 }
0x2f85   :  { %v6442_v3 = vpop.f32.mrf.mxu1  ;;  %v6520_v1 = vpop.f32.mrf.mxu0 }
0x2f86   :  { %v6602_v4 = vmul.f32 0.35355338, %v6520_v1 }
0x2f87   :  { %v8045_v7 = vpop.f32.mrf.mxu1  ;;  %v8050_v8 = vpop.f32.mrf.mxu0 }
0x2f88   :  { %v6604_v9 = vsel %vm256_vm2, %v6602_v4, -inf  ;;  %v6953_v8 = vld [vmem:[#allocation11 + $0x30] sm:$0xff] }
0x2f89   :  { %6605 = vmax.xlane.f32.xlu0 %v6604_v9  ;;  %v6598_v12 = vpop.f32.mrf.mxu1  ;;  %v6952_v9 = vld [vmem:[#allocation11 + $0x28] sm:$0xff] }
0x2f8a   :  { %v6603_v51 = vmul.f32 0.35355338, %v6598_v12  ;;  %v6951_v12 = vld [vmem:[#allocation11 + $0x20] sm:$0xff] }
0x2f8b   :  { %v8055_v2 = vpop.f32.mrf.mxu1 }
0x2f8c   :  { %v6607_v45 = vsel %vm256_vm2, %v6603_v51, -inf  ;;  %v7387_v2 = vld [vmem:[%s9590_s15 + $0x70] sm:$0xff] }
0x2f8d   :  { %6608 = vmax.xlane.f32.xlu1 %v6607_v45  ;;  %v7386_v45 = vld [vmem:[%s9590_s15 + $0x68] sm:$0xff] }
0x2f9e   :  { %6626 = vrot.lane.b32.xlu1 %v9347_v16, %s9659_s25 }
0x2fa2   :  { %6780 = vrot.lane.b32.xlu1 %v9442_v29, %s9650_s26 }
0x2fa6   :  { %6782 = vrot.lane.b32.xlu1 %v9444_v18, %s9650_s26 }
0x2faa   :  { %6790 = vrot.lane.b32.xlu1 %v6442_v3, %s9651_s24 }
0x3012   :  { %v6606_v6 = vpop.xlane.xlu0 %6605 }
0x3013   :  { %v6610_v17 = vsub.f32 %v6602_v4, %v6606_v6  ;;  %v7385_v6 = vld [vmem:[%s9590_s15 + $0x60] sm:$0xff] }
0x3015   :  { %v6612_v19 = vmul.f32 1.442695, %v6610_v17 }
0x3016   :  { %v6609_v20 = vpop.xlane.xlu1 %6608 }
0x3017   :  { %8267 = vpow2.f32 %v6612_v19  ;;  %v6611_v21 = vsub.f32 %v6603_v51, %v6609_v20  ;;  %v7388_v51 = vld [vmem:[%s9590_s15 + $0x78] sm:$0xff] }
0x3019   :  { %v6614_v23 = vmul.f32 1.442695, %v6611_v21 }
0x301a   :  { %v6627_v24 = vpop.permute.xlu1 %6626 }
0x301b   :  { %8269 = vpow2.f32 %v6614_v23  ;;  %8057 = vmatpush3.msra.mxu0 %v6627_v24 }
0x301c   :  { %8066 = vmatprep.subr.mxu0 %v6812_v32 }
0x301e   :  { %v6781_v39 = vpop.permute.xlu1 %6780 }
0x301f   :  { %v6802_v48 = vsel %vm256_vm2, %v9404_v47, %v6781_v39  ;;  %v7370_v47 = vld [vmem:[%s9587_s12 + $0x1] ss:$0 sm:$0xff]  ;;  %s8459_s12 = smov [#allocation13]  }
0x3020   :  { %s7199_s30 = sshll.u32 %s8459_s12, 4  ;;  %s7200_s30 = int_to_ptr.vmem [resolvable:$true] %s7199_s30 }
0x3021   :  { %s8406_s29 = scalar_lea.vmem %s7200_s30, 256  ;;  %p8411_p3 = scmp.lt.s32.totalorder %s7200_s30, %s7200_s30 }
0x3022   :  { %v6783_v41 = vpop.permute.xlu1 %6782  ;;  %p8407_p2 = scmp.ne.s32.totalorder %s7200_s30, %s8406_s29  ;;  %p8412_p4 = scmp.lt.s32.totalorder %s8406_s29, %s8406_s29 }
0x3023   :  { %v6803_v46 = vsel %vm256_vm2, %v9406_v58, %v6783_v41 }
0x3024   :  { %v8268_v10 = vpop.eup %8267  ;;  %p8413_p5 = por %p8412_p4, %p8411_p3 }
0x3025   :  { %v6616_v16 = vsel %vm256_vm2, %v8268_v10, 0.0 }
0x3026   :  { %6617 = vadd.xlane.f32.xlu0 %v6616_v16  ;;  %v6791_v50 = vpop.permute.xlu1 %6790  ;;  %v7375_v16 = vld [vmem:[%s9594_s19 + $0x1] ss:$0 sm:$0xff]  ;;  %p8414_p6 = pnand %p8413_p5, %p8407_p2 }
0x3027   :  { %v6805_v43 = vsel %vm1614_vm4, %v6803_v46, %v6791_v50 }
0x3028   :  { %v8270_v26 = vpop.eup %8269 }
0x3029   :  { %v6619_v25 = vsel %vm256_vm2, %v8270_v26, 0.0 }
0x302a   :  { %6620 = vadd.xlane.f32.xlu0 %v6619_v25  ;;  %v7376_v25 = vld [vmem:[%s9595_s20 + $0x1] ss:$0 sm:$0xff] }
0x3040   :  { %6702 = vrot.lane.b32.xlu0 %v9345_v14, %s9659_s25  ;;  %v6810_v14 = vld [vmem:[#allocation10 + $0x28] sm:$0xff] }
0x3044   :  { %6788 = vrot.lane.b32.xlu0 %v6366_v52, %s9651_s24 }
0x30af   :  { %v6618_v27 = vpop.xlane.xlu0 %6617 }
0x30b0   :  { %8271 = vrcp.f32 %v6618_v27 }
0x30b3   :  { %v6621_v28 = vpop.xlane.xlu0 %6620 }
0x30b4   :  { %8273 = vrcp.f32 %v6621_v28 }
0x30b7   :  { %v6703_v29 = vpop.permute.xlu0 %6702 }
0x30b8   :  { %8062 = vmatpush3.msra.mxu1 %v6703_v29 }
0x30bb   :  { %v6789_v42 = vpop.permute.xlu0 %6788 }
0x30bc   :  { %v6804_v40 = vsel %vm1614_vm4, %v6802_v48, %v6789_v42  ;;  %v7390_v42 = vld [vmem:[%s9591_s16 + $0x1] ss:$0 sm:$0xff] }
0x30bd   :  { %v8272_v30 = vpop.eup %8271 }
0x30be   :  { %v6624_v18 = vmul.f32 %v8272_v30, %v8268_v10 }
0x30c0   :  { %8059 = vmatmul.mubr.msk.f32.vlgmr.msra.gmra.mxu0 %vm256_vm2, %v6624_v18 }
0x30c1   :  { %v8274_v31 = vpop.eup %8273  ;;  %8067 = vmatpush3.msra.mxu0 %v6812_v32  ;;  %v7383_v32 = vld [vmem:[%s9590_s15 + $0x50] sm:$0xff] }
0x30c2   :  { %v6625_v35 = vmul.f32 %v8274_v31, %v8270_v26  ;;  %8068 = vmatprep.subr.mxu0 %v6811_v34 }
0x30c3   :  { %8069 = vmatpush3.msra.mxu0 %v6811_v34  ;;  %v7382_v34 = vld [vmem:[%s9590_s15 + $0x48] sm:$0xff] }
0x30c4   :  { %8064 = vmatmul.mubr.msk.f32.vlgmr.msra.gmra.mxu1 %vm256_vm2, %v6625_v35  ;;  %8070 = vmatprep.subr.mxu0 %v6810_v14  ;;  %v7384_v35 = vld [vmem:[%s9590_s15 + $0x58] sm:$0xff] }
0x30c5   :  { %8071 = vmatpush3.msra.mxu0 %v6810_v14  ;;  %v7381_v14 = vld [vmem:[%s9590_s15 + $0x40] sm:$0xff] }
0x30c6   :  { %8072 = vmatprep.subr.mxu0 %v6809_v44 }
0x30c7   :  { %8073 = vmatpush3.msra.mxu0 %v6809_v44  ;;  %v7378_v44 = vld [vmem:[%s9589_s14 + $0x1] ss:$0 sm:$0xff] }
0x30c8   :  { %8088 = vmatprep.subr.mxu0 %v7388_v51 }
0x3180   :  { %v6698_v33 = vpop.f32.mrf.mxu0 }
0x3181   :  { %6796 = vrot.lane.b32.xlu0 %v6698_v33, %s9652_s7 }
0x3182   :  { %v8060_v11 = vpop.f32.mrf.mxu0 }
0x3184   :  { %v6774_v36 = vpop.f32.mrf.mxu1 }
0x3185   :  { %6798 = vrot.lane.b32.xlu1 %v6774_v36, %s9652_s7 }
0x3186   :  { %v8065_v37 = vpop.f32.mrf.mxu1 }
0x31f3   :  { %v6797_v53 = vpop.permute.xlu0 %6796 }
0x31f4   :  { %v6806_v54 = vsel %vm1617_vm3, %v6804_v40, %v6797_v53 }
0x31f5   :  { %8074 = vmatprep.mubr.msk.f32.mxu0 %vm171_vm0, %v6806_v54 }
0x31f7   :  { %v6799_v22 = vpop.permute.xlu1 %6798 }
0x31f8   :  { %v6807_v55 = vsel %vm1617_vm3, %v6805_v43, %v6799_v22 }
0x31f9   :  { %8075 = vmatmul.mubr.msk.f32.vlgmr.msra.gmra.mxu0 %vm171_vm0, %v6807_v55 }
0x31fa   :  { %8089 = vmatpush3.msra.mxu0 %v7388_v51 }
0x31fb   :  { %8090 = vmatprep.subr.mxu0 %v7387_v2 }
0x31fc   :  { %8091 = vmatpush3.msra.mxu0 %v7387_v2 }
0x31fd   :  { %8092 = vmatprep.subr.mxu0 %v7386_v45 }
0x31fe   :  { %8093 = vmatpush3.msra.mxu0 %v7386_v45 }
0x31ff   :  { %8094 = vmatprep.subr.mxu0 %v7385_v6 }
0x3200   :  { %8095 = vmatpush3.msra.mxu0 %v7385_v6 }
0x3201   :  { %8096 = vmatprep.subr.mxu0 %v7384_v35 }
0x3202   :  { %8097 = vmatpush3.msra.mxu0 %v7384_v35 }
0x3203   :  { %8098 = vmatprep.subr.mxu0 %v7383_v32 }
0x3204   :  { %8099 = vmatpush3.msra.mxu0 %v7383_v32 }
0x3205   :  { %8100 = vmatprep.subr.mxu0 %v7382_v34 }
0x3206   :  { %8101 = vmatpush3.msra.mxu0 %v7382_v34 }
0x3207   :  { %8102 = vmatprep.subr.mxu0 %v7381_v14 }
0x3208   :  { %8103 = vmatpush3.msra.mxu0 %v7381_v14 }
0x32b9   :  { %v8076_v56 = vpop.f32.mrf.mxu0 }
0x32ba   :  { %v6899_v59 = vadd.f32 %v8076_v56, %v7370_v47 }
0x32bb   :  { %v6893_v60 = vpop.f32.mrf.mxu0 }
0x32bc   :  { %v6903_v61 = vadd.f32 %v6899_v59, %v9336_v13  ;;  %v6894_v38 = vadd.f32 %v7370_v47, %v6893_v60 }
0x32be   :  { %v6902_v57 = vadd.f32 %v6894_v38, %v9332_v5  ;;  %v6911_v58 = vsel %vm171_vm0, %v6903_v61, 0.0  ;;  %v6954_v5 = vld [vmem:[#allocation11 + $0x38] sm:$0xff] }
0x32bf   :  { %6912 = vadd.xlane.f32.xlu1 %v6911_v58  ;;  %8077 = vmatprep.subr.mxu1 %v6954_v5 }
0x32c0   :  { %v6908_v49 = vsel %vm171_vm0, %v6902_v57, 0.0  ;;  %8078 = vmatpush3.msra.mxu1 %v6954_v5  ;;  %v7396_v5 = vld [vmem:[%s9597_s22 + $0x1] ss:$0 sm:$0xff] }
0x32c1   :  { %6909 = vadd.xlane.f32.xlu0 %v6908_v49  ;;  %8079 = vmatprep.subr.mxu1 %v6953_v8 }
0x32c2   :  { %8080 = vmatpush3.msra.mxu1 %v6953_v8 }
0x32c3   :  { %8081 = vmatprep.subr.mxu1 %v6952_v9 }
0x32c4   :  { %8082 = vmatpush3.msra.mxu1 %v6952_v9 }
0x32c5   :  { %8083 = vmatprep.subr.mxu1 %v6951_v12 }
0x32c6   :  { %8084 = vmatpush3.msra.mxu1 %v6951_v12 }
0x3348   :  { %v6913_v62 = vpop.xlane.xlu1 %6912 }
0x3349   :  { %v6915_v15 = vmul.f32 0.03125, %v6913_v62 }
0x334a   :  { %v6910_v0 = vpop.xlane.xlu0 %6909 }
0x334b   :  { %v6914_v52 = vmul.f32 0.03125, %v6910_v0  ;;  %v6917_v63 = vsub.f32 %v6903_v61, %v6915_v15 }
0x334d   :  { %v6916_v3 = vsub.f32 %v6902_v57, %v6914_v52  ;;  %v6919_v7 = vmul.f32 %v6917_v63, %v6917_v63 }
0x334f   :  { %v6918_v1 = vmul.f32 %v6916_v3, %v6916_v3  ;;  %v6923_v13 = vsel %vm171_vm0, %v6919_v7, 0.0 }
0x3351   :  { %v6920_v4 = vsel %vm171_vm0, %v6918_v1, 0.0 }
0x3352   :  { %6921 = vadd.xlane.f32.xlu0 %v6920_v4  ;;  %v7395_v4 = vld [vmem:[%s9596_s21 + $0x1] ss:$0 sm:$0xff] }
0x3356   :  { %6924 = vadd.xlane.f32.xlu0 %v6923_v13 }
0x33db   :  { %v6922_v17 = vpop.xlane.xlu0 %6921 }
0x33dc   :  { %v6926_v19 = vmul.f32 0.03125, %v6922_v17 }
0x33de   :  { %v6928_v20 = vadd.f32 1e-05, %v6926_v19 }
0x33df   :  { %v6925_v21 = vpop.xlane.xlu0 %6924 }
0x33e0   :  { %8275 = vrsqrt.f32 %v6928_v20  ;;  %v6927_v23 = vmul.f32 0.03125, %v6925_v21 }
0x33e2   :  { %v6929_v24 = vadd.f32 1e-05, %v6927_v23 }
0x33e4   :  { %8277 = vrsqrt.f32 %v6929_v24 }
0x33ed   :  { %v8276_v10 = vpop.eup %8275 }
0x33ee   :  { %v6932_v26 = vmul.f32 %v8276_v10, %v6916_v3 }
0x33f0   :  { %v6940_v27 = vmul.f32 %v7375_v16, %v6932_v26 }
0x33f1   :  { %v8278_v28 = vpop.eup %8277 }
0x33f2   :  { %v6933_v29 = vmul.f32 %v8278_v28, %v6917_v63  ;;  %v6948_v30 = vadd.f32 %v7376_v25, %v6940_v27 }
0x33f4   :  { %v6941_v18 = vmul.f32 %v7375_v16, %v6933_v29  ;;  %8085 = vmatprep.mubr.msk.f32.mxu1 %vm171_vm0, %v6948_v30 }
0x33f6   :  { %v6949_v31 = vadd.f32 %v7376_v25, %v6941_v18 }
0x33f8   :  { %8086 = vmatmul.mubr.msk.f32.vlgmr.msra.gmra.mxu1 %vm171_vm0, %v6949_v31 }
0x34b8   :  { %v8087_v33 = vpop.f32.mrf.mxu1 }
0x34b9   :  { %v7041_v11 = vadd.f32 %v8087_v33, %v7378_v44 }
0x34ba   :  { %v7035_v36 = vpop.f32.mrf.mxu1 }
0x34bb   :  { %v7036_v37 = vadd.f32 %v7378_v44, %v7035_v36  ;;  %v7045_v41 = vmax.f32 %v7041_v11, 0.0 }
0x34bd   :  { %v7044_v39 = vmax.f32 %v7036_v37, 0.0 }
0x34bf   :  { %8104 = vmatprep.mubr.msk.f32.mxu0 %vm3544_vm5, %v7044_v39 }
0x34c0   :  { %8105 = vmatmul.mubr.msk.f32.vlgmr.msra.gmra.mxu0 %vm3544_vm5, %v7045_v41 }
0x3580   :  { %v8106_v48 = vpop.f32.mrf.mxu0 }
0x3581   :  { %v7141_v50 = vadd.f32 %v8106_v48, %v7390_v42 }
0x3582   :  { %v7135_v40 = vpop.f32.mrf.mxu0 }
0x3583   :  { %v7145_v53 = vadd.f32 %v7141_v50, %v6949_v31  ;;  %v7136_v54 = vadd.f32 %v7390_v42, %v7135_v40 }
0x3585   :  { %v7144_v46 = vadd.f32 %v7136_v54, %v6948_v30  ;;  %v7153_v43 = vsel %vm171_vm0, %v7145_v53, 0.0 }
0x3586   :  { %7154 = vadd.xlane.f32.xlu0 %v7153_v43 }
0x3587   :  { %v7150_v22 = vsel %vm171_vm0, %v7144_v46, 0.0 }
0x3588   :  { %7151 = vadd.xlane.f32.xlu1 %v7150_v22 }
0x360f   :  { %v7155_v55 = vpop.xlane.xlu0 %7154 }
0x3610   :  { %v7157_v47 = vmul.f32 0.03125, %v7155_v55 }
0x3611   :  { %v7152_v56 = vpop.xlane.xlu1 %7151 }
0x3612   :  { %v7159_v59 = vsub.f32 %v7145_v53, %v7157_v47  ;;  %v7156_v60 = vmul.f32 0.03125, %v7152_v56 }
0x3614   :  { %v7158_v61 = vsub.f32 %v7144_v46, %v7156_v60  ;;  %v7161_v38 = vmul.f32 %v7159_v59, %v7159_v59 }
0x3616   :  { %v7165_v57 = vsel %vm171_vm0, %v7161_v38, 0.0  ;;  %v7160_v58 = vmul.f32 %v7158_v61, %v7158_v61 }
0x3617   :  { %7166 = vadd.xlane.f32.xlu0 %v7165_v57 }
0x3618   :  { %v7162_v49 = vsel %vm171_vm0, %v7160_v58, 0.0 }
0x3619   :  { %7163 = vadd.xlane.f32.xlu1 %v7162_v49 }
0x36a0   :  { %v7167_v62 = vpop.xlane.xlu0 %7166 }
0x36a1   :  { %v7169_v15 = vmul.f32 0.03125, %v7167_v62 }
0x36a2   :  { %v7164_v0 = vpop.xlane.xlu1 %7163 }
0x36a3   :  { %v7171_v52 = vadd.f32 1e-05, %v7169_v15  ;;  %v7168_v63 = vmul.f32 0.03125, %v7164_v0 }
0x36a5   :  { %8279 = vrsqrt.f32 %v7171_v52  ;;  %v7170_v3 = vadd.f32 1e-05, %v7168_v63 }
0x36a7   :  { %8281 = vrsqrt.f32 %v7170_v3 }
0x36b2   :  { %v8280_v1 = vpop.eup %8279 }
0x36b3   :  { %v7175_v7 = vmul.f32 %v8280_v1, %v7159_v59 }
0x36b4   :  { %v8282_v13 = vpop.eup %8281 }
0x36b5   :  { %v7174_v8 = vmul.f32 %v8282_v13, %v7158_v61  ;;  %v7183_v9 = vmul.f32 %v7395_v4, %v7175_v7 }
0x36b7   :  { %v7182_v12 = vmul.f32 %v7395_v4, %v7174_v8  ;;  %v7191_v51 = vadd.f32 %v7396_v5, %v7183_v9 }
0x36b9   :  { %v7190_v2 = vadd.f32 %v7396_v5, %v7182_v12  ;;  %7193 = vst.msk [vmem:[#allocation13 + $0x8] sm:$0xff] %vm171_vm0, %v7191_v51 }
0x36bb   :  { %7192 = vst.msk [vmem:[#allocation13] sm:$0xff] %vm171_vm0, %v7190_v2 }
0x36bc   :  { %8417 = shalt.err (!%p8414_p6)
}
0x36bd   :  { %s9664_s21 = smov 128   ;;  %s9665_s25 = sld [smem:[#allocation27_spill]] }
0x36c3   :  { %7205 = dma.vmem_to_hbm [thread:$0]  %s7200_s30, 256, %s9665_s25, [#allocation4], %s9664_s21, %s9664_s21, %s9650_s26  }
0x36c4   :  { %8434 = dma.done.wait [#allocation4], 256  }
0x36c5   :  { %8435 = vsyncadd [#allocation4], 4294967040 }
0x36c6   :  { %7209 = vsyncpa [#allocation3], 1 }
0x36c7   :  { %7210 = vsyncpa [#allocation6], 1 }
0x36c8   :  { %7211 = vsyncpa [#allocation9], 1 }
0x36c9   :  { %7212 = vsyncpa [#allocation12], 1 }
0x36ca   :  { %7213 = vsyncpa [#allocation4], 1 }

</bundles_post_ra>
